<compile_context>
chip_gen: v6e
topology: v6e:2x2x1
jax: 0.10.0
libtpu: 0.0.40
codegen_flags: <defaults>
</compile_context>

<pallas_src>
import functools
import math

import jax
import jax.numpy as jnp
from jax.experimental import pallas as pl
from jax.experimental.pallas import tpu as pltpu  # noqa: F401  (kept for TPU params if needed)

# ---- model hyper-params (small, consistent with the module __init__) --------
D_MODEL = 32
NHEAD = 4
DIM_FF = 64
NUM_LAYERS = 2
DROPOUT = 0.0          # eval-mode semantics: dropout is identity
EPS = 1e-5             # torch.nn.LayerNorm default eps

BATCH = 2
T_TGT = 8
S_MEM = 12


# ----------------------------- kernel math -----------------------------------
def _layer_norm(x, w, b):
    mu = jnp.mean(x, axis=-1, keepdims=True)
    var = jnp.mean((x - mu) ** 2, axis=-1, keepdims=True)
    return (x - mu) * jax.lax.rsqrt(var + EPS) * w + b


def _attention_one(qb, kb, vb, nhead, mask):
    """Scaled-dot-product attention for ONE batch element.

    qb: (Tq, D)  (1/sqrt(dh) scale already folded into the Q projection),
    kb/vb: (Tk, D), mask: (Tq, Tk) additive or None.
    Heads are static lane slices; head outputs are lane-concatenated so the
    output projection is a single (Tq,D)@(D,D) matmul outside this function.
    """
    d = qb.shape[-1]
    dh = d // nhead
    heads = []
    for h in range(nhead):
        qh = qb[:, h * dh:(h + 1) * dh]
        kh = kb[:, h * dh:(h + 1) * dh]
        vh = vb[:, h * dh:(h + 1) * dh]
        s = jnp.dot(qh, kh.T, preferred_element_type=jnp.float32)
        if mask is not None:
            s = s + mask
        s = s - jnp.max(s, axis=-1, keepdims=True)
        p = jnp.exp(s)
        # divide -> EUP reciprocal (separate VLIW slot) + one VALU multiply
        p = p * pl.reciprocal(jnp.sum(p, axis=-1, keepdims=True), approx=True)
        heads.append(jnp.dot(p, vh, preferred_element_type=jnp.float32))
    return jnp.concatenate(heads, axis=-1)          # (Tq, D)


def fused_decoder_kernel(tgt_ref, mem_ref, mask_ref,
                         sa_wt_ref, sa_b_ref, sa_owt_ref, sa_ob_ref,
                         ca_wt_ref, ca_b_ref, ca_owt_ref, ca_ob_ref,
                         l1_wt_ref, l1_b_ref, l2_wt_ref, l2_b_ref,
                         n1_w_ref, n1_b_ref, n2_w_ref, n2_b_ref,
                         n3_w_ref, n3_b_ref,
                         fin_w_ref, fin_b_ref,
                         out_ref, *, nhead):
    """Entire decoder (all layers + final LayerNorm) in a single invocation.

    tgt_ref: (B*T, D)  batch folded into sublanes.
    mem_ref: (B, S, D) kept 3-D so per-batch slices stay sublane-aligned
             (S=12 is not a multiple of 8).
    All weights are pre-transposed, per-layer-stacked along a leading axis.
    """
    batch, _, d = mem_ref.shape
    t_tgt = tgt_ref.shape[0] // batch
    num_layers = sa_wt_ref.shape[0]

    x = tgt_ref[...]                                  # (B*T, D)
    mask = mask_ref[...]                              # (T, T) additive
    mems = [mem_ref[b] for b in range(batch)]         # hoisted, loaded once

    for l in range(num_layers):                       # static unroll over layers
        # ---- self-attention: fused QKV projection over the whole batch ------
        qkv = (jnp.dot(x, sa_wt_ref[l], preferred_element_type=jnp.float32)
               + sa_b_ref[l])                         # (B*T, 3D), q cols pre-scaled
        rows = []
        for b in range(batch):
            r0 = b * t_tgt
            rows.append(_attention_one(qkv[r0:r0 + t_tgt, :d],
                                       qkv[r0:r0 + t_tgt, d:2 * d],
                                       qkv[r0:r0 + t_tgt, 2 * d:],
                                       nhead, mask))
        att = jnp.concatenate(rows, axis=0)           # (B*T, D)
        att = (jnp.dot(att, sa_owt_ref[l], preferred_element_type=jnp.float32)
               + sa_ob_ref[l])
        x = _layer_norm(x + att, n1_w_ref[l], n1_b_ref[l])

        # ---- cross-attention -------------------------------------------------
        cw = ca_wt_ref[l]                             # (D, 3D) pre-transposed
        cb = ca_b_ref[l]                              # (1, 3D)
        q = (jnp.dot(x, cw[:, :d], preferred_element_type=jnp.float32)
             + cb[:, :d])                             # (B*T, D), pre-scaled
        rows = []
        for b in range(batch):
            kv = (jnp.dot(mems[b], cw[:, d:], preferred_element_type=jnp.float32)
                  + cb[:, d:])                        # (S, 2D), one fused KV dot
            rows.append(_attention_one(q[b * t_tgt:(b + 1) * t_tgt],
                                       kv[:, :d], kv[:, d:], nhead, None))
        att = jnp.concatenate(rows, axis=0)
        att = (jnp.dot(att, ca_owt_ref[l], preferred_element_type=jnp.float32)
               + ca_ob_ref[l])
        x = _layer_norm(x + att, n2_w_ref[l], n2_b_ref[l])

        # ---- feed-forward: Linear -> ReLU -> Linear --------------------------
        h = jnp.maximum(
            jnp.dot(x, l1_wt_ref[l], preferred_element_type=jnp.float32)
            + l1_b_ref[l], 0.0)
        ff = (jnp.dot(h, l2_wt_ref[l], preferred_element_type=jnp.float32)
              + l2_b_ref[l])
        x = _layer_norm(x + ff, n3_w_ref[l], n3_b_ref[l])

    # final LayerNorm fused into the same kernel (no extra launch / HBM trip)
    # TODO(synk): a lane-dense (B*T*D/128, 128) output would avoid masked
    # stores for D=32, but the (16,32)->(4,128) in-kernel reshape is not
    # guaranteed to lower cleanly on all generations, so keep the (B*T, D) store.
    out_ref[...] = _layer_norm(x, fin_w_ref[...], fin_b_ref[...])


# ------------------------------- wrappers -------------------------------------
_STACK_KEYS = ('sa_wt', 'sa_b', 'sa_owt', 'sa_ob',
               'ca_wt', 'ca_b', 'ca_owt', 'ca_ob',
               'l1_wt', 'l1_b', 'l2_wt', 'l2_b',
               'n1_w', 'n1_b', 'n2_w', 'n2_b', 'n3_w', 'n3_b')


def prepare_params(layer_params, nhead):
    """Host-side, one-time: pre-transpose weights, fold 1/sqrt(dh) into the Q
    projection (weights AND bias), and stack all layers on a leading axis."""
    d = layer_params[0]['sa_w'].shape[1]
    scale = 1.0 / math.sqrt(d // nhead)
    qscale = jnp.concatenate([jnp.full((d,), scale, jnp.float32),
                              jnp.ones((2 * d,), jnp.float32)])[None, :]   # (1, 3D)
    acc = {k: [] for k in _STACK_KEYS}
    for p in layer_params:
        acc['sa_wt'].append(p['sa_w'].T * qscale)     # (D, 3D)
        acc['sa_b'].append(p['sa_b'] * qscale)        # (1, 3D)
        acc['sa_owt'].append(p['sa_ow'].T)            # (D, D)
        acc['sa_ob'].append(p['sa_ob'])
        acc['ca_wt'].append(p['ca_w'].T * qscale)
        acc['ca_b'].append(p['ca_b'] * qscale)
        acc['ca_owt'].append(p['ca_ow'].T)
        acc['ca_ob'].append(p['ca_ob'])
        acc['l1_wt'].append(p['l1_w'].T)              # (D, FF)
        acc['l1_b'].append(p['l1_b'])
        acc['l2_wt'].append(p['l2_w'].T)              # (FF, D)
        acc['l2_b'].append(p['l2_b'])
        for k in ('n1_w', 'n1_b', 'n2_w', 'n2_b', 'n3_w', 'n3_b'):
            acc[k].append(p[k])
    return {k: jnp.stack(v, axis=0) for k, v in acc.items()}


def decoder_forward(tgt, memory, tgt_mask, stacked, final_w, final_b, nhead=NHEAD):
    """Equivalent of Decoder.forward(tgt, memory, tgt_mask), batch-first I/O."""
    B, T, D = tgt.shape
    kernel = functools.partial(fused_decoder_kernel, nhead=nhead)
    args = ([tgt.reshape(B * T, D), memory, tgt_mask]
            + [stacked[k] for k in _STACK_KEYS]
            + [final_w, final_b])
    # Single invocation, no grid: all weights (~90 KB) and activations stay
    # VMEM-resident for the whole decoder; zero per-layer launch/DMA overhead.
    # TODO(synk): for large batch add a leading "parallel" batch grid axis
    # (pays off on v7x's 2 TensorCores); at B=2 a single call is cheaper.
    out2d = pl.pallas_call(
        kernel,
        out_shape=jax.ShapeDtypeStruct((B * T, D), jnp.float32),
    )(*args)
    return out2d.reshape(B, T, D)


# ------------------------- deterministic parameter init -----------------------
def init_params(key):
    def dense(k, shape, fan_in):
        return jax.random.uniform(k, shape, jnp.float32, -1.0, 1.0) / math.sqrt(fan_in)

    layers = []
    for l in range(NUM_LAYERS):
        ks = jax.random.split(jax.random.fold_in(key, l), 18)
        p = {
            'sa_w': dense(ks[0], (3 * D_MODEL, D_MODEL), D_MODEL),
            'sa_b': dense(ks[1], (1, 3 * D_MODEL), D_MODEL),
            'sa_ow': dense(ks[2], (D_MODEL, D_MODEL), D_MODEL),
            'sa_ob': dense(ks[3], (1, D_MODEL), D_MODEL),
            'ca_w': dense(ks[4], (3 * D_MODEL, D_MODEL), D_MODEL),
            'ca_b': dense(ks[5], (1, 3 * D_MODEL), D_MODEL),
            'ca_ow': dense(ks[6], (D_MODEL, D_MODEL), D_MODEL),
            'ca_ob': dense(ks[7], (1, D_MODEL), D_MODEL),
            'l1_w': dense(ks[8], (DIM_FF, D_MODEL), D_MODEL),
            'l1_b': dense(ks[9], (1, DIM_FF), D_MODEL),
            'l2_w': dense(ks[10], (D_MODEL, DIM_FF), DIM_FF),
            'l2_b': dense(ks[11], (1, D_MODEL), DIM_FF),
            'n1_w': jnp.ones((1, D_MODEL), jnp.float32),
            'n1_b': jnp.zeros((1, D_MODEL), jnp.float32),
            'n2_w': jnp.ones((1, D_MODEL), jnp.float32),
            'n2_b': jnp.zeros((1, D_MODEL), jnp.float32),
            'n3_w': jnp.ones((1, D_MODEL), jnp.float32),
            'n3_b': jnp.zeros((1, D_MODEL), jnp.float32),
        }
        layers.append(p)
    final_w = jnp.ones((1, D_MODEL), jnp.float32)
    final_b = jnp.zeros((1, D_MODEL), jnp.float32)
    return layers, final_w, final_b


# ------------------------------ pure-JAX reference -----------------------------
def reference_forward(tgt, memory, tgt_mask, layer_params, final_w, final_b, nhead):
    def mha(q_in, kv_in, w_in, b_in, w_out, b_out, mask):
        d = q_in.shape[-1]
        dh = d // nhead
        scale = 1.0 / math.sqrt(dh)
        q = q_in @ w_in[:d].T + b_in[:, :d]
        k = kv_in @ w_in[d:2 * d].T + b_in[:, d:2 * d]
        v = kv_in @ w_in[2 * d:].T + b_in[:, 2 * d:]
        qh = q.reshape(-1, nhead, dh).transpose(1, 0, 2)
        kh = k.reshape(-1, nhead, dh).transpose(1, 0, 2)
        vh = v.reshape(-1, nhead, dh).transpose(1, 0, 2)
        s = jnp.einsum('hqd,hkd->hqk', qh, kh) * scale
        if mask is not None:
            s = s + mask
        p = jax.nn.softmax(s, axis=-1)
        o = jnp.einsum('hqk,hkd->hqd', p, vh).transpose(1, 0, 2).reshape(-1, d)
        return o @ w_out.T + b_out

    def ln(x, w, b):
        mu = jnp.mean(x, axis=-1, keepdims=True)
        var = jnp.mean((x - mu) ** 2, axis=-1, keepdims=True)
        return (x - mu) * jax.lax.rsqrt(var + EPS) * w + b

    def one(x, mem):
        for p in layer_params:
            sa = mha(x, x, p['sa_w'], p['sa_b'], p['sa_ow'], p['sa_ob'], tgt_mask)
            x = ln(x + sa, p['n1_w'], p['n1_b'])
            ca = mha(x, mem, p['ca_w'], p['ca_b'], p['ca_ow'], p['ca_ob'], None)
            x = ln(x + ca, p['n2_w'], p['n2_b'])
            h = jnp.maximum(x @ p['l1_w'].T + p['l1_b'], 0.0)
            ff = h @ p['l2_w'].T + p['l2_b']
            x = ln(x + ff, p['n3_w'], p['n3_b'])
        return ln(x, final_w, final_b)

    return jax.vmap(one)(tgt, memory)


# ------------------------------------ main -------------------------------------
if __name__ == "__main__":
    key = jax.random.PRNGKey(0)
    k_tgt, k_mem, k_par = jax.random.split(key, 3)

    tgt = jax.random.normal(k_tgt, (BATCH, T_TGT, D_MODEL), jnp.float32)
    memory = jax.random.normal(k_mem, (BATCH, S_MEM, D_MODEL), jnp.float32)
    # causal (square subsequent) additive mask; -1e9 instead of -inf for safety
    causal = jnp.tril(jnp.ones((T_TGT, T_TGT), jnp.float32))
    tgt_mask = jnp.where(causal == 1.0, 0.0, -1e9).astype(jnp.float32)

    layer_params, final_w, final_b = init_params(k_par)
    stacked = prepare_params(layer_params, NHEAD)

    out = decoder_forward(tgt, memory, tgt_mask, stacked, final_w, final_b)
    out = jax.block_until_ready(out)

    ref = reference_forward(tgt, memory, tgt_mask, layer_params, final_w, final_b, NHEAD)
    ref = jax.block_until_ready(ref)

    assert out.shape == (BATCH, T_TGT, D_MODEL)
    # tolerance accounts for the approx (EUP) reciprocal in the softmax
    assert jnp.allclose(out, ref, atol=5e-3, rtol=5e-3), \
        f"max abs diff {jnp.max(jnp.abs(out - ref))}"

    print("KERNEL_OK")
</pallas_src>

<mosaic_0001>
module attributes {stable_mosaic.version = 11 : i64} {
  func.func @fused_decoder_kernel(%arg0: memref<16x32xf32, #tpu.memory_space<vmem>>, %arg1: memref<2x12x32xf32, #tpu.memory_space<vmem>>, %arg2: memref<8x8xf32, #tpu.memory_space<vmem>>, %arg3: memref<2x32x96xf32, #tpu.memory_space<vmem>>, %arg4: memref<2x1x96xf32, #tpu.memory_space<vmem>>, %arg5: memref<2x32x32xf32, #tpu.memory_space<vmem>>, %arg6: memref<2x1x32xf32, #tpu.memory_space<vmem>>, %arg7: memref<2x32x96xf32, #tpu.memory_space<vmem>>, %arg8: memref<2x1x96xf32, #tpu.memory_space<vmem>>, %arg9: memref<2x32x32xf32, #tpu.memory_space<vmem>>, %arg10: memref<2x1x32xf32, #tpu.memory_space<vmem>>, %arg11: memref<2x32x64xf32, #tpu.memory_space<vmem>>, %arg12: memref<2x1x64xf32, #tpu.memory_space<vmem>>, %arg13: memref<2x64x32xf32, #tpu.memory_space<vmem>>, %arg14: memref<2x1x32xf32, #tpu.memory_space<vmem>>, %arg15: memref<2x1x32xf32, #tpu.memory_space<vmem>>, %arg16: memref<2x1x32xf32, #tpu.memory_space<vmem>>, %arg17: memref<2x1x32xf32, #tpu.memory_space<vmem>>, %arg18: memref<2x1x32xf32, #tpu.memory_space<vmem>>, %arg19: memref<2x1x32xf32, #tpu.memory_space<vmem>>, %arg20: memref<2x1x32xf32, #tpu.memory_space<vmem>>, %arg21: memref<1x32xf32, #tpu.memory_space<vmem>>, %arg22: memref<1x32xf32, #tpu.memory_space<vmem>>, %arg23: memref<16x32xf32, #tpu.memory_space<vmem>>) attributes {dimension_semantics = [], scalar_prefetch = 0 : i64, scratch_operands = 0 : i64, tpu.core_type = #tpu.core_type<tc>} {
    %c0 = arith.constant 0 : index
    %c0_0 = arith.constant 0 : index
    %0 = vector.load %arg0[%c0, %c0_0] : memref<16x32xf32, #tpu.memory_space<vmem>>, vector<16x32xf32>
    %c0_1 = arith.constant 0 : index
    %c0_2 = arith.constant 0 : index
    %1 = vector.load %arg2[%c0_1, %c0_2] : memref<8x8xf32, #tpu.memory_space<vmem>>, vector<8x8xf32>
    %c0_3 = arith.constant 0 : index
    %c0_4 = arith.constant 0 : index
    %c0_5 = arith.constant 0 : index
    %2 = vector.load %arg1[%c0_3, %c0_4, %c0_5] : memref<2x12x32xf32, #tpu.memory_space<vmem>>, vector<1x12x32xf32>
    %3 = vector.shape_cast %2 : vector<1x12x32xf32> to vector<12x32xf32>
    %c1 = arith.constant 1 : index
    %c0_6 = arith.constant 0 : index
    %c0_7 = arith.constant 0 : index
    %4 = vector.load %arg1[%c1, %c0_6, %c0_7] : memref<2x12x32xf32, #tpu.memory_space<vmem>>, vector<1x12x32xf32>
    %5 = vector.shape_cast %4 : vector<1x12x32xf32> to vector<12x32xf32>
    %c0_8 = arith.constant 0 : index
    %c0_9 = arith.constant 0 : index
    %c0_10 = arith.constant 0 : index
    %6 = vector.load %arg3[%c0_8, %c0_9, %c0_10] : memref<2x32x96xf32, #tpu.memory_space<vmem>>, vector<1x32x96xf32>
    %7 = vector.shape_cast %6 : vector<1x32x96xf32> to vector<32x96xf32>
    %cst = arith.constant dense<0.000000e+00> : vector<16x96xf32>
    %8 = tpu.matmul %0, %7, %cst {dimension_numbers = #tpu.dot_dimension_numbers<[1], [0], [0], [1], [0, 0, 1, 1], [], []>} : vector<16x32xf32>, vector<32x96xf32>, vector<16x96xf32> -> vector<16x96xf32>
    %c0_11 = arith.constant 0 : index
    %c0_12 = arith.constant 0 : index
    %c0_13 = arith.constant 0 : index
    %9 = vector.load %arg4[%c0_11, %c0_12, %c0_13] : memref<2x1x96xf32, #tpu.memory_space<vmem>>, vector<1x1x96xf32>
    %10 = vector.shape_cast %9 : vector<1x1x96xf32> to vector<1x96xf32>
    %11 = vector.broadcast %10 : vector<1x96xf32> to vector<16x96xf32>
    %12 = arith.addf %8, %11 : vector<16x96xf32>
    %13 = vector.extract_strided_slice %12 {offsets = [0, 0], sizes = [8, 32], strides = [1, 1]} : vector<16x96xf32> to vector<8x32xf32>
    %14 = vector.extract_strided_slice %12 {offsets = [0, 32], sizes = [8, 32], strides = [1, 1]} : vector<16x96xf32> to vector<8x32xf32>
    %15 = vector.extract_strided_slice %12 {offsets = [0, 64], sizes = [8, 32], strides = [1, 1]} : vector<16x96xf32> to vector<8x32xf32>
    %16 = vector.extract_strided_slice %13 {offsets = [0, 0], sizes = [8, 8], strides = [1, 1]} : vector<8x32xf32> to vector<8x8xf32>
    %17 = vector.extract_strided_slice %14 {offsets = [0, 0], sizes = [8, 8], strides = [1, 1]} : vector<8x32xf32> to vector<8x8xf32>
    %18 = vector.extract_strided_slice %15 {offsets = [0, 0], sizes = [8, 8], strides = [1, 1]} : vector<8x32xf32> to vector<8x8xf32>
    %19 = tpu.transpose %17, [1, 0] : vector<8x8xf32> -> vector<8x8xf32>
    %cst_14 = arith.constant dense<0.000000e+00> : vector<8x8xf32>
    %20 = tpu.matmul %16, %19, %cst_14 {dimension_numbers = #tpu.dot_dimension_numbers<[1], [0], [0], [1], [0, 0, 1, 1], [], []>} : vector<8x8xf32>, vector<8x8xf32>, vector<8x8xf32> -> vector<8x8xf32>
    %21 = arith.addf %20, %1 : vector<8x8xf32>
    %cst_15 = arith.constant dense<0xFF800000> : vector<8xf32>
    %22 = vector.multi_reduction <maximumf>, %21, %cst_15 [1] : vector<8x8xf32> to vector<8xf32>
    %23 = vector.shape_cast %22 : vector<8xf32> to vector<8x1xf32>
    %24 = vector.broadcast %23 : vector<8x1xf32> to vector<8x8xf32>
    %25 = arith.subf %21, %24 : vector<8x8xf32>
    %26 = math.exp %25 : vector<8x8xf32>
    %cst_16 = arith.constant dense<0.000000e+00> : vector<8xf32>
    %27 = vector.multi_reduction <add>, %26, %cst_16 [1] : vector<8x8xf32> to vector<8xf32>
    %28 = vector.shape_cast %27 : vector<8xf32> to vector<8x1xf32>
    %29 = tpu.reciprocal %28 {approx = true} : vector<8x1xf32> -> vector<8x1xf32>
    %30 = vector.broadcast %29 : vector<8x1xf32> to vector<8x8xf32>
    %31 = arith.mulf %26, %30 : vector<8x8xf32>
    %cst_17 = arith.constant dense<0.000000e+00> : vector<8x8xf32>
    %32 = tpu.matmul %31, %18, %cst_17 {dimension_numbers = #tpu.dot_dimension_numbers<[1], [0], [0], [1], [0, 0, 1, 1], [], []>} : vector<8x8xf32>, vector<8x8xf32>, vector<8x8xf32> -> vector<8x8xf32>
    %33 = vector.extract_strided_slice %13 {offsets = [0, 8], sizes = [8, 8], strides = [1, 1]} : vector<8x32xf32> to vector<8x8xf32>
    %34 = vector.extract_strided_slice %14 {offsets = [0, 8], sizes = [8, 8], strides = [1, 1]} : vector<8x32xf32> to vector<8x8xf32>
    %35 = vector.extract_strided_slice %15 {offsets = [0, 8], sizes = [8, 8], strides = [1, 1]} : vector<8x32xf32> to vector<8x8xf32>
    %36 = tpu.transpose %34, [1, 0] : vector<8x8xf32> -> vector<8x8xf32>
    %cst_18 = arith.constant dense<0.000000e+00> : vector<8x8xf32>
    %37 = tpu.matmul %33, %36, %cst_18 {dimension_numbers = #tpu.dot_dimension_numbers<[1], [0], [0], [1], [0, 0, 1, 1], [], []>} : vector<8x8xf32>, vector<8x8xf32>, vector<8x8xf32> -> vector<8x8xf32>
    %38 = arith.addf %37, %1 : vector<8x8xf32>
    %cst_19 = arith.constant dense<0xFF800000> : vector<8xf32>
    %39 = vector.multi_reduction <maximumf>, %38, %cst_19 [1] : vector<8x8xf32> to vector<8xf32>
    %40 = vector.shape_cast %39 : vector<8xf32> to vector<8x1xf32>
    %41 = vector.broadcast %40 : vector<8x1xf32> to vector<8x8xf32>
    %42 = arith.subf %38, %41 : vector<8x8xf32>
    %43 = math.exp %42 : vector<8x8xf32>
    %cst_20 = arith.constant dense<0.000000e+00> : vector<8xf32>
    %44 = vector.multi_reduction <add>, %43, %cst_20 [1] : vector<8x8xf32> to vector<8xf32>
    %45 = vector.shape_cast %44 : vector<8xf32> to vector<8x1xf32>
    %46 = tpu.reciprocal %45 {approx = true} : vector<8x1xf32> -> vector<8x1xf32>
    %47 = vector.broadcast %46 : vector<8x1xf32> to vector<8x8xf32>
    %48 = arith.mulf %43, %47 : vector<8x8xf32>
    %cst_21 = arith.constant dense<0.000000e+00> : vector<8x8xf32>
    %49 = tpu.matmul %48, %35, %cst_21 {dimension_numbers = #tpu.dot_dimension_numbers<[1], [0], [0], [1], [0, 0, 1, 1], [], []>} : vector<8x8xf32>, vector<8x8xf32>, vector<8x8xf32> -> vector<8x8xf32>
    %50 = vector.extract_strided_slice %13 {offsets = [0, 16], sizes = [8, 8], strides = [1, 1]} : vector<8x32xf32> to vector<8x8xf32>
    %51 = vector.extract_strided_slice %14 {offsets = [0, 16], sizes = [8, 8], strides = [1, 1]} : vector<8x32xf32> to vector<8x8xf32>
    %52 = vector.extract_strided_slice %15 {offsets = [0, 16], sizes = [8, 8], strides = [1, 1]} : vector<8x32xf32> to vector<8x8xf32>
    %53 = tpu.transpose %51, [1, 0] : vector<8x8xf32> -> vector<8x8xf32>
    %cst_22 = arith.constant dense<0.000000e+00> : vector<8x8xf32>
    %54 = tpu.matmul %50, %53, %cst_22 {dimension_numbers = #tpu.dot_dimension_numbers<[1], [0], [0], [1], [0, 0, 1, 1], [], []>} : vector<8x8xf32>, vector<8x8xf32>, vector<8x8xf32> -> vector<8x8xf32>
    %55 = arith.addf %54, %1 : vector<8x8xf32>
    %cst_23 = arith.constant dense<0xFF800000> : vector<8xf32>
    %56 = vector.multi_reduction <maximumf>, %55, %cst_23 [1] : vector<8x8xf32> to vector<8xf32>
    %57 = vector.shape_cast %56 : vector<8xf32> to vector<8x1xf32>
    %58 = vector.broadcast %57 : vector<8x1xf32> to vector<8x8xf32>
    %59 = arith.subf %55, %58 : vector<8x8xf32>
    %60 = math.exp %59 : vector<8x8xf32>
    %cst_24 = arith.constant dense<0.000000e+00> : vector<8xf32>
    %61 = vector.multi_reduction <add>, %60, %cst_24 [1] : vector<8x8xf32> to vector<8xf32>
    %62 = vector.shape_cast %61 : vector<8xf32> to vector<8x1xf32>
    %63 = tpu.reciprocal %62 {approx = true} : vector<8x1xf32> -> vector<8x1xf32>
    %64 = vector.broadcast %63 : vector<8x1xf32> to vector<8x8xf32>
    %65 = arith.mulf %60, %64 : vector<8x8xf32>
    %cst_25 = arith.constant dense<0.000000e+00> : vector<8x8xf32>
    %66 = tpu.matmul %65, %52, %cst_25 {dimension_numbers = #tpu.dot_dimension_numbers<[1], [0], [0], [1], [0, 0, 1, 1], [], []>} : vector<8x8xf32>, vector<8x8xf32>, vector<8x8xf32> -> vector<8x8xf32>
    %67 = vector.extract_strided_slice %13 {offsets = [0, 24], sizes = [8, 8], strides = [1, 1]} : vector<8x32xf32> to vector<8x8xf32>
    %68 = vector.extract_strided_slice %14 {offsets = [0, 24], sizes = [8, 8], strides = [1, 1]} : vector<8x32xf32> to vector<8x8xf32>
    %69 = vector.extract_strided_slice %15 {offsets = [0, 24], sizes = [8, 8], strides = [1, 1]} : vector<8x32xf32> to vector<8x8xf32>
    %70 = tpu.transpose %68, [1, 0] : vector<8x8xf32> -> vector<8x8xf32>
    %cst_26 = arith.constant dense<0.000000e+00> : vector<8x8xf32>
    %71 = tpu.matmul %67, %70, %cst_26 {dimension_numbers = #tpu.dot_dimension_numbers<[1], [0], [0], [1], [0, 0, 1, 1], [], []>} : vector<8x8xf32>, vector<8x8xf32>, vector<8x8xf32> -> vector<8x8xf32>
    %72 = arith.addf %71, %1 : vector<8x8xf32>
    %cst_27 = arith.constant dense<0xFF800000> : vector<8xf32>
    %73 = vector.multi_reduction <maximumf>, %72, %cst_27 [1] : vector<8x8xf32> to vector<8xf32>
    %74 = vector.shape_cast %73 : vector<8xf32> to vector<8x1xf32>
    %75 = vector.broadcast %74 : vector<8x1xf32> to vector<8x8xf32>
    %76 = arith.subf %72, %75 : vector<8x8xf32>
    %77 = math.exp %76 : vector<8x8xf32>
    %cst_28 = arith.constant dense<0.000000e+00> : vector<8xf32>
    %78 = vector.multi_reduction <add>, %77, %cst_28 [1] : vector<8x8xf32> to vector<8xf32>
    %79 = vector.shape_cast %78 : vector<8xf32> to vector<8x1xf32>
    %80 = tpu.reciprocal %79 {approx = true} : vector<8x1xf32> -> vector<8x1xf32>
    %81 = vector.broadcast %80 : vector<8x1xf32> to vector<8x8xf32>
    %82 = arith.mulf %77, %81 : vector<8x8xf32>
    %cst_29 = arith.constant dense<0.000000e+00> : vector<8x8xf32>
    %83 = tpu.matmul %82, %69, %cst_29 {dimension_numbers = #tpu.dot_dimension_numbers<[1], [0], [0], [1], [0, 0, 1, 1], [], []>} : vector<8x8xf32>, vector<8x8xf32>, vector<8x8xf32> -> vector<8x8xf32>
    %84 = tpu.concatenate %32, %49, %66, %83 in 1 : vector<8x8xf32>, vector<8x8xf32>, vector<8x8xf32>, vector<8x8xf32> -> vector<8x32xf32>
    %85 = vector.extract_strided_slice %12 {offsets = [8, 0], sizes = [8, 32], strides = [1, 1]} : vector<16x96xf32> to vector<8x32xf32>
    %86 = vector.extract_strided_slice %12 {offsets = [8, 32], sizes = [8, 32], strides = [1, 1]} : vector<16x96xf32> to vector<8x32xf32>
    %87 = vector.extract_strided_slice %12 {offsets = [8, 64], sizes = [8, 32], strides = [1, 1]} : vector<16x96xf32> to vector<8x32xf32>
    %88 = vector.extract_strided_slice %85 {offsets = [0, 0], sizes = [8, 8], strides = [1, 1]} : vector<8x32xf32> to vector<8x8xf32>
    %89 = vector.extract_strided_slice %86 {offsets = [0, 0], sizes = [8, 8], strides = [1, 1]} : vector<8x32xf32> to vector<8x8xf32>
    %90 = vector.extract_strided_slice %87 {offsets = [0, 0], sizes = [8, 8], strides = [1, 1]} : vector<8x32xf32> to vector<8x8xf32>
    %91 = tpu.transpose %89, [1, 0] : vector<8x8xf32> -> vector<8x8xf32>
    %cst_30 = arith.constant dense<0.000000e+00> : vector<8x8xf32>
    %92 = tpu.matmul %88, %91, %cst_30 {dimension_numbers = #tpu.dot_dimension_numbers<[1], [0], [0], [1], [0, 0, 1, 1], [], []>} : vector<8x8xf32>, vector<8x8xf32>, vector<8x8xf32> -> vector<8x8xf32>
    %93 = arith.addf %92, %1 : vector<8x8xf32>
    %cst_31 = arith.constant dense<0xFF800000> : vector<8xf32>
    %94 = vector.multi_reduction <maximumf>, %93, %cst_31 [1] : vector<8x8xf32> to vector<8xf32>
    %95 = vector.shape_cast %94 : vector<8xf32> to vector<8x1xf32>
    %96 = vector.broadcast %95 : vector<8x1xf32> to vector<8x8xf32>
    %97 = arith.subf %93, %96 : vector<8x8xf32>
    %98 = math.exp %97 : vector<8x8xf32>
    %cst_32 = arith.constant dense<0.000000e+00> : vector<8xf32>
    %99 = vector.multi_reduction <add>, %98, %cst_32 [1] : vector<8x8xf32> to vector<8xf32>
    %100 = vector.shape_cast %99 : vector<8xf32> to vector<8x1xf32>
    %101 = tpu.reciprocal %100 {approx = true} : vector<8x1xf32> -> vector<8x1xf32>
    %102 = vector.broadcast %101 : vector<8x1xf32> to vector<8x8xf32>
    %103 = arith.mulf %98, %102 : vector<8x8xf32>
    %cst_33 = arith.constant dense<0.000000e+00> : vector<8x8xf32>
    %104 = tpu.matmul %103, %90, %cst_33 {dimension_numbers = #tpu.dot_dimension_numbers<[1], [0], [0], [1], [0, 0, 1, 1], [], []>} : vector<8x8xf32>, vector<8x8xf32>, vector<8x8xf32> -> vector<8x8xf32>
    %105 = vector.extract_strided_slice %85 {offsets = [0, 8], sizes = [8, 8], strides = [1, 1]} : vector<8x32xf32> to vector<8x8xf32>
    %106 = vector.extract_strided_slice %86 {offsets = [0, 8], sizes = [8, 8], strides = [1, 1]} : vector<8x32xf32> to vector<8x8xf32>
    %107 = vector.extract_strided_slice %87 {offsets = [0, 8], sizes = [8, 8], strides = [1, 1]} : vector<8x32xf32> to vector<8x8xf32>
    %108 = tpu.transpose %106, [1, 0] : vector<8x8xf32> -> vector<8x8xf32>
    %cst_34 = arith.constant dense<0.000000e+00> : vector<8x8xf32>
    %109 = tpu.matmul %105, %108, %cst_34 {dimension_numbers = #tpu.dot_dimension_numbers<[1], [0], [0], [1], [0, 0, 1, 1], [], []>} : vector<8x8xf32>, vector<8x8xf32>, vector<8x8xf32> -> vector<8x8xf32>
    %110 = arith.addf %109, %1 : vector<8x8xf32>
    %cst_35 = arith.constant dense<0xFF800000> : vector<8xf32>
    %111 = vector.multi_reduction <maximumf>, %110, %cst_35 [1] : vector<8x8xf32> to vector<8xf32>
    %112 = vector.shape_cast %111 : vector<8xf32> to vector<8x1xf32>
    %113 = vector.broadcast %112 : vector<8x1xf32> to vector<8x8xf32>
    %114 = arith.subf %110, %113 : vector<8x8xf32>
    %115 = math.exp %114 : vector<8x8xf32>
    %cst_36 = arith.constant dense<0.000000e+00> : vector<8xf32>
    %116 = vector.multi_reduction <add>, %115, %cst_36 [1] : vector<8x8xf32> to vector<8xf32>
    %117 = vector.shape_cast %116 : vector<8xf32> to vector<8x1xf32>
    %118 = tpu.reciprocal %117 {approx = true} : vector<8x1xf32> -> vector<8x1xf32>
    %119 = vector.broadcast %118 : vector<8x1xf32> to vector<8x8xf32>
    %120 = arith.mulf %115, %119 : vector<8x8xf32>
    %cst_37 = arith.constant dense<0.000000e+00> : vector<8x8xf32>
    %121 = tpu.matmul %120, %107, %cst_37 {dimension_numbers = #tpu.dot_dimension_numbers<[1], [0], [0], [1], [0, 0, 1, 1], [], []>} : vector<8x8xf32>, vector<8x8xf32>, vector<8x8xf32> -> vector<8x8xf32>
    %122 = vector.extract_strided_slice %85 {offsets = [0, 16], sizes = [8, 8], strides = [1, 1]} : vector<8x32xf32> to vector<8x8xf32>
    %123 = vector.extract_strided_slice %86 {offsets = [0, 16], sizes = [8, 8], strides = [1, 1]} : vector<8x32xf32> to vector<8x8xf32>
    %124 = vector.extract_strided_slice %87 {offsets = [0, 16], sizes = [8, 8], strides = [1, 1]} : vector<8x32xf32> to vector<8x8xf32>
    %125 = tpu.transpose %123, [1, 0] : vector<8x8xf32> -> vector<8x8xf32>
    %cst_38 = arith.constant dense<0.000000e+00> : vector<8x8xf32>
    %126 = tpu.matmul %122, %125, %cst_38 {dimension_numbers = #tpu.dot_dimension_numbers<[1], [0], [0], [1], [0, 0, 1, 1], [], []>} : vector<8x8xf32>, vector<8x8xf32>, vector<8x8xf32> -> vector<8x8xf32>
    %127 = arith.addf %126, %1 : vector<8x8xf32>
    %cst_39 = arith.constant dense<0xFF800000> : vector<8xf32>
    %128 = vector.multi_reduction <maximumf>, %127, %cst_39 [1] : vector<8x8xf32> to vector<8xf32>
    %129 = vector.shape_cast %128 : vector<8xf32> to vector<8x1xf32>
    %130 = vector.broadcast %129 : vector<8x1xf32> to vector<8x8xf32>
    %131 = arith.subf %127, %130 : vector<8x8xf32>
    %132 = math.exp %131 : vector<8x8xf32>
    %cst_40 = arith.constant dense<0.000000e+00> : vector<8xf32>
    %133 = vector.multi_reduction <add>, %132, %cst_40 [1] : vector<8x8xf32> to vector<8xf32>
    %134 = vector.shape_cast %133 : vector<8xf32> to vector<8x1xf32>
    %135 = tpu.reciprocal %134 {approx = true} : vector<8x1xf32> -> vector<8x1xf32>
    %136 = vector.broadcast %135 : vector<8x1xf32> to vector<8x8xf32>
    %137 = arith.mulf %132, %136 : vector<8x8xf32>
    %cst_41 = arith.constant dense<0.000000e+00> : vector<8x8xf32>
    %138 = tpu.matmul %137, %124, %cst_41 {dimension_numbers = #tpu.dot_dimension_numbers<[1], [0], [0], [1], [0, 0, 1, 1], [], []>} : vector<8x8xf32>, vector<8x8xf32>, vector<8x8xf32> -> vector<8x8xf32>
    %139 = vector.extract_strided_slice %85 {offsets = [0, 24], sizes = [8, 8], strides = [1, 1]} : vector<8x32xf32> to vector<8x8xf32>
    %140 = vector.extract_strided_slice %86 {offsets = [0, 24], sizes = [8, 8], strides = [1, 1]} : vector<8x32xf32> to vector<8x8xf32>
    %141 = vector.extract_strided_slice %87 {offsets = [0, 24], sizes = [8, 8], strides = [1, 1]} : vector<8x32xf32> to vector<8x8xf32>
    %142 = tpu.transpose %140, [1, 0] : vector<8x8xf32> -> vector<8x8xf32>
    %cst_42 = arith.constant dense<0.000000e+00> : vector<8x8xf32>
    %143 = tpu.matmul %139, %142, %cst_42 {dimension_numbers = #tpu.dot_dimension_numbers<[1], [0], [0], [1], [0, 0, 1, 1], [], []>} : vector<8x8xf32>, vector<8x8xf32>, vector<8x8xf32> -> vector<8x8xf32>
    %144 = arith.addf %143, %1 : vector<8x8xf32>
    %cst_43 = arith.constant dense<0xFF800000> : vector<8xf32>
    %145 = vector.multi_reduction <maximumf>, %144, %cst_43 [1] : vector<8x8xf32> to vector<8xf32>
    %146 = vector.shape_cast %145 : vector<8xf32> to vector<8x1xf32>
    %147 = vector.broadcast %146 : vector<8x1xf32> to vector<8x8xf32>
    %148 = arith.subf %144, %147 : vector<8x8xf32>
    %149 = math.exp %148 : vector<8x8xf32>
    %cst_44 = arith.constant dense<0.000000e+00> : vector<8xf32>
    %150 = vector.multi_reduction <add>, %149, %cst_44 [1] : vector<8x8xf32> to vector<8xf32>
    %151 = vector.shape_cast %150 : vector<8xf32> to vector<8x1xf32>
    %152 = tpu.reciprocal %151 {approx = true} : vector<8x1xf32> -> vector<8x1xf32>
    %153 = vector.broadcast %152 : vector<8x1xf32> to vector<8x8xf32>
    %154 = arith.mulf %149, %153 : vector<8x8xf32>
    %cst_45 = arith.constant dense<0.000000e+00> : vector<8x8xf32>
    %155 = tpu.matmul %154, %141, %cst_45 {dimension_numbers = #tpu.dot_dimension_numbers<[1], [0], [0], [1], [0, 0, 1, 1], [], []>} : vector<8x8xf32>, vector<8x8xf32>, vector<8x8xf32> -> vector<8x8xf32>
    %156 = tpu.concatenate %104, %121, %138, %155 in 1 : vector<8x8xf32>, vector<8x8xf32>, vector<8x8xf32>, vector<8x8xf32> -> vector<8x32xf32>
    %157 = tpu.concatenate %84, %156 in 0 : vector<8x32xf32>, vector<8x32xf32> -> vector<16x32xf32>
    %c0_46 = arith.constant 0 : index
    %c0_47 = arith.constant 0 : index
    %c0_48 = arith.constant 0 : index
    %158 = vector.load %arg5[%c0_46, %c0_47, %c0_48] : memref<2x32x32xf32, #tpu.memory_space<vmem>>, vector<1x32x32xf32>
    %159 = vector.shape_cast %158 : vector<1x32x32xf32> to vector<32x32xf32>
    %cst_49 = arith.constant dense<0.000000e+00> : vector<16x32xf32>
    %160 = tpu.matmul %157, %159, %cst_49 {dimension_numbers = #tpu.dot_dimension_numbers<[1], [0], [0], [1], [0, 0, 1, 1], [], []>} : vector<16x32xf32>, vector<32x32xf32>, vector<16x32xf32> -> vector<16x32xf32>
    %c0_50 = arith.constant 0 : index
    %c0_51 = arith.constant 0 : index
    %c0_52 = arith.constant 0 : index
    %161 = vector.load %arg6[%c0_50, %c0_51, %c0_52] : memref<2x1x32xf32, #tpu.memory_space<vmem>>, vector<1x1x32xf32>
    %162 = vector.shape_cast %161 : vector<1x1x32xf32> to vector<1x32xf32>
    %163 = vector.broadcast %162 : vector<1x32xf32> to vector<16x32xf32>
    %164 = arith.addf %160, %163 : vector<16x32xf32>
    %165 = arith.addf %0, %164 : vector<16x32xf32>
    %c0_53 = arith.constant 0 : index
    %c0_54 = arith.constant 0 : index
    %c0_55 = arith.constant 0 : index
    %166 = vector.load %arg15[%c0_53, %c0_54, %c0_55] : memref<2x1x32xf32, #tpu.memory_space<vmem>>, vector<1x1x32xf32>
    %167 = vector.shape_cast %166 : vector<1x1x32xf32> to vector<1x32xf32>
    %c0_56 = arith.constant 0 : index
    %c0_57 = arith.constant 0 : index
    %c0_58 = arith.constant 0 : index
    %168 = vector.load %arg16[%c0_56, %c0_57, %c0_58] : memref<2x1x32xf32, #tpu.memory_space<vmem>>, vector<1x1x32xf32>
    %169 = vector.shape_cast %168 : vector<1x1x32xf32> to vector<1x32xf32>
    %cst_59 = arith.constant dense<0.000000e+00> : vector<16xf32>
    %170 = vector.multi_reduction <add>, %165, %cst_59 [1] : vector<16x32xf32> to vector<16xf32>
    %171 = vector.shape_cast %170 : vector<16xf32> to vector<16x1xf32>
    %cst_60 = arith.constant 3.200000e+01 : f32
    %172 = vector.broadcast %cst_60 : f32 to vector<16x1xf32>
    %173 = arith.divf %171, %172 : vector<16x1xf32>
    %174 = vector.broadcast %173 : vector<16x1xf32> to vector<16x32xf32>
    %175 = arith.subf %165, %174 : vector<16x32xf32>
    %176 = arith.mulf %175, %175 : vector<16x32xf32>
    %cst_61 = arith.constant dense<0.000000e+00> : vector<16xf32>
    %177 = vector.multi_reduction <add>, %176, %cst_61 [1] : vector<16x32xf32> to vector<16xf32>
    %178 = vector.shape_cast %177 : vector<16xf32> to vector<16x1xf32>
    %cst_62 = arith.constant 3.200000e+01 : f32
    %179 = vector.broadcast %cst_62 : f32 to vector<16x1xf32>
    %180 = arith.divf %178, %179 : vector<16x1xf32>
    %181 = vector.broadcast %173 : vector<16x1xf32> to vector<16x32xf32>
    %182 = arith.subf %165, %181 : vector<16x32xf32>
    %cst_63 = arith.constant 9.99999974E-6 : f32
    %183 = vector.broadcast %cst_63 : f32 to vector<16x1xf32>
    %184 = arith.addf %180, %183 : vector<16x1xf32>
    %185 = math.rsqrt %184 : vector<16x1xf32>
    %186 = vector.broadcast %185 : vector<16x1xf32> to vector<16x32xf32>
    %187 = arith.mulf %182, %186 : vector<16x32xf32>
    %188 = vector.broadcast %167 : vector<1x32xf32> to vector<16x32xf32>
    %189 = arith.mulf %187, %188 : vector<16x32xf32>
    %190 = vector.broadcast %169 : vector<1x32xf32> to vector<16x32xf32>
    %191 = arith.addf %189, %190 : vector<16x32xf32>
    %c0_64 = arith.constant 0 : index
    %c0_65 = arith.constant 0 : index
    %c0_66 = arith.constant 0 : index
    %192 = vector.load %arg7[%c0_64, %c0_65, %c0_66] : memref<2x32x96xf32, #tpu.memory_space<vmem>>, vector<1x32x96xf32>
    %193 = vector.shape_cast %192 : vector<1x32x96xf32> to vector<32x96xf32>
    %c0_67 = arith.constant 0 : index
    %c0_68 = arith.constant 0 : index
    %c0_69 = arith.constant 0 : index
    %194 = vector.load %arg8[%c0_67, %c0_68, %c0_69] : memref<2x1x96xf32, #tpu.memory_space<vmem>>, vector<1x1x96xf32>
    %195 = vector.shape_cast %194 : vector<1x1x96xf32> to vector<1x96xf32>
    %196 = vector.extract_strided_slice %193 {offsets = [0, 0], sizes = [32, 32], strides = [1, 1]} : vector<32x96xf32> to vector<32x32xf32>
    %cst_70 = arith.constant dense<0.000000e+00> : vector<16x32xf32>
    %197 = tpu.matmul %191, %196, %cst_70 {dimension_numbers = #tpu.dot_dimension_numbers<[1], [0], [0], [1], [0, 0, 1, 1], [], []>} : vector<16x32xf32>, vector<32x32xf32>, vector<16x32xf32> -> vector<16x32xf32>
    %198 = vector.extract_strided_slice %195 {offsets = [0, 0], sizes = [1, 32], strides = [1, 1]} : vector<1x96xf32> to vector<1x32xf32>
    %199 = vector.broadcast %198 : vector<1x32xf32> to vector<16x32xf32>
    %200 = arith.addf %197, %199 : vector<16x32xf32>
    %201 = vector.extract_strided_slice %193 {offsets = [0, 32], sizes = [32, 64], strides = [1, 1]} : vector<32x96xf32> to vector<32x64xf32>
    %cst_71 = arith.constant dense<0.000000e+00> : vector<12x64xf32>
    %202 = tpu.matmul %3, %201, %cst_71 {dimension_numbers = #tpu.dot_dimension_numbers<[1], [0], [0], [1], [0, 0, 1, 1], [], []>} : vector<12x32xf32>, vector<32x64xf32>, vector<12x64xf32> -> vector<12x64xf32>
    %203 = vector.extract_strided_slice %195 {offsets = [0, 32], sizes = [1, 64], strides = [1, 1]} : vector<1x96xf32> to vector<1x64xf32>
    %204 = vector.broadcast %203 : vector<1x64xf32> to vector<12x64xf32>
    %205 = arith.addf %202, %204 : vector<12x64xf32>
    %206 = vector.extract_strided_slice %200 {offsets = [0, 0], sizes = [8, 32], strides = [1, 1]} : vector<16x32xf32> to vector<8x32xf32>
    %207 = vector.extract_strided_slice %205 {offsets = [0, 0], sizes = [12, 32], strides = [1, 1]} : vector<12x64xf32> to vector<12x32xf32>
    %208 = vector.extract_strided_slice %205 {offsets = [0, 32], sizes = [12, 32], strides = [1, 1]} : vector<12x64xf32> to vector<12x32xf32>
    %209 = vector.extract_strided_slice %206 {offsets = [0, 0], sizes = [8, 8], strides = [1, 1]} : vector<8x32xf32> to vector<8x8xf32>
    %210 = vector.extract_strided_slice %207 {offsets = [0, 0], sizes = [12, 8], strides = [1, 1]} : vector<12x32xf32> to vector<12x8xf32>
    %211 = vector.extract_strided_slice %208 {offsets = [0, 0], sizes = [12, 8], strides = [1, 1]} : vector<12x32xf32> to vector<12x8xf32>
    %212 = tpu.transpose %210, [1, 0] : vector<12x8xf32> -> vector<8x12xf32>
    %cst_72 = arith.constant dense<0.000000e+00> : vector<8x12xf32>
    %213 = tpu.matmul %209, %212, %cst_72 {dimension_numbers = #tpu.dot_dimension_numbers<[1], [0], [0], [1], [0, 0, 1, 1], [], []>} : vector<8x8xf32>, vector<8x12xf32>, vector<8x12xf32> -> vector<8x12xf32>
    %cst_73 = arith.constant dense<0xFF800000> : vector<8xf32>
    %214 = vector.multi_reduction <maximumf>, %213, %cst_73 [1] : vector<8x12xf32> to vector<8xf32>
    %215 = vector.shape_cast %214 : vector<8xf32> to vector<8x1xf32>
    %216 = vector.broadcast %215 : vector<8x1xf32> to vector<8x12xf32>
    %217 = arith.subf %213, %216 : vector<8x12xf32>
    %218 = math.exp %217 : vector<8x12xf32>
    %cst_74 = arith.constant dense<0.000000e+00> : vector<8xf32>
    %219 = vector.multi_reduction <add>, %218, %cst_74 [1] : vector<8x12xf32> to vector<8xf32>
    %220 = vector.shape_cast %219 : vector<8xf32> to vector<8x1xf32>
    %221 = tpu.reciprocal %220 {approx = true} : vector<8x1xf32> -> vector<8x1xf32>
    %222 = vector.broadcast %221 : vector<8x1xf32> to vector<8x12xf32>
    %223 = arith.mulf %218, %222 : vector<8x12xf32>
    %cst_75 = arith.constant dense<0.000000e+00> : vector<8x8xf32>
    %224 = tpu.matmul %223, %211, %cst_75 {dimension_numbers = #tpu.dot_dimension_numbers<[1], [0], [0], [1], [0, 0, 1, 1], [], []>} : vector<8x12xf32>, vector<12x8xf32>, vector<8x8xf32> -> vector<8x8xf32>
    %225 = vector.extract_strided_slice %206 {offsets = [0, 8], sizes = [8, 8], strides = [1, 1]} : vector<8x32xf32> to vector<8x8xf32>
    %226 = vector.extract_strided_slice %207 {offsets = [0, 8], sizes = [12, 8], strides = [1, 1]} : vector<12x32xf32> to vector<12x8xf32>
    %227 = vector.extract_strided_slice %208 {offsets = [0, 8], sizes = [12, 8], strides = [1, 1]} : vector<12x32xf32> to vector<12x8xf32>
    %228 = tpu.transpose %226, [1, 0] : vector<12x8xf32> -> vector<8x12xf32>
    %cst_76 = arith.constant dense<0.000000e+00> : vector<8x12xf32>
    %229 = tpu.matmul %225, %228, %cst_76 {dimension_numbers = #tpu.dot_dimension_numbers<[1], [0], [0], [1], [0, 0, 1, 1], [], []>} : vector<8x8xf32>, vector<8x12xf32>, vector<8x12xf32> -> vector<8x12xf32>
    %cst_77 = arith.constant dense<0xFF800000> : vector<8xf32>
    %230 = vector.multi_reduction <maximumf>, %229, %cst_77 [1] : vector<8x12xf32> to vector<8xf32>
    %231 = vector.shape_cast %230 : vector<8xf32> to vector<8x1xf32>
    %232 = vector.broadcast %231 : vector<8x1xf32> to vector<8x12xf32>
    %233 = arith.subf %229, %232 : vector<8x12xf32>
    %234 = math.exp %233 : vector<8x12xf32>
    %cst_78 = arith.constant dense<0.000000e+00> : vector<8xf32>
    %235 = vector.multi_reduction <add>, %234, %cst_78 [1] : vector<8x12xf32> to vector<8xf32>
    %236 = vector.shape_cast %235 : vector<8xf32> to vector<8x1xf32>
    %237 = tpu.reciprocal %236 {approx = true} : vector<8x1xf32> -> vector<8x1xf32>
    %238 = vector.broadcast %237 : vector<8x1xf32> to vector<8x12xf32>
    %239 = arith.mulf %234, %238 : vector<8x12xf32>
    %cst_79 = arith.constant dense<0.000000e+00> : vector<8x8xf32>
    %240 = tpu.matmul %239, %227, %cst_79 {dimension_numbers = #tpu.dot_dimension_numbers<[1], [0], [0], [1], [0, 0, 1, 1], [], []>} : vector<8x12xf32>, vector<12x8xf32>, vector<8x8xf32> -> vector<8x8xf32>
    %241 = vector.extract_strided_slice %206 {offsets = [0, 16], sizes = [8, 8], strides = [1, 1]} : vector<8x32xf32> to vector<8x8xf32>
    %242 = vector.extract_strided_slice %207 {offsets = [0, 16], sizes = [12, 8], strides = [1, 1]} : vector<12x32xf32> to vector<12x8xf32>
    %243 = vector.extract_strided_slice %208 {offsets = [0, 16], sizes = [12, 8], strides = [1, 1]} : vector<12x32xf32> to vector<12x8xf32>
    %244 = tpu.transpose %242, [1, 0] : vector<12x8xf32> -> vector<8x12xf32>
    %cst_80 = arith.constant dense<0.000000e+00> : vector<8x12xf32>
    %245 = tpu.matmul %241, %244, %cst_80 {dimension_numbers = #tpu.dot_dimension_numbers<[1], [0], [0], [1], [0, 0, 1, 1], [], []>} : vector<8x8xf32>, vector<8x12xf32>, vector<8x12xf32> -> vector<8x12xf32>
    %cst_81 = arith.constant dense<0xFF800000> : vector<8xf32>
    %246 = vector.multi_reduction <maximumf>, %245, %cst_81 [1] : vector<8x12xf32> to vector<8xf32>
    %247 = vector.shape_cast %246 : vector<8xf32> to vector<8x1xf32>
    %248 = vector.broadcast %247 : vector<8x1xf32> to vector<8x12xf32>
    %249 = arith.subf %245, %248 : vector<8x12xf32>
    %250 = math.exp %249 : vector<8x12xf32>
    %cst_82 = arith.constant dense<0.000000e+00> : vector<8xf32>
    %251 = vector.multi_reduction <add>, %250, %cst_82 [1] : vector<8x12xf32> to vector<8xf32>
    %252 = vector.shape_cast %251 : vector<8xf32> to vector<8x1xf32>
    %253 = tpu.reciprocal %252 {approx = true} : vector<8x1xf32> -> vector<8x1xf32>
    %254 = vector.broadcast %253 : vector<8x1xf32> to vector<8x12xf32>
    %255 = arith.mulf %250, %254 : vector<8x12xf32>
    %cst_83 = arith.constant dense<0.000000e+00> : vector<8x8xf32>
    %256 = tpu.matmul %255, %243, %cst_83 {dimension_numbers = #tpu.dot_dimension_numbers<[1], [0], [0], [1], [0, 0, 1, 1], [], []>} : vector<8x12xf32>, vector<12x8xf32>, vector<8x8xf32> -> vector<8x8xf32>
    %257 = vector.extract_strided_slice %206 {offsets = [0, 24], sizes = [8, 8], strides = [1, 1]} : vector<8x32xf32> to vector<8x8xf32>
    %258 = vector.extract_strided_slice %207 {offsets = [0, 24], sizes = [12, 8], strides = [1, 1]} : vector<12x32xf32> to vector<12x8xf32>
    %259 = vector.extract_strided_slice %208 {offsets = [0, 24], sizes = [12, 8], strides = [1, 1]} : vector<12x32xf32> to vector<12x8xf32>
    %260 = tpu.transpose %258, [1, 0] : vector<12x8xf32> -> vector<8x12xf32>
    %cst_84 = arith.constant dense<0.000000e+00> : vector<8x12xf32>
    %261 = tpu.matmul %257, %260, %cst_84 {dimension_numbers = #tpu.dot_dimension_numbers<[1], [0], [0], [1], [0, 0, 1, 1], [], []>} : vector<8x8xf32>, vector<8x12xf32>, vector<8x12xf32> -> vector<8x12xf32>
    %cst_85 = arith.constant dense<0xFF800000> : vector<8xf32>
    %262 = vector.multi_reduction <maximumf>, %261, %cst_85 [1] : vector<8x12xf32> to vector<8xf32>
    %263 = vector.shape_cast %262 : vector<8xf32> to vector<8x1xf32>
    %264 = vector.broadcast %263 : vector<8x1xf32> to vector<8x12xf32>
    %265 = arith.subf %261, %264 : vector<8x12xf32>
    %266 = math.exp %265 : vector<8x12xf32>
    %cst_86 = arith.constant dense<0.000000e+00> : vector<8xf32>
    %267 = vector.multi_reduction <add>, %266, %cst_86 [1] : vector<8x12xf32> to vector<8xf32>
    %268 = vector.shape_cast %267 : vector<8xf32> to vector<8x1xf32>
    %269 = tpu.reciprocal %268 {approx = true} : vector<8x1xf32> -> vector<8x1xf32>
    %270 = vector.broadcast %269 : vector<8x1xf32> to vector<8x12xf32>
    %271 = arith.mulf %266, %270 : vector<8x12xf32>
    %cst_87 = arith.constant dense<0.000000e+00> : vector<8x8xf32>
    %272 = tpu.matmul %271, %259, %cst_87 {dimension_numbers = #tpu.dot_dimension_numbers<[1], [0], [0], [1], [0, 0, 1, 1], [], []>} : vector<8x12xf32>, vector<12x8xf32>, vector<8x8xf32> -> vector<8x8xf32>
    %273 = tpu.concatenate %224, %240, %256, %272 in 1 : vector<8x8xf32>, vector<8x8xf32>, vector<8x8xf32>, vector<8x8xf32> -> vector<8x32xf32>
    %274 = vector.extract_strided_slice %193 {offsets = [0, 32], sizes = [32, 64], strides = [1, 1]} : vector<32x96xf32> to vector<32x64xf32>
    %cst_88 = arith.constant dense<0.000000e+00> : vector<12x64xf32>
    %275 = tpu.matmul %5, %274, %cst_88 {dimension_numbers = #tpu.dot_dimension_numbers<[1], [0], [0], [1], [0, 0, 1, 1], [], []>} : vector<12x32xf32>, vector<32x64xf32>, vector<12x64xf32> -> vector<12x64xf32>
    %276 = vector.extract_strided_slice %195 {offsets = [0, 32], sizes = [1, 64], strides = [1, 1]} : vector<1x96xf32> to vector<1x64xf32>
    %277 = vector.broadcast %276 : vector<1x64xf32> to vector<12x64xf32>
    %278 = arith.addf %275, %277 : vector<12x64xf32>
    %279 = vector.extract_strided_slice %200 {offsets = [8, 0], sizes = [8, 32], strides = [1, 1]} : vector<16x32xf32> to vector<8x32xf32>
    %280 = vector.extract_strided_slice %278 {offsets = [0, 0], sizes = [12, 32], strides = [1, 1]} : vector<12x64xf32> to vector<12x32xf32>
    %281 = vector.extract_strided_slice %278 {offsets = [0, 32], sizes = [12, 32], strides = [1, 1]} : vector<12x64xf32> to vector<12x32xf32>
    %282 = vector.extract_strided_slice %279 {offsets = [0, 0], sizes = [8, 8], strides = [1, 1]} : vector<8x32xf32> to vector<8x8xf32>
    %283 = vector.extract_strided_slice %280 {offsets = [0, 0], sizes = [12, 8], strides = [1, 1]} : vector<12x32xf32> to vector<12x8xf32>
    %284 = vector.extract_strided_slice %281 {offsets = [0, 0], sizes = [12, 8], strides = [1, 1]} : vector<12x32xf32> to vector<12x8xf32>
    %285 = tpu.transpose %283, [1, 0] : vector<12x8xf32> -> vector<8x12xf32>
    %cst_89 = arith.constant dense<0.000000e+00> : vector<8x12xf32>
    %286 = tpu.matmul %282, %285, %cst_89 {dimension_numbers = #tpu.dot_dimension_numbers<[1], [0], [0], [1], [0, 0, 1, 1], [], []>} : vector<8x8xf32>, vector<8x12xf32>, vector<8x12xf32> -> vector<8x12xf32>
    %cst_90 = arith.constant dense<0xFF800000> : vector<8xf32>
    %287 = vector.multi_reduction <maximumf>, %286, %cst_90 [1] : vector<8x12xf32> to vector<8xf32>
    %288 = vector.shape_cast %287 : vector<8xf32> to vector<8x1xf32>
    %289 = vector.broadcast %288 : vector<8x1xf32> to vector<8x12xf32>
    %290 = arith.subf %286, %289 : vector<8x12xf32>
    %291 = math.exp %290 : vector<8x12xf32>
    %cst_91 = arith.constant dense<0.000000e+00> : vector<8xf32>
    %292 = vector.multi_reduction <add>, %291, %cst_91 [1] : vector<8x12xf32> to vector<8xf32>
    %293 = vector.shape_cast %292 : vector<8xf32> to vector<8x1xf32>
    %294 = tpu.reciprocal %293 {approx = true} : vector<8x1xf32> -> vector<8x1xf32>
    %295 = vector.broadcast %294 : vector<8x1xf32> to vector<8x12xf32>
    %296 = arith.mulf %291, %295 : vector<8x12xf32>
    %cst_92 = arith.constant dense<0.000000e+00> : vector<8x8xf32>
    %297 = tpu.matmul %296, %284, %cst_92 {dimension_numbers = #tpu.dot_dimension_numbers<[1], [0], [0], [1], [0, 0, 1, 1], [], []>} : vector<8x12xf32>, vector<12x8xf32>, vector<8x8xf32> -> vector<8x8xf32>
    %298 = vector.extract_strided_slice %279 {offsets = [0, 8], sizes = [8, 8], strides = [1, 1]} : vector<8x32xf32> to vector<8x8xf32>
    %299 = vector.extract_strided_slice %280 {offsets = [0, 8], sizes = [12, 8], strides = [1, 1]} : vector<12x32xf32> to vector<12x8xf32>
    %300 = vector.extract_strided_slice %281 {offsets = [0, 8], sizes = [12, 8], strides = [1, 1]} : vector<12x32xf32> to vector<12x8xf32>
    %301 = tpu.transpose %299, [1, 0] : vector<12x8xf32> -> vector<8x12xf32>
    %cst_93 = arith.constant dense<0.000000e+00> : vector<8x12xf32>
    %302 = tpu.matmul %298, %301, %cst_93 {dimension_numbers = #tpu.dot_dimension_numbers<[1], [0], [0], [1], [0, 0, 1, 1], [], []>} : vector<8x8xf32>, vector<8x12xf32>, vector<8x12xf32> -> vector<8x12xf32>
    %cst_94 = arith.constant dense<0xFF800000> : vector<8xf32>
    %303 = vector.multi_reduction <maximumf>, %302, %cst_94 [1] : vector<8x12xf32> to vector<8xf32>
    %304 = vector.shape_cast %303 : vector<8xf32> to vector<8x1xf32>
    %305 = vector.broadcast %304 : vector<8x1xf32> to vector<8x12xf32>
    %306 = arith.subf %302, %305 : vector<8x12xf32>
    %307 = math.exp %306 : vector<8x12xf32>
    %cst_95 = arith.constant dense<0.000000e+00> : vector<8xf32>
    %308 = vector.multi_reduction <add>, %307, %cst_95 [1] : vector<8x12xf32> to vector<8xf32>
    %309 = vector.shape_cast %308 : vector<8xf32> to vector<8x1xf32>
    %310 = tpu.reciprocal %309 {approx = true} : vector<8x1xf32> -> vector<8x1xf32>
    %311 = vector.broadcast %310 : vector<8x1xf32> to vector<8x12xf32>
    %312 = arith.mulf %307, %311 : vector<8x12xf32>
    %cst_96 = arith.constant dense<0.000000e+00> : vector<8x8xf32>
    %313 = tpu.matmul %312, %300, %cst_96 {dimension_numbers = #tpu.dot_dimension_numbers<[1], [0], [0], [1], [0, 0, 1, 1], [], []>} : vector<8x12xf32>, vector<12x8xf32>, vector<8x8xf32> -> vector<8x8xf32>
    %314 = vector.extract_strided_slice %279 {offsets = [0, 16], sizes = [8, 8], strides = [1, 1]} : vector<8x32xf32> to vector<8x8xf32>
    %315 = vector.extract_strided_slice %280 {offsets = [0, 16], sizes = [12, 8], strides = [1, 1]} : vector<12x32xf32> to vector<12x8xf32>
    %316 = vector.extract_strided_slice %281 {offsets = [0, 16], sizes = [12, 8], strides = [1, 1]} : vector<12x32xf32> to vector<12x8xf32>
    %317 = tpu.transpose %315, [1, 0] : vector<12x8xf32> -> vector<8x12xf32>
    %cst_97 = arith.constant dense<0.000000e+00> : vector<8x12xf32>
    %318 = tpu.matmul %314, %317, %cst_97 {dimension_numbers = #tpu.dot_dimension_numbers<[1], [0], [0], [1], [0, 0, 1, 1], [], []>} : vector<8x8xf32>, vector<8x12xf32>, vector<8x12xf32> -> vector<8x12xf32>
    %cst_98 = arith.constant dense<0xFF800000> : vector<8xf32>
    %319 = vector.multi_reduction <maximumf>, %318, %cst_98 [1] : vector<8x12xf32> to vector<8xf32>
    %320 = vector.shape_cast %319 : vector<8xf32> to vector<8x1xf32>
    %321 = vector.broadcast %320 : vector<8x1xf32> to vector<8x12xf32>
    %322 = arith.subf %318, %321 : vector<8x12xf32>
    %323 = math.exp %322 : vector<8x12xf32>
    %cst_99 = arith.constant dense<0.000000e+00> : vector<8xf32>
    %324 = vector.multi_reduction <add>, %323, %cst_99 [1] : vector<8x12xf32> to vector<8xf32>
    %325 = vector.shape_cast %324 : vector<8xf32> to vector<8x1xf32>
    %326 = tpu.reciprocal %325 {approx = true} : vector<8x1xf32> -> vector<8x1xf32>
    %327 = vector.broadcast %326 : vector<8x1xf32> to vector<8x12xf32>
    %328 = arith.mulf %323, %327 : vector<8x12xf32>
    %cst_100 = arith.constant dense<0.000000e+00> : vector<8x8xf32>
    %329 = tpu.matmul %328, %316, %cst_100 {dimension_numbers = #tpu.dot_dimension_numbers<[1], [0], [0], [1], [0, 0, 1, 1], [], []>} : vector<8x12xf32>, vector<12x8xf32>, vector<8x8xf32> -> vector<8x8xf32>
    %330 = vector.extract_strided_slice %279 {offsets = [0, 24], sizes = [8, 8], strides = [1, 1]} : vector<8x32xf32> to vector<8x8xf32>
    %331 = vector.extract_strided_slice %280 {offsets = [0, 24], sizes = [12, 8], strides = [1, 1]} : vector<12x32xf32> to vector<12x8xf32>
    %332 = vector.extract_strided_slice %281 {offsets = [0, 24], sizes = [12, 8], strides = [1, 1]} : vector<12x32xf32> to vector<12x8xf32>
    %333 = tpu.transpose %331, [1, 0] : vector<12x8xf32> -> vector<8x12xf32>
    %cst_101 = arith.constant dense<0.000000e+00> : vector<8x12xf32>
    %334 = tpu.matmul %330, %333, %cst_101 {dimension_numbers = #tpu.dot_dimension_numbers<[1], [0], [0], [1], [0, 0, 1, 1], [], []>} : vector<8x8xf32>, vector<8x12xf32>, vector<8x12xf32> -> vector<8x12xf32>
    %cst_102 = arith.constant dense<0xFF800000> : vector<8xf32>
    %335 = vector.multi_reduction <maximumf>, %334, %cst_102 [1] : vector<8x12xf32> to vector<8xf32>
    %336 = vector.shape_cast %335 : vector<8xf32> to vector<8x1xf32>
    %337 = vector.broadcast %336 : vector<8x1xf32> to vector<8x12xf32>
    %338 = arith.subf %334, %337 : vector<8x12xf32>
    %339 = math.exp %338 : vector<8x12xf32>
    %cst_103 = arith.constant dense<0.000000e+00> : vector<8xf32>
    %340 = vector.multi_reduction <add>, %339, %cst_103 [1] : vector<8x12xf32> to vector<8xf32>
    %341 = vector.shape_cast %340 : vector<8xf32> to vector<8x1xf32>
    %342 = tpu.reciprocal %341 {approx = true} : vector<8x1xf32> -> vector<8x1xf32>
    %343 = vector.broadcast %342 : vector<8x1xf32> to vector<8x12xf32>
    %344 = arith.mulf %339, %343 : vector<8x12xf32>
    %cst_104 = arith.constant dense<0.000000e+00> : vector<8x8xf32>
    %345 = tpu.matmul %344, %332, %cst_104 {dimension_numbers = #tpu.dot_dimension_numbers<[1], [0], [0], [1], [0, 0, 1, 1], [], []>} : vector<8x12xf32>, vector<12x8xf32>, vector<8x8xf32> -> vector<8x8xf32>
    %346 = tpu.concatenate %297, %313, %329, %345 in 1 : vector<8x8xf32>, vector<8x8xf32>, vector<8x8xf32>, vector<8x8xf32> -> vector<8x32xf32>
    %347 = tpu.concatenate %273, %346 in 0 : vector<8x32xf32>, vector<8x32xf32> -> vector<16x32xf32>
    %c0_105 = arith.constant 0 : index
    %c0_106 = arith.constant 0 : index
    %c0_107 = arith.constant 0 : index
    %348 = vector.load %arg9[%c0_105, %c0_106, %c0_107] : memref<2x32x32xf32, #tpu.memory_space<vmem>>, vector<1x32x32xf32>
    %349 = vector.shape_cast %348 : vector<1x32x32xf32> to vector<32x32xf32>
    %cst_108 = arith.constant dense<0.000000e+00> : vector<16x32xf32>
    %350 = tpu.matmul %347, %349, %cst_108 {dimension_numbers = #tpu.dot_dimension_numbers<[1], [0], [0], [1], [0, 0, 1, 1], [], []>} : vector<16x32xf32>, vector<32x32xf32>, vector<16x32xf32> -> vector<16x32xf32>
    %c0_109 = arith.constant 0 : index
    %c0_110 = arith.constant 0 : index
    %c0_111 = arith.constant 0 : index
    %351 = vector.load %arg10[%c0_109, %c0_110, %c0_111] : memref<2x1x32xf32, #tpu.memory_space<vmem>>, vector<1x1x32xf32>
    %352 = vector.shape_cast %351 : vector<1x1x32xf32> to vector<1x32xf32>
    %353 = vector.broadcast %352 : vector<1x32xf32> to vector<16x32xf32>
    %354 = arith.addf %350, %353 : vector<16x32xf32>
    %355 = arith.addf %191, %354 : vector<16x32xf32>
    %c0_112 = arith.constant 0 : index
    %c0_113 = arith.constant 0 : index
    %c0_114 = arith.constant 0 : index
    %356 = vector.load %arg17[%c0_112, %c0_113, %c0_114] : memref<2x1x32xf32, #tpu.memory_space<vmem>>, vector<1x1x32xf32>
    %357 = vector.shape_cast %356 : vector<1x1x32xf32> to vector<1x32xf32>
    %c0_115 = arith.constant 0 : index
    %c0_116 = arith.constant 0 : index
    %c0_117 = arith.constant 0 : index
    %358 = vector.load %arg18[%c0_115, %c0_116, %c0_117] : memref<2x1x32xf32, #tpu.memory_space<vmem>>, vector<1x1x32xf32>
    %359 = vector.shape_cast %358 : vector<1x1x32xf32> to vector<1x32xf32>
    %cst_118 = arith.constant dense<0.000000e+00> : vector<16xf32>
    %360 = vector.multi_reduction <add>, %355, %cst_118 [1] : vector<16x32xf32> to vector<16xf32>
    %361 = vector.shape_cast %360 : vector<16xf32> to vector<16x1xf32>
    %cst_119 = arith.constant 3.200000e+01 : f32
    %362 = vector.broadcast %cst_119 : f32 to vector<16x1xf32>
    %363 = arith.divf %361, %362 : vector<16x1xf32>
    %364 = vector.broadcast %363 : vector<16x1xf32> to vector<16x32xf32>
    %365 = arith.subf %355, %364 : vector<16x32xf32>
    %366 = arith.mulf %365, %365 : vector<16x32xf32>
    %cst_120 = arith.constant dense<0.000000e+00> : vector<16xf32>
    %367 = vector.multi_reduction <add>, %366, %cst_120 [1] : vector<16x32xf32> to vector<16xf32>
    %368 = vector.shape_cast %367 : vector<16xf32> to vector<16x1xf32>
    %cst_121 = arith.constant 3.200000e+01 : f32
    %369 = vector.broadcast %cst_121 : f32 to vector<16x1xf32>
    %370 = arith.divf %368, %369 : vector<16x1xf32>
    %371 = vector.broadcast %363 : vector<16x1xf32> to vector<16x32xf32>
    %372 = arith.subf %355, %371 : vector<16x32xf32>
    %cst_122 = arith.constant 9.99999974E-6 : f32
    %373 = vector.broadcast %cst_122 : f32 to vector<16x1xf32>
    %374 = arith.addf %370, %373 : vector<16x1xf32>
    %375 = math.rsqrt %374 : vector<16x1xf32>
    %376 = vector.broadcast %375 : vector<16x1xf32> to vector<16x32xf32>
    %377 = arith.mulf %372, %376 : vector<16x32xf32>
    %378 = vector.broadcast %357 : vector<1x32xf32> to vector<16x32xf32>
    %379 = arith.mulf %377, %378 : vector<16x32xf32>
    %380 = vector.broadcast %359 : vector<1x32xf32> to vector<16x32xf32>
    %381 = arith.addf %379, %380 : vector<16x32xf32>
    %c0_123 = arith.constant 0 : index
    %c0_124 = arith.constant 0 : index
    %c0_125 = arith.constant 0 : index
    %382 = vector.load %arg11[%c0_123, %c0_124, %c0_125] : memref<2x32x64xf32, #tpu.memory_space<vmem>>, vector<1x32x64xf32>
    %383 = vector.shape_cast %382 : vector<1x32x64xf32> to vector<32x64xf32>
    %cst_126 = arith.constant dense<0.000000e+00> : vector<16x64xf32>
    %384 = tpu.matmul %381, %383, %cst_126 {dimension_numbers = #tpu.dot_dimension_numbers<[1], [0], [0], [1], [0, 0, 1, 1], [], []>} : vector<16x32xf32>, vector<32x64xf32>, vector<16x64xf32> -> vector<16x64xf32>
    %c0_127 = arith.constant 0 : index
    %c0_128 = arith.constant 0 : index
    %c0_129 = arith.constant 0 : index
    %385 = vector.load %arg12[%c0_127, %c0_128, %c0_129] : memref<2x1x64xf32, #tpu.memory_space<vmem>>, vector<1x1x64xf32>
    %386 = vector.shape_cast %385 : vector<1x1x64xf32> to vector<1x64xf32>
    %387 = vector.broadcast %386 : vector<1x64xf32> to vector<16x64xf32>
    %388 = arith.addf %384, %387 : vector<16x64xf32>
    %cst_130 = arith.constant 0.000000e+00 : f32
    %389 = vector.broadcast %cst_130 : f32 to vector<16x64xf32>
    %390 = arith.maximumf %388, %389 : vector<16x64xf32>
    %c0_131 = arith.constant 0 : index
    %c0_132 = arith.constant 0 : index
    %c0_133 = arith.constant 0 : index
    %391 = vector.load %arg13[%c0_131, %c0_132, %c0_133] : memref<2x64x32xf32, #tpu.memory_space<vmem>>, vector<1x64x32xf32>
    %392 = vector.shape_cast %391 : vector<1x64x32xf32> to vector<64x32xf32>
    %cst_134 = arith.constant dense<0.000000e+00> : vector<16x32xf32>
    %393 = tpu.matmul %390, %392, %cst_134 {dimension_numbers = #tpu.dot_dimension_numbers<[1], [0], [0], [1], [0, 0, 1, 1], [], []>} : vector<16x64xf32>, vector<64x32xf32>, vector<16x32xf32> -> vector<16x32xf32>
    %c0_135 = arith.constant 0 : index
    %c0_136 = arith.constant 0 : index
    %c0_137 = arith.constant 0 : index
    %394 = vector.load %arg14[%c0_135, %c0_136, %c0_137] : memref<2x1x32xf32, #tpu.memory_space<vmem>>, vector<1x1x32xf32>
    %395 = vector.shape_cast %394 : vector<1x1x32xf32> to vector<1x32xf32>
    %396 = vector.broadcast %395 : vector<1x32xf32> to vector<16x32xf32>
    %397 = arith.addf %393, %396 : vector<16x32xf32>
    %398 = arith.addf %381, %397 : vector<16x32xf32>
    %c0_138 = arith.constant 0 : index
    %c0_139 = arith.constant 0 : index
    %c0_140 = arith.constant 0 : index
    %399 = vector.load %arg19[%c0_138, %c0_139, %c0_140] : memref<2x1x32xf32, #tpu.memory_space<vmem>>, vector<1x1x32xf32>
    %400 = vector.shape_cast %399 : vector<1x1x32xf32> to vector<1x32xf32>
    %c0_141 = arith.constant 0 : index
    %c0_142 = arith.constant 0 : index
    %c0_143 = arith.constant 0 : index
    %401 = vector.load %arg20[%c0_141, %c0_142, %c0_143] : memref<2x1x32xf32, #tpu.memory_space<vmem>>, vector<1x1x32xf32>
    %402 = vector.shape_cast %401 : vector<1x1x32xf32> to vector<1x32xf32>
    %cst_144 = arith.constant dense<0.000000e+00> : vector<16xf32>
    %403 = vector.multi_reduction <add>, %398, %cst_144 [1] : vector<16x32xf32> to vector<16xf32>
    %404 = vector.shape_cast %403 : vector<16xf32> to vector<16x1xf32>
    %cst_145 = arith.constant 3.200000e+01 : f32
    %405 = vector.broadcast %cst_145 : f32 to vector<16x1xf32>
    %406 = arith.divf %404, %405 : vector<16x1xf32>
    %407 = vector.broadcast %406 : vector<16x1xf32> to vector<16x32xf32>
    %408 = arith.subf %398, %407 : vector<16x32xf32>
    %409 = arith.mulf %408, %408 : vector<16x32xf32>
    %cst_146 = arith.constant dense<0.000000e+00> : vector<16xf32>
    %410 = vector.multi_reduction <add>, %409, %cst_146 [1] : vector<16x32xf32> to vector<16xf32>
    %411 = vector.shape_cast %410 : vector<16xf32> to vector<16x1xf32>
    %cst_147 = arith.constant 3.200000e+01 : f32
    %412 = vector.broadcast %cst_147 : f32 to vector<16x1xf32>
    %413 = arith.divf %411, %412 : vector<16x1xf32>
    %414 = vector.broadcast %406 : vector<16x1xf32> to vector<16x32xf32>
    %415 = arith.subf %398, %414 : vector<16x32xf32>
    %cst_148 = arith.constant 9.99999974E-6 : f32
    %416 = vector.broadcast %cst_148 : f32 to vector<16x1xf32>
    %417 = arith.addf %413, %416 : vector<16x1xf32>
    %418 = math.rsqrt %417 : vector<16x1xf32>
    %419 = vector.broadcast %418 : vector<16x1xf32> to vector<16x32xf32>
    %420 = arith.mulf %415, %419 : vector<16x32xf32>
    %421 = vector.broadcast %400 : vector<1x32xf32> to vector<16x32xf32>
    %422 = arith.mulf %420, %421 : vector<16x32xf32>
    %423 = vector.broadcast %402 : vector<1x32xf32> to vector<16x32xf32>
    %424 = arith.addf %422, %423 : vector<16x32xf32>
    %c1_149 = arith.constant 1 : index
    %c0_150 = arith.constant 0 : index
    %c0_151 = arith.constant 0 : index
    %425 = vector.load %arg3[%c1_149, %c0_150, %c0_151] : memref<2x32x96xf32, #tpu.memory_space<vmem>>, vector<1x32x96xf32>
    %426 = vector.shape_cast %425 : vector<1x32x96xf32> to vector<32x96xf32>
    %cst_152 = arith.constant dense<0.000000e+00> : vector<16x96xf32>
    %427 = tpu.matmul %424, %426, %cst_152 {dimension_numbers = #tpu.dot_dimension_numbers<[1], [0], [0], [1], [0, 0, 1, 1], [], []>} : vector<16x32xf32>, vector<32x96xf32>, vector<16x96xf32> -> vector<16x96xf32>
    %c1_153 = arith.constant 1 : index
    %c0_154 = arith.constant 0 : index
    %c0_155 = arith.constant 0 : index
    %428 = vector.load %arg4[%c1_153, %c0_154, %c0_155] : memref<2x1x96xf32, #tpu.memory_space<vmem>>, vector<1x1x96xf32>
    %429 = vector.shape_cast %428 : vector<1x1x96xf32> to vector<1x96xf32>
    %430 = vector.broadcast %429 : vector<1x96xf32> to vector<16x96xf32>
    %431 = arith.addf %427, %430 : vector<16x96xf32>
    %432 = vector.extract_strided_slice %431 {offsets = [0, 0], sizes = [8, 32], strides = [1, 1]} : vector<16x96xf32> to vector<8x32xf32>
    %433 = vector.extract_strided_slice %431 {offsets = [0, 32], sizes = [8, 32], strides = [1, 1]} : vector<16x96xf32> to vector<8x32xf32>
    %434 = vector.extract_strided_slice %431 {offsets = [0, 64], sizes = [8, 32], strides = [1, 1]} : vector<16x96xf32> to vector<8x32xf32>
    %435 = vector.extract_strided_slice %432 {offsets = [0, 0], sizes = [8, 8], strides = [1, 1]} : vector<8x32xf32> to vector<8x8xf32>
    %436 = vector.extract_strided_slice %433 {offsets = [0, 0], sizes = [8, 8], strides = [1, 1]} : vector<8x32xf32> to vector<8x8xf32>
    %437 = vector.extract_strided_slice %434 {offsets = [0, 0], sizes = [8, 8], strides = [1, 1]} : vector<8x32xf32> to vector<8x8xf32>
    %438 = tpu.transpose %436, [1, 0] : vector<8x8xf32> -> vector<8x8xf32>
    %cst_156 = arith.constant dense<0.000000e+00> : vector<8x8xf32>
    %439 = tpu.matmul %435, %438, %cst_156 {dimension_numbers = #tpu.dot_dimension_numbers<[1], [0], [0], [1], [0, 0, 1, 1], [], []>} : vector<8x8xf32>, vector<8x8xf32>, vector<8x8xf32> -> vector<8x8xf32>
    %440 = arith.addf %439, %1 : vector<8x8xf32>
    %cst_157 = arith.constant dense<0xFF800000> : vector<8xf32>
    %441 = vector.multi_reduction <maximumf>, %440, %cst_157 [1] : vector<8x8xf32> to vector<8xf32>
    %442 = vector.shape_cast %441 : vector<8xf32> to vector<8x1xf32>
    %443 = vector.broadcast %442 : vector<8x1xf32> to vector<8x8xf32>
    %444 = arith.subf %440, %443 : vector<8x8xf32>
    %445 = math.exp %444 : vector<8x8xf32>
    %cst_158 = arith.constant dense<0.000000e+00> : vector<8xf32>
    %446 = vector.multi_reduction <add>, %445, %cst_158 [1] : vector<8x8xf32> to vector<8xf32>
    %447 = vector.shape_cast %446 : vector<8xf32> to vector<8x1xf32>
    %448 = tpu.reciprocal %447 {approx = true} : vector<8x1xf32> -> vector<8x1xf32>
    %449 = vector.broadcast %448 : vector<8x1xf32> to vector<8x8xf32>
    %450 = arith.mulf %445, %449 : vector<8x8xf32>
    %cst_159 = arith.constant dense<0.000000e+00> : vector<8x8xf32>
    %451 = tpu.matmul %450, %437, %cst_159 {dimension_numbers = #tpu.dot_dimension_numbers<[1], [0], [0], [1], [0, 0, 1, 1], [], []>} : vector<8x8xf32>, vector<8x8xf32>, vector<8x8xf32> -> vector<8x8xf32>
    %452 = vector.extract_strided_slice %432 {offsets = [0, 8], sizes = [8, 8], strides = [1, 1]} : vector<8x32xf32> to vector<8x8xf32>
    %453 = vector.extract_strided_slice %433 {offsets = [0, 8], sizes = [8, 8], strides = [1, 1]} : vector<8x32xf32> to vector<8x8xf32>
    %454 = vector.extract_strided_slice %434 {offsets = [0, 8], sizes = [8, 8], strides = [1, 1]} : vector<8x32xf32> to vector<8x8xf32>
    %455 = tpu.transpose %453, [1, 0] : vector<8x8xf32> -> vector<8x8xf32>
    %cst_160 = arith.constant dense<0.000000e+00> : vector<8x8xf32>
    %456 = tpu.matmul %452, %455, %cst_160 {dimension_numbers = #tpu.dot_dimension_numbers<[1], [0], [0], [1], [0, 0, 1, 1], [], []>} : vector<8x8xf32>, vector<8x8xf32>, vector<8x8xf32> -> vector<8x8xf32>
    %457 = arith.addf %456, %1 : vector<8x8xf32>
    %cst_161 = arith.constant dense<0xFF800000> : vector<8xf32>
    %458 = vector.multi_reduction <maximumf>, %457, %cst_161 [1] : vector<8x8xf32> to vector<8xf32>
    %459 = vector.shape_cast %458 : vector<8xf32> to vector<8x1xf32>
    %460 = vector.broadcast %459 : vector<8x1xf32> to vector<8x8xf32>
    %461 = arith.subf %457, %460 : vector<8x8xf32>
    %462 = math.exp %461 : vector<8x8xf32>
    %cst_162 = arith.constant dense<0.000000e+00> : vector<8xf32>
    %463 = vector.multi_reduction <add>, %462, %cst_162 [1] : vector<8x8xf32> to vector<8xf32>
    %464 = vector.shape_cast %463 : vector<8xf32> to vector<8x1xf32>
    %465 = tpu.reciprocal %464 {approx = true} : vector<8x1xf32> -> vector<8x1xf32>
    %466 = vector.broadcast %465 : vector<8x1xf32> to vector<8x8xf32>
    %467 = arith.mulf %462, %466 : vector<8x8xf32>
    %cst_163 = arith.constant dense<0.000000e+00> : vector<8x8xf32>
    %468 = tpu.matmul %467, %454, %cst_163 {dimension_numbers = #tpu.dot_dimension_numbers<[1], [0], [0], [1], [0, 0, 1, 1], [], []>} : vector<8x8xf32>, vector<8x8xf32>, vector<8x8xf32> -> vector<8x8xf32>
    %469 = vector.extract_strided_slice %432 {offsets = [0, 16], sizes = [8, 8], strides = [1, 1]} : vector<8x32xf32> to vector<8x8xf32>
    %470 = vector.extract_strided_slice %433 {offsets = [0, 16], sizes = [8, 8], strides = [1, 1]} : vector<8x32xf32> to vector<8x8xf32>
    %471 = vector.extract_strided_slice %434 {offsets = [0, 16], sizes = [8, 8], strides = [1, 1]} : vector<8x32xf32> to vector<8x8xf32>
    %472 = tpu.transpose %470, [1, 0] : vector<8x8xf32> -> vector<8x8xf32>
    %cst_164 = arith.constant dense<0.000000e+00> : vector<8x8xf32>
    %473 = tpu.matmul %469, %472, %cst_164 {dimension_numbers = #tpu.dot_dimension_numbers<[1], [0], [0], [1], [0, 0, 1, 1], [], []>} : vector<8x8xf32>, vector<8x8xf32>, vector<8x8xf32> -> vector<8x8xf32>
    %474 = arith.addf %473, %1 : vector<8x8xf32>
    %cst_165 = arith.constant dense<0xFF800000> : vector<8xf32>
    %475 = vector.multi_reduction <maximumf>, %474, %cst_165 [1] : vector<8x8xf32> to vector<8xf32>
    %476 = vector.shape_cast %475 : vector<8xf32> to vector<8x1xf32>
    %477 = vector.broadcast %476 : vector<8x1xf32> to vector<8x8xf32>
    %478 = arith.subf %474, %477 : vector<8x8xf32>
    %479 = math.exp %478 : vector<8x8xf32>
    %cst_166 = arith.constant dense<0.000000e+00> : vector<8xf32>
    %480 = vector.multi_reduction <add>, %479, %cst_166 [1] : vector<8x8xf32> to vector<8xf32>
    %481 = vector.shape_cast %480 : vector<8xf32> to vector<8x1xf32>
    %482 = tpu.reciprocal %481 {approx = true} : vector<8x1xf32> -> vector<8x1xf32>
    %483 = vector.broadcast %482 : vector<8x1xf32> to vector<8x8xf32>
    %484 = arith.mulf %479, %483 : vector<8x8xf32>
    %cst_167 = arith.constant dense<0.000000e+00> : vector<8x8xf32>
    %485 = tpu.matmul %484, %471, %cst_167 {dimension_numbers = #tpu.dot_dimension_numbers<[1], [0], [0], [1], [0, 0, 1, 1], [], []>} : vector<8x8xf32>, vector<8x8xf32>, vector<8x8xf32> -> vector<8x8xf32>
    %486 = vector.extract_strided_slice %432 {offsets = [0, 24], sizes = [8, 8], strides = [1, 1]} : vector<8x32xf32> to vector<8x8xf32>
    %487 = vector.extract_strided_slice %433 {offsets = [0, 24], sizes = [8, 8], strides = [1, 1]} : vector<8x32xf32> to vector<8x8xf32>
    %488 = vector.extract_strided_slice %434 {offsets = [0, 24], sizes = [8, 8], strides = [1, 1]} : vector<8x32xf32> to vector<8x8xf32>
    %489 = tpu.transpose %487, [1, 0] : vector<8x8xf32> -> vector<8x8xf32>
    %cst_168 = arith.constant dense<0.000000e+00> : vector<8x8xf32>
    %490 = tpu.matmul %486, %489, %cst_168 {dimension_numbers = #tpu.dot_dimension_numbers<[1], [0], [0], [1], [0, 0, 1, 1], [], []>} : vector<8x8xf32>, vector<8x8xf32>, vector<8x8xf32> -> vector<8x8xf32>
    %491 = arith.addf %490, %1 : vector<8x8xf32>
    %cst_169 = arith.constant dense<0xFF800000> : vector<8xf32>
    %492 = vector.multi_reduction <maximumf>, %491, %cst_169 [1] : vector<8x8xf32> to vector<8xf32>
    %493 = vector.shape_cast %492 : vector<8xf32> to vector<8x1xf32>
    %494 = vector.broadcast %493 : vector<8x1xf32> to vector<8x8xf32>
    %495 = arith.subf %491, %494 : vector<8x8xf32>
    %496 = math.exp %495 : vector<8x8xf32>
    %cst_170 = arith.constant dense<0.000000e+00> : vector<8xf32>
    %497 = vector.multi_reduction <add>, %496, %cst_170 [1] : vector<8x8xf32> to vector<8xf32>
    %498 = vector.shape_cast %497 : vector<8xf32> to vector<8x1xf32>
    %499 = tpu.reciprocal %498 {approx = true} : vector<8x1xf32> -> vector<8x1xf32>
    %500 = vector.broadcast %499 : vector<8x1xf32> to vector<8x8xf32>
    %501 = arith.mulf %496, %500 : vector<8x8xf32>
    %cst_171 = arith.constant dense<0.000000e+00> : vector<8x8xf32>
    %502 = tpu.matmul %501, %488, %cst_171 {dimension_numbers = #tpu.dot_dimension_numbers<[1], [0], [0], [1], [0, 0, 1, 1], [], []>} : vector<8x8xf32>, vector<8x8xf32>, vector<8x8xf32> -> vector<8x8xf32>
    %503 = tpu.concatenate %451, %468, %485, %502 in 1 : vector<8x8xf32>, vector<8x8xf32>, vector<8x8xf32>, vector<8x8xf32> -> vector<8x32xf32>
    %504 = vector.extract_strided_slice %431 {offsets = [8, 0], sizes = [8, 32], strides = [1, 1]} : vector<16x96xf32> to vector<8x32xf32>
    %505 = vector.extract_strided_slice %431 {offsets = [8, 32], sizes = [8, 32], strides = [1, 1]} : vector<16x96xf32> to vector<8x32xf32>
    %506 = vector.extract_strided_slice %431 {offsets = [8, 64], sizes = [8, 32], strides = [1, 1]} : vector<16x96xf32> to vector<8x32xf32>
    %507 = vector.extract_strided_slice %504 {offsets = [0, 0], sizes = [8, 8], strides = [1, 1]} : vector<8x32xf32> to vector<8x8xf32>
    %508 = vector.extract_strided_slice %505 {offsets = [0, 0], sizes = [8, 8], strides = [1, 1]} : vector<8x32xf32> to vector<8x8xf32>
    %509 = vector.extract_strided_slice %506 {offsets = [0, 0], sizes = [8, 8], strides = [1, 1]} : vector<8x32xf32> to vector<8x8xf32>
    %510 = tpu.transpose %508, [1, 0] : vector<8x8xf32> -> vector<8x8xf32>
    %cst_172 = arith.constant dense<0.000000e+00> : vector<8x8xf32>
    %511 = tpu.matmul %507, %510, %cst_172 {dimension_numbers = #tpu.dot_dimension_numbers<[1], [0], [0], [1], [0, 0, 1, 1], [], []>} : vector<8x8xf32>, vector<8x8xf32>, vector<8x8xf32> -> vector<8x8xf32>
    %512 = arith.addf %511, %1 : vector<8x8xf32>
    %cst_173 = arith.constant dense<0xFF800000> : vector<8xf32>
    %513 = vector.multi_reduction <maximumf>, %512, %cst_173 [1] : vector<8x8xf32> to vector<8xf32>
    %514 = vector.shape_cast %513 : vector<8xf32> to vector<8x1xf32>
    %515 = vector.broadcast %514 : vector<8x1xf32> to vector<8x8xf32>
    %516 = arith.subf %512, %515 : vector<8x8xf32>
    %517 = math.exp %516 : vector<8x8xf32>
    %cst_174 = arith.constant dense<0.000000e+00> : vector<8xf32>
    %518 = vector.multi_reduction <add>, %517, %cst_174 [1] : vector<8x8xf32> to vector<8xf32>
    %519 = vector.shape_cast %518 : vector<8xf32> to vector<8x1xf32>
    %520 = tpu.reciprocal %519 {approx = true} : vector<8x1xf32> -> vector<8x1xf32>
    %521 = vector.broadcast %520 : vector<8x1xf32> to vector<8x8xf32>
    %522 = arith.mulf %517, %521 : vector<8x8xf32>
    %cst_175 = arith.constant dense<0.000000e+00> : vector<8x8xf32>
    %523 = tpu.matmul %522, %509, %cst_175 {dimension_numbers = #tpu.dot_dimension_numbers<[1], [0], [0], [1], [0, 0, 1, 1], [], []>} : vector<8x8xf32>, vector<8x8xf32>, vector<8x8xf32> -> vector<8x8xf32>
    %524 = vector.extract_strided_slice %504 {offsets = [0, 8], sizes = [8, 8], strides = [1, 1]} : vector<8x32xf32> to vector<8x8xf32>
    %525 = vector.extract_strided_slice %505 {offsets = [0, 8], sizes = [8, 8], strides = [1, 1]} : vector<8x32xf32> to vector<8x8xf32>
    %526 = vector.extract_strided_slice %506 {offsets = [0, 8], sizes = [8, 8], strides = [1, 1]} : vector<8x32xf32> to vector<8x8xf32>
    %527 = tpu.transpose %525, [1, 0] : vector<8x8xf32> -> vector<8x8xf32>
    %cst_176 = arith.constant dense<0.000000e+00> : vector<8x8xf32>
    %528 = tpu.matmul %524, %527, %cst_176 {dimension_numbers = #tpu.dot_dimension_numbers<[1], [0], [0], [1], [0, 0, 1, 1], [], []>} : vector<8x8xf32>, vector<8x8xf32>, vector<8x8xf32> -> vector<8x8xf32>
    %529 = arith.addf %528, %1 : vector<8x8xf32>
    %cst_177 = arith.constant dense<0xFF800000> : vector<8xf32>
    %530 = vector.multi_reduction <maximumf>, %529, %cst_177 [1] : vector<8x8xf32> to vector<8xf32>
    %531 = vector.shape_cast %530 : vector<8xf32> to vector<8x1xf32>
    %532 = vector.broadcast %531 : vector<8x1xf32> to vector<8x8xf32>
    %533 = arith.subf %529, %532 : vector<8x8xf32>
    %534 = math.exp %533 : vector<8x8xf32>
    %cst_178 = arith.constant dense<0.000000e+00> : vector<8xf32>
    %535 = vector.multi_reduction <add>, %534, %cst_178 [1] : vector<8x8xf32> to vector<8xf32>
    %536 = vector.shape_cast %535 : vector<8xf32> to vector<8x1xf32>
    %537 = tpu.reciprocal %536 {approx = true} : vector<8x1xf32> -> vector<8x1xf32>
    %538 = vector.broadcast %537 : vector<8x1xf32> to vector<8x8xf32>
    %539 = arith.mulf %534, %538 : vector<8x8xf32>
    %cst_179 = arith.constant dense<0.000000e+00> : vector<8x8xf32>
    %540 = tpu.matmul %539, %526, %cst_179 {dimension_numbers = #tpu.dot_dimension_numbers<[1], [0], [0], [1], [0, 0, 1, 1], [], []>} : vector<8x8xf32>, vector<8x8xf32>, vector<8x8xf32> -> vector<8x8xf32>
    %541 = vector.extract_strided_slice %504 {offsets = [0, 16], sizes = [8, 8], strides = [1, 1]} : vector<8x32xf32> to vector<8x8xf32>
    %542 = vector.extract_strided_slice %505 {offsets = [0, 16], sizes = [8, 8], strides = [1, 1]} : vector<8x32xf32> to vector<8x8xf32>
    %543 = vector.extract_strided_slice %506 {offsets = [0, 16], sizes = [8, 8], strides = [1, 1]} : vector<8x32xf32> to vector<8x8xf32>
    %544 = tpu.transpose %542, [1, 0] : vector<8x8xf32> -> vector<8x8xf32>
    %cst_180 = arith.constant dense<0.000000e+00> : vector<8x8xf32>
    %545 = tpu.matmul %541, %544, %cst_180 {dimension_numbers = #tpu.dot_dimension_numbers<[1], [0], [0], [1], [0, 0, 1, 1], [], []>} : vector<8x8xf32>, vector<8x8xf32>, vector<8x8xf32> -> vector<8x8xf32>
    %546 = arith.addf %545, %1 : vector<8x8xf32>
    %cst_181 = arith.constant dense<0xFF800000> : vector<8xf32>
    %547 = vector.multi_reduction <maximumf>, %546, %cst_181 [1] : vector<8x8xf32> to vector<8xf32>
    %548 = vector.shape_cast %547 : vector<8xf32> to vector<8x1xf32>
    %549 = vector.broadcast %548 : vector<8x1xf32> to vector<8x8xf32>
    %550 = arith.subf %546, %549 : vector<8x8xf32>
    %551 = math.exp %550 : vector<8x8xf32>
    %cst_182 = arith.constant dense<0.000000e+00> : vector<8xf32>
    %552 = vector.multi_reduction <add>, %551, %cst_182 [1] : vector<8x8xf32> to vector<8xf32>
    %553 = vector.shape_cast %552 : vector<8xf32> to vector<8x1xf32>
    %554 = tpu.reciprocal %553 {approx = true} : vector<8x1xf32> -> vector<8x1xf32>
    %555 = vector.broadcast %554 : vector<8x1xf32> to vector<8x8xf32>
    %556 = arith.mulf %551, %555 : vector<8x8xf32>
    %cst_183 = arith.constant dense<0.000000e+00> : vector<8x8xf32>
    %557 = tpu.matmul %556, %543, %cst_183 {dimension_numbers = #tpu.dot_dimension_numbers<[1], [0], [0], [1], [0, 0, 1, 1], [], []>} : vector<8x8xf32>, vector<8x8xf32>, vector<8x8xf32> -> vector<8x8xf32>
    %558 = vector.extract_strided_slice %504 {offsets = [0, 24], sizes = [8, 8], strides = [1, 1]} : vector<8x32xf32> to vector<8x8xf32>
    %559 = vector.extract_strided_slice %505 {offsets = [0, 24], sizes = [8, 8], strides = [1, 1]} : vector<8x32xf32> to vector<8x8xf32>
    %560 = vector.extract_strided_slice %506 {offsets = [0, 24], sizes = [8, 8], strides = [1, 1]} : vector<8x32xf32> to vector<8x8xf32>
    %561 = tpu.transpose %559, [1, 0] : vector<8x8xf32> -> vector<8x8xf32>
    %cst_184 = arith.constant dense<0.000000e+00> : vector<8x8xf32>
    %562 = tpu.matmul %558, %561, %cst_184 {dimension_numbers = #tpu.dot_dimension_numbers<[1], [0], [0], [1], [0, 0, 1, 1], [], []>} : vector<8x8xf32>, vector<8x8xf32>, vector<8x8xf32> -> vector<8x8xf32>
    %563 = arith.addf %562, %1 : vector<8x8xf32>
    %cst_185 = arith.constant dense<0xFF800000> : vector<8xf32>
    %564 = vector.multi_reduction <maximumf>, %563, %cst_185 [1] : vector<8x8xf32> to vector<8xf32>
    %565 = vector.shape_cast %564 : vector<8xf32> to vector<8x1xf32>
    %566 = vector.broadcast %565 : vector<8x1xf32> to vector<8x8xf32>
    %567 = arith.subf %563, %566 : vector<8x8xf32>
    %568 = math.exp %567 : vector<8x8xf32>
    %cst_186 = arith.constant dense<0.000000e+00> : vector<8xf32>
    %569 = vector.multi_reduction <add>, %568, %cst_186 [1] : vector<8x8xf32> to vector<8xf32>
    %570 = vector.shape_cast %569 : vector<8xf32> to vector<8x1xf32>
    %571 = tpu.reciprocal %570 {approx = true} : vector<8x1xf32> -> vector<8x1xf32>
    %572 = vector.broadcast %571 : vector<8x1xf32> to vector<8x8xf32>
    %573 = arith.mulf %568, %572 : vector<8x8xf32>
    %cst_187 = arith.constant dense<0.000000e+00> : vector<8x8xf32>
    %574 = tpu.matmul %573, %560, %cst_187 {dimension_numbers = #tpu.dot_dimension_numbers<[1], [0], [0], [1], [0, 0, 1, 1], [], []>} : vector<8x8xf32>, vector<8x8xf32>, vector<8x8xf32> -> vector<8x8xf32>
    %575 = tpu.concatenate %523, %540, %557, %574 in 1 : vector<8x8xf32>, vector<8x8xf32>, vector<8x8xf32>, vector<8x8xf32> -> vector<8x32xf32>
    %576 = tpu.concatenate %503, %575 in 0 : vector<8x32xf32>, vector<8x32xf32> -> vector<16x32xf32>
    %c1_188 = arith.constant 1 : index
    %c0_189 = arith.constant 0 : index
    %c0_190 = arith.constant 0 : index
    %577 = vector.load %arg5[%c1_188, %c0_189, %c0_190] : memref<2x32x32xf32, #tpu.memory_space<vmem>>, vector<1x32x32xf32>
    %578 = vector.shape_cast %577 : vector<1x32x32xf32> to vector<32x32xf32>
    %cst_191 = arith.constant dense<0.000000e+00> : vector<16x32xf32>
    %579 = tpu.matmul %576, %578, %cst_191 {dimension_numbers = #tpu.dot_dimension_numbers<[1], [0], [0], [1], [0, 0, 1, 1], [], []>} : vector<16x32xf32>, vector<32x32xf32>, vector<16x32xf32> -> vector<16x32xf32>
    %c1_192 = arith.constant 1 : index
    %c0_193 = arith.constant 0 : index
    %c0_194 = arith.constant 0 : index
    %580 = vector.load %arg6[%c1_192, %c0_193, %c0_194] : memref<2x1x32xf32, #tpu.memory_space<vmem>>, vector<1x1x32xf32>
    %581 = vector.shape_cast %580 : vector<1x1x32xf32> to vector<1x32xf32>
    %582 = vector.broadcast %581 : vector<1x32xf32> to vector<16x32xf32>
    %583 = arith.addf %579, %582 : vector<16x32xf32>
    %584 = arith.addf %424, %583 : vector<16x32xf32>
    %c1_195 = arith.constant 1 : index
    %c0_196 = arith.constant 0 : index
    %c0_197 = arith.constant 0 : index
    %585 = vector.load %arg15[%c1_195, %c0_196, %c0_197] : memref<2x1x32xf32, #tpu.memory_space<vmem>>, vector<1x1x32xf32>
    %586 = vector.shape_cast %585 : vector<1x1x32xf32> to vector<1x32xf32>
    %c1_198 = arith.constant 1 : index
    %c0_199 = arith.constant 0 : index
    %c0_200 = arith.constant 0 : index
    %587 = vector.load %arg16[%c1_198, %c0_199, %c0_200] : memref<2x1x32xf32, #tpu.memory_space<vmem>>, vector<1x1x32xf32>
    %588 = vector.shape_cast %587 : vector<1x1x32xf32> to vector<1x32xf32>
    %cst_201 = arith.constant dense<0.000000e+00> : vector<16xf32>
    %589 = vector.multi_reduction <add>, %584, %cst_201 [1] : vector<16x32xf32> to vector<16xf32>
    %590 = vector.shape_cast %589 : vector<16xf32> to vector<16x1xf32>
    %cst_202 = arith.constant 3.200000e+01 : f32
    %591 = vector.broadcast %cst_202 : f32 to vector<16x1xf32>
    %592 = arith.divf %590, %591 : vector<16x1xf32>
    %593 = vector.broadcast %592 : vector<16x1xf32> to vector<16x32xf32>
    %594 = arith.subf %584, %593 : vector<16x32xf32>
    %595 = arith.mulf %594, %594 : vector<16x32xf32>
    %cst_203 = arith.constant dense<0.000000e+00> : vector<16xf32>
    %596 = vector.multi_reduction <add>, %595, %cst_203 [1] : vector<16x32xf32> to vector<16xf32>
    %597 = vector.shape_cast %596 : vector<16xf32> to vector<16x1xf32>
    %cst_204 = arith.constant 3.200000e+01 : f32
    %598 = vector.broadcast %cst_204 : f32 to vector<16x1xf32>
    %599 = arith.divf %597, %598 : vector<16x1xf32>
    %600 = vector.broadcast %592 : vector<16x1xf32> to vector<16x32xf32>
    %601 = arith.subf %584, %600 : vector<16x32xf32>
    %cst_205 = arith.constant 9.99999974E-6 : f32
    %602 = vector.broadcast %cst_205 : f32 to vector<16x1xf32>
    %603 = arith.addf %599, %602 : vector<16x1xf32>
    %604 = math.rsqrt %603 : vector<16x1xf32>
    %605 = vector.broadcast %604 : vector<16x1xf32> to vector<16x32xf32>
    %606 = arith.mulf %601, %605 : vector<16x32xf32>
    %607 = vector.broadcast %586 : vector<1x32xf32> to vector<16x32xf32>
    %608 = arith.mulf %606, %607 : vector<16x32xf32>
    %609 = vector.broadcast %588 : vector<1x32xf32> to vector<16x32xf32>
    %610 = arith.addf %608, %609 : vector<16x32xf32>
    %c1_206 = arith.constant 1 : index
    %c0_207 = arith.constant 0 : index
    %c0_208 = arith.constant 0 : index
    %611 = vector.load %arg7[%c1_206, %c0_207, %c0_208] : memref<2x32x96xf32, #tpu.memory_space<vmem>>, vector<1x32x96xf32>
    %612 = vector.shape_cast %611 : vector<1x32x96xf32> to vector<32x96xf32>
    %c1_209 = arith.constant 1 : index
    %c0_210 = arith.constant 0 : index
    %c0_211 = arith.constant 0 : index
    %613 = vector.load %arg8[%c1_209, %c0_210, %c0_211] : memref<2x1x96xf32, #tpu.memory_space<vmem>>, vector<1x1x96xf32>
    %614 = vector.shape_cast %613 : vector<1x1x96xf32> to vector<1x96xf32>
    %615 = vector.extract_strided_slice %612 {offsets = [0, 0], sizes = [32, 32], strides = [1, 1]} : vector<32x96xf32> to vector<32x32xf32>
    %cst_212 = arith.constant dense<0.000000e+00> : vector<16x32xf32>
    %616 = tpu.matmul %610, %615, %cst_212 {dimension_numbers = #tpu.dot_dimension_numbers<[1], [0], [0], [1], [0, 0, 1, 1], [], []>} : vector<16x32xf32>, vector<32x32xf32>, vector<16x32xf32> -> vector<16x32xf32>
    %617 = vector.extract_strided_slice %614 {offsets = [0, 0], sizes = [1, 32], strides = [1, 1]} : vector<1x96xf32> to vector<1x32xf32>
    %618 = vector.broadcast %617 : vector<1x32xf32> to vector<16x32xf32>
    %619 = arith.addf %616, %618 : vector<16x32xf32>
    %620 = vector.extract_strided_slice %612 {offsets = [0, 32], sizes = [32, 64], strides = [1, 1]} : vector<32x96xf32> to vector<32x64xf32>
    %cst_213 = arith.constant dense<0.000000e+00> : vector<12x64xf32>
    %621 = tpu.matmul %3, %620, %cst_213 {dimension_numbers = #tpu.dot_dimension_numbers<[1], [0], [0], [1], [0, 0, 1, 1], [], []>} : vector<12x32xf32>, vector<32x64xf32>, vector<12x64xf32> -> vector<12x64xf32>
    %622 = vector.extract_strided_slice %614 {offsets = [0, 32], sizes = [1, 64], strides = [1, 1]} : vector<1x96xf32> to vector<1x64xf32>
    %623 = vector.broadcast %622 : vector<1x64xf32> to vector<12x64xf32>
    %624 = arith.addf %621, %623 : vector<12x64xf32>
    %625 = vector.extract_strided_slice %619 {offsets = [0, 0], sizes = [8, 32], strides = [1, 1]} : vector<16x32xf32> to vector<8x32xf32>
    %626 = vector.extract_strided_slice %624 {offsets = [0, 0], sizes = [12, 32], strides = [1, 1]} : vector<12x64xf32> to vector<12x32xf32>
    %627 = vector.extract_strided_slice %624 {offsets = [0, 32], sizes = [12, 32], strides = [1, 1]} : vector<12x64xf32> to vector<12x32xf32>
    %628 = vector.extract_strided_slice %625 {offsets = [0, 0], sizes = [8, 8], strides = [1, 1]} : vector<8x32xf32> to vector<8x8xf32>
    %629 = vector.extract_strided_slice %626 {offsets = [0, 0], sizes = [12, 8], strides = [1, 1]} : vector<12x32xf32> to vector<12x8xf32>
    %630 = vector.extract_strided_slice %627 {offsets = [0, 0], sizes = [12, 8], strides = [1, 1]} : vector<12x32xf32> to vector<12x8xf32>
    %631 = tpu.transpose %629, [1, 0] : vector<12x8xf32> -> vector<8x12xf32>
    %cst_214 = arith.constant dense<0.000000e+00> : vector<8x12xf32>
    %632 = tpu.matmul %628, %631, %cst_214 {dimension_numbers = #tpu.dot_dimension_numbers<[1], [0], [0], [1], [0, 0, 1, 1], [], []>} : vector<8x8xf32>, vector<8x12xf32>, vector<8x12xf32> -> vector<8x12xf32>
    %cst_215 = arith.constant dense<0xFF800000> : vector<8xf32>
    %633 = vector.multi_reduction <maximumf>, %632, %cst_215 [1] : vector<8x12xf32> to vector<8xf32>
    %634 = vector.shape_cast %633 : vector<8xf32> to vector<8x1xf32>
    %635 = vector.broadcast %634 : vector<8x1xf32> to vector<8x12xf32>
    %636 = arith.subf %632, %635 : vector<8x12xf32>
    %637 = math.exp %636 : vector<8x12xf32>
    %cst_216 = arith.constant dense<0.000000e+00> : vector<8xf32>
    %638 = vector.multi_reduction <add>, %637, %cst_216 [1] : vector<8x12xf32> to vector<8xf32>
    %639 = vector.shape_cast %638 : vector<8xf32> to vector<8x1xf32>
    %640 = tpu.reciprocal %639 {approx = true} : vector<8x1xf32> -> vector<8x1xf32>
    %641 = vector.broadcast %640 : vector<8x1xf32> to vector<8x12xf32>
    %642 = arith.mulf %637, %641 : vector<8x12xf32>
    %cst_217 = arith.constant dense<0.000000e+00> : vector<8x8xf32>
    %643 = tpu.matmul %642, %630, %cst_217 {dimension_numbers = #tpu.dot_dimension_numbers<[1], [0], [0], [1], [0, 0, 1, 1], [], []>} : vector<8x12xf32>, vector<12x8xf32>, vector<8x8xf32> -> vector<8x8xf32>
    %644 = vector.extract_strided_slice %625 {offsets = [0, 8], sizes = [8, 8], strides = [1, 1]} : vector<8x32xf32> to vector<8x8xf32>
    %645 = vector.extract_strided_slice %626 {offsets = [0, 8], sizes = [12, 8], strides = [1, 1]} : vector<12x32xf32> to vector<12x8xf32>
    %646 = vector.extract_strided_slice %627 {offsets = [0, 8], sizes = [12, 8], strides = [1, 1]} : vector<12x32xf32> to vector<12x8xf32>
    %647 = tpu.transpose %645, [1, 0] : vector<12x8xf32> -> vector<8x12xf32>
    %cst_218 = arith.constant dense<0.000000e+00> : vector<8x12xf32>
    %648 = tpu.matmul %644, %647, %cst_218 {dimension_numbers = #tpu.dot_dimension_numbers<[1], [0], [0], [1], [0, 0, 1, 1], [], []>} : vector<8x8xf32>, vector<8x12xf32>, vector<8x12xf32> -> vector<8x12xf32>
    %cst_219 = arith.constant dense<0xFF800000> : vector<8xf32>
    %649 = vector.multi_reduction <maximumf>, %648, %cst_219 [1] : vector<8x12xf32> to vector<8xf32>
    %650 = vector.shape_cast %649 : vector<8xf32> to vector<8x1xf32>
    %651 = vector.broadcast %650 : vector<8x1xf32> to vector<8x12xf32>
    %652 = arith.subf %648, %651 : vector<8x12xf32>
    %653 = math.exp %652 : vector<8x12xf32>
    %cst_220 = arith.constant dense<0.000000e+00> : vector<8xf32>
    %654 = vector.multi_reduction <add>, %653, %cst_220 [1] : vector<8x12xf32> to vector<8xf32>
    %655 = vector.shape_cast %654 : vector<8xf32> to vector<8x1xf32>
    %656 = tpu.reciprocal %655 {approx = true} : vector<8x1xf32> -> vector<8x1xf32>
    %657 = vector.broadcast %656 : vector<8x1xf32> to vector<8x12xf32>
    %658 = arith.mulf %653, %657 : vector<8x12xf32>
    %cst_221 = arith.constant dense<0.000000e+00> : vector<8x8xf32>
    %659 = tpu.matmul %658, %646, %cst_221 {dimension_numbers = #tpu.dot_dimension_numbers<[1], [0], [0], [1], [0, 0, 1, 1], [], []>} : vector<8x12xf32>, vector<12x8xf32>, vector<8x8xf32> -> vector<8x8xf32>
    %660 = vector.extract_strided_slice %625 {offsets = [0, 16], sizes = [8, 8], strides = [1, 1]} : vector<8x32xf32> to vector<8x8xf32>
    %661 = vector.extract_strided_slice %626 {offsets = [0, 16], sizes = [12, 8], strides = [1, 1]} : vector<12x32xf32> to vector<12x8xf32>
    %662 = vector.extract_strided_slice %627 {offsets = [0, 16], sizes = [12, 8], strides = [1, 1]} : vector<12x32xf32> to vector<12x8xf32>
    %663 = tpu.transpose %661, [1, 0] : vector<12x8xf32> -> vector<8x12xf32>
    %cst_222 = arith.constant dense<0.000000e+00> : vector<8x12xf32>
    %664 = tpu.matmul %660, %663, %cst_222 {dimension_numbers = #tpu.dot_dimension_numbers<[1], [0], [0], [1], [0, 0, 1, 1], [], []>} : vector<8x8xf32>, vector<8x12xf32>, vector<8x12xf32> -> vector<8x12xf32>
    %cst_223 = arith.constant dense<0xFF800000> : vector<8xf32>
    %665 = vector.multi_reduction <maximumf>, %664, %cst_223 [1] : vector<8x12xf32> to vector<8xf32>
    %666 = vector.shape_cast %665 : vector<8xf32> to vector<8x1xf32>
    %667 = vector.broadcast %666 : vector<8x1xf32> to vector<8x12xf32>
    %668 = arith.subf %664, %667 : vector<8x12xf32>
    %669 = math.exp %668 : vector<8x12xf32>
    %cst_224 = arith.constant dense<0.000000e+00> : vector<8xf32>
    %670 = vector.multi_reduction <add>, %669, %cst_224 [1] : vector<8x12xf32> to vector<8xf32>
    %671 = vector.shape_cast %670 : vector<8xf32> to vector<8x1xf32>
    %672 = tpu.reciprocal %671 {approx = true} : vector<8x1xf32> -> vector<8x1xf32>
    %673 = vector.broadcast %672 : vector<8x1xf32> to vector<8x12xf32>
    %674 = arith.mulf %669, %673 : vector<8x12xf32>
    %cst_225 = arith.constant dense<0.000000e+00> : vector<8x8xf32>
    %675 = tpu.matmul %674, %662, %cst_225 {dimension_numbers = #tpu.dot_dimension_numbers<[1], [0], [0], [1], [0, 0, 1, 1], [], []>} : vector<8x12xf32>, vector<12x8xf32>, vector<8x8xf32> -> vector<8x8xf32>
    %676 = vector.extract_strided_slice %625 {offsets = [0, 24], sizes = [8, 8], strides = [1, 1]} : vector<8x32xf32> to vector<8x8xf32>
    %677 = vector.extract_strided_slice %626 {offsets = [0, 24], sizes = [12, 8], strides = [1, 1]} : vector<12x32xf32> to vector<12x8xf32>
    %678 = vector.extract_strided_slice %627 {offsets = [0, 24], sizes = [12, 8], strides = [1, 1]} : vector<12x32xf32> to vector<12x8xf32>
    %679 = tpu.transpose %677, [1, 0] : vector<12x8xf32> -> vector<8x12xf32>
    %cst_226 = arith.constant dense<0.000000e+00> : vector<8x12xf32>
    %680 = tpu.matmul %676, %679, %cst_226 {dimension_numbers = #tpu.dot_dimension_numbers<[1], [0], [0], [1], [0, 0, 1, 1], [], []>} : vector<8x8xf32>, vector<8x12xf32>, vector<8x12xf32> -> vector<8x12xf32>
    %cst_227 = arith.constant dense<0xFF800000> : vector<8xf32>
    %681 = vector.multi_reduction <maximumf>, %680, %cst_227 [1] : vector<8x12xf32> to vector<8xf32>
    %682 = vector.shape_cast %681 : vector<8xf32> to vector<8x1xf32>
    %683 = vector.broadcast %682 : vector<8x1xf32> to vector<8x12xf32>
    %684 = arith.subf %680, %683 : vector<8x12xf32>
    %685 = math.exp %684 : vector<8x12xf32>
    %cst_228 = arith.constant dense<0.000000e+00> : vector<8xf32>
    %686 = vector.multi_reduction <add>, %685, %cst_228 [1] : vector<8x12xf32> to vector<8xf32>
    %687 = vector.shape_cast %686 : vector<8xf32> to vector<8x1xf32>
    %688 = tpu.reciprocal %687 {approx = true} : vector<8x1xf32> -> vector<8x1xf32>
    %689 = vector.broadcast %688 : vector<8x1xf32> to vector<8x12xf32>
    %690 = arith.mulf %685, %689 : vector<8x12xf32>
    %cst_229 = arith.constant dense<0.000000e+00> : vector<8x8xf32>
    %691 = tpu.matmul %690, %678, %cst_229 {dimension_numbers = #tpu.dot_dimension_numbers<[1], [0], [0], [1], [0, 0, 1, 1], [], []>} : vector<8x12xf32>, vector<12x8xf32>, vector<8x8xf32> -> vector<8x8xf32>
    %692 = tpu.concatenate %643, %659, %675, %691 in 1 : vector<8x8xf32>, vector<8x8xf32>, vector<8x8xf32>, vector<8x8xf32> -> vector<8x32xf32>
    %693 = vector.extract_strided_slice %612 {offsets = [0, 32], sizes = [32, 64], strides = [1, 1]} : vector<32x96xf32> to vector<32x64xf32>
    %cst_230 = arith.constant dense<0.000000e+00> : vector<12x64xf32>
    %694 = tpu.matmul %5, %693, %cst_230 {dimension_numbers = #tpu.dot_dimension_numbers<[1], [0], [0], [1], [0, 0, 1, 1], [], []>} : vector<12x32xf32>, vector<32x64xf32>, vector<12x64xf32> -> vector<12x64xf32>
    %695 = vector.extract_strided_slice %614 {offsets = [0, 32], sizes = [1, 64], strides = [1, 1]} : vector<1x96xf32> to vector<1x64xf32>
    %696 = vector.broadcast %695 : vector<1x64xf32> to vector<12x64xf32>
    %697 = arith.addf %694, %696 : vector<12x64xf32>
    %698 = vector.extract_strided_slice %619 {offsets = [8, 0], sizes = [8, 32], strides = [1, 1]} : vector<16x32xf32> to vector<8x32xf32>
    %699 = vector.extract_strided_slice %697 {offsets = [0, 0], sizes = [12, 32], strides = [1, 1]} : vector<12x64xf32> to vector<12x32xf32>
    %700 = vector.extract_strided_slice %697 {offsets = [0, 32], sizes = [12, 32], strides = [1, 1]} : vector<12x64xf32> to vector<12x32xf32>
    %701 = vector.extract_strided_slice %698 {offsets = [0, 0], sizes = [8, 8], strides = [1, 1]} : vector<8x32xf32> to vector<8x8xf32>
    %702 = vector.extract_strided_slice %699 {offsets = [0, 0], sizes = [12, 8], strides = [1, 1]} : vector<12x32xf32> to vector<12x8xf32>
    %703 = vector.extract_strided_slice %700 {offsets = [0, 0], sizes = [12, 8], strides = [1, 1]} : vector<12x32xf32> to vector<12x8xf32>
    %704 = tpu.transpose %702, [1, 0] : vector<12x8xf32> -> vector<8x12xf32>
    %cst_231 = arith.constant dense<0.000000e+00> : vector<8x12xf32>
    %705 = tpu.matmul %701, %704, %cst_231 {dimension_numbers = #tpu.dot_dimension_numbers<[1], [0], [0], [1], [0, 0, 1, 1], [], []>} : vector<8x8xf32>, vector<8x12xf32>, vector<8x12xf32> -> vector<8x12xf32>
    %cst_232 = arith.constant dense<0xFF800000> : vector<8xf32>
    %706 = vector.multi_reduction <maximumf>, %705, %cst_232 [1] : vector<8x12xf32> to vector<8xf32>
    %707 = vector.shape_cast %706 : vector<8xf32> to vector<8x1xf32>
    %708 = vector.broadcast %707 : vector<8x1xf32> to vector<8x12xf32>
    %709 = arith.subf %705, %708 : vector<8x12xf32>
    %710 = math.exp %709 : vector<8x12xf32>
    %cst_233 = arith.constant dense<0.000000e+00> : vector<8xf32>
    %711 = vector.multi_reduction <add>, %710, %cst_233 [1] : vector<8x12xf32> to vector<8xf32>
    %712 = vector.shape_cast %711 : vector<8xf32> to vector<8x1xf32>
    %713 = tpu.reciprocal %712 {approx = true} : vector<8x1xf32> -> vector<8x1xf32>
    %714 = vector.broadcast %713 : vector<8x1xf32> to vector<8x12xf32>
    %715 = arith.mulf %710, %714 : vector<8x12xf32>
    %cst_234 = arith.constant dense<0.000000e+00> : vector<8x8xf32>
    %716 = tpu.matmul %715, %703, %cst_234 {dimension_numbers = #tpu.dot_dimension_numbers<[1], [0], [0], [1], [0, 0, 1, 1], [], []>} : vector<8x12xf32>, vector<12x8xf32>, vector<8x8xf32> -> vector<8x8xf32>
    %717 = vector.extract_strided_slice %698 {offsets = [0, 8], sizes = [8, 8], strides = [1, 1]} : vector<8x32xf32> to vector<8x8xf32>
    %718 = vector.extract_strided_slice %699 {offsets = [0, 8], sizes = [12, 8], strides = [1, 1]} : vector<12x32xf32> to vector<12x8xf32>
    %719 = vector.extract_strided_slice %700 {offsets = [0, 8], sizes = [12, 8], strides = [1, 1]} : vector<12x32xf32> to vector<12x8xf32>
    %720 = tpu.transpose %718, [1, 0] : vector<12x8xf32> -> vector<8x12xf32>
    %cst_235 = arith.constant dense<0.000000e+00> : vector<8x12xf32>
    %721 = tpu.matmul %717, %720, %cst_235 {dimension_numbers = #tpu.dot_dimension_numbers<[1], [0], [0], [1], [0, 0, 1, 1], [], []>} : vector<8x8xf32>, vector<8x12xf32>, vector<8x12xf32> -> vector<8x12xf32>
    %cst_236 = arith.constant dense<0xFF800000> : vector<8xf32>
    %722 = vector.multi_reduction <maximumf>, %721, %cst_236 [1] : vector<8x12xf32> to vector<8xf32>
    %723 = vector.shape_cast %722 : vector<8xf32> to vector<8x1xf32>
    %724 = vector.broadcast %723 : vector<8x1xf32> to vector<8x12xf32>
    %725 = arith.subf %721, %724 : vector<8x12xf32>
    %726 = math.exp %725 : vector<8x12xf32>
    %cst_237 = arith.constant dense<0.000000e+00> : vector<8xf32>
    %727 = vector.multi_reduction <add>, %726, %cst_237 [1] : vector<8x12xf32> to vector<8xf32>
    %728 = vector.shape_cast %727 : vector<8xf32> to vector<8x1xf32>
    %729 = tpu.reciprocal %728 {approx = true} : vector<8x1xf32> -> vector<8x1xf32>
    %730 = vector.broadcast %729 : vector<8x1xf32> to vector<8x12xf32>
    %731 = arith.mulf %726, %730 : vector<8x12xf32>
    %cst_238 = arith.constant dense<0.000000e+00> : vector<8x8xf32>
    %732 = tpu.matmul %731, %719, %cst_238 {dimension_numbers = #tpu.dot_dimension_numbers<[1], [0], [0], [1], [0, 0, 1, 1], [], []>} : vector<8x12xf32>, vector<12x8xf32>, vector<8x8xf32> -> vector<8x8xf32>
    %733 = vector.extract_strided_slice %698 {offsets = [0, 16], sizes = [8, 8], strides = [1, 1]} : vector<8x32xf32> to vector<8x8xf32>
    %734 = vector.extract_strided_slice %699 {offsets = [0, 16], sizes = [12, 8], strides = [1, 1]} : vector<12x32xf32> to vector<12x8xf32>
    %735 = vector.extract_strided_slice %700 {offsets = [0, 16], sizes = [12, 8], strides = [1, 1]} : vector<12x32xf32> to vector<12x8xf32>
    %736 = tpu.transpose %734, [1, 0] : vector<12x8xf32> -> vector<8x12xf32>
    %cst_239 = arith.constant dense<0.000000e+00> : vector<8x12xf32>
    %737 = tpu.matmul %733, %736, %cst_239 {dimension_numbers = #tpu.dot_dimension_numbers<[1], [0], [0], [1], [0, 0, 1, 1], [], []>} : vector<8x8xf32>, vector<8x12xf32>, vector<8x12xf32> -> vector<8x12xf32>
    %cst_240 = arith.constant dense<0xFF800000> : vector<8xf32>
    %738 = vector.multi_reduction <maximumf>, %737, %cst_240 [1] : vector<8x12xf32> to vector<8xf32>
    %739 = vector.shape_cast %738 : vector<8xf32> to vector<8x1xf32>
    %740 = vector.broadcast %739 : vector<8x1xf32> to vector<8x12xf32>
    %741 = arith.subf %737, %740 : vector<8x12xf32>
    %742 = math.exp %741 : vector<8x12xf32>
    %cst_241 = arith.constant dense<0.000000e+00> : vector<8xf32>
    %743 = vector.multi_reduction <add>, %742, %cst_241 [1] : vector<8x12xf32> to vector<8xf32>
    %744 = vector.shape_cast %743 : vector<8xf32> to vector<8x1xf32>
    %745 = tpu.reciprocal %744 {approx = true} : vector<8x1xf32> -> vector<8x1xf32>
    %746 = vector.broadcast %745 : vector<8x1xf32> to vector<8x12xf32>
    %747 = arith.mulf %742, %746 : vector<8x12xf32>
    %cst_242 = arith.constant dense<0.000000e+00> : vector<8x8xf32>
    %748 = tpu.matmul %747, %735, %cst_242 {dimension_numbers = #tpu.dot_dimension_numbers<[1], [0], [0], [1], [0, 0, 1, 1], [], []>} : vector<8x12xf32>, vector<12x8xf32>, vector<8x8xf32> -> vector<8x8xf32>
    %749 = vector.extract_strided_slice %698 {offsets = [0, 24], sizes = [8, 8], strides = [1, 1]} : vector<8x32xf32> to vector<8x8xf32>
    %750 = vector.extract_strided_slice %699 {offsets = [0, 24], sizes = [12, 8], strides = [1, 1]} : vector<12x32xf32> to vector<12x8xf32>
    %751 = vector.extract_strided_slice %700 {offsets = [0, 24], sizes = [12, 8], strides = [1, 1]} : vector<12x32xf32> to vector<12x8xf32>
    %752 = tpu.transpose %750, [1, 0] : vector<12x8xf32> -> vector<8x12xf32>
    %cst_243 = arith.constant dense<0.000000e+00> : vector<8x12xf32>
    %753 = tpu.matmul %749, %752, %cst_243 {dimension_numbers = #tpu.dot_dimension_numbers<[1], [0], [0], [1], [0, 0, 1, 1], [], []>} : vector<8x8xf32>, vector<8x12xf32>, vector<8x12xf32> -> vector<8x12xf32>
    %cst_244 = arith.constant dense<0xFF800000> : vector<8xf32>
    %754 = vector.multi_reduction <maximumf>, %753, %cst_244 [1] : vector<8x12xf32> to vector<8xf32>
    %755 = vector.shape_cast %754 : vector<8xf32> to vector<8x1xf32>
    %756 = vector.broadcast %755 : vector<8x1xf32> to vector<8x12xf32>
    %757 = arith.subf %753, %756 : vector<8x12xf32>
    %758 = math.exp %757 : vector<8x12xf32>
    %cst_245 = arith.constant dense<0.000000e+00> : vector<8xf32>
    %759 = vector.multi_reduction <add>, %758, %cst_245 [1] : vector<8x12xf32> to vector<8xf32>
    %760 = vector.shape_cast %759 : vector<8xf32> to vector<8x1xf32>
    %761 = tpu.reciprocal %760 {approx = true} : vector<8x1xf32> -> vector<8x1xf32>
    %762 = vector.broadcast %761 : vector<8x1xf32> to vector<8x12xf32>
    %763 = arith.mulf %758, %762 : vector<8x12xf32>
    %cst_246 = arith.constant dense<0.000000e+00> : vector<8x8xf32>
    %764 = tpu.matmul %763, %751, %cst_246 {dimension_numbers = #tpu.dot_dimension_numbers<[1], [0], [0], [1], [0, 0, 1, 1], [], []>} : vector<8x12xf32>, vector<12x8xf32>, vector<8x8xf32> -> vector<8x8xf32>
    %765 = tpu.concatenate %716, %732, %748, %764 in 1 : vector<8x8xf32>, vector<8x8xf32>, vector<8x8xf32>, vector<8x8xf32> -> vector<8x32xf32>
    %766 = tpu.concatenate %692, %765 in 0 : vector<8x32xf32>, vector<8x32xf32> -> vector<16x32xf32>
    %c1_247 = arith.constant 1 : index
    %c0_248 = arith.constant 0 : index
    %c0_249 = arith.constant 0 : index
    %767 = vector.load %arg9[%c1_247, %c0_248, %c0_249] : memref<2x32x32xf32, #tpu.memory_space<vmem>>, vector<1x32x32xf32>
    %768 = vector.shape_cast %767 : vector<1x32x32xf32> to vector<32x32xf32>
    %cst_250 = arith.constant dense<0.000000e+00> : vector<16x32xf32>
    %769 = tpu.matmul %766, %768, %cst_250 {dimension_numbers = #tpu.dot_dimension_numbers<[1], [0], [0], [1], [0, 0, 1, 1], [], []>} : vector<16x32xf32>, vector<32x32xf32>, vector<16x32xf32> -> vector<16x32xf32>
    %c1_251 = arith.constant 1 : index
    %c0_252 = arith.constant 0 : index
    %c0_253 = arith.constant 0 : index
    %770 = vector.load %arg10[%c1_251, %c0_252, %c0_253] : memref<2x1x32xf32, #tpu.memory_space<vmem>>, vector<1x1x32xf32>
    %771 = vector.shape_cast %770 : vector<1x1x32xf32> to vector<1x32xf32>
    %772 = vector.broadcast %771 : vector<1x32xf32> to vector<16x32xf32>
    %773 = arith.addf %769, %772 : vector<16x32xf32>
    %774 = arith.addf %610, %773 : vector<16x32xf32>
    %c1_254 = arith.constant 1 : index
    %c0_255 = arith.constant 0 : index
    %c0_256 = arith.constant 0 : index
    %775 = vector.load %arg17[%c1_254, %c0_255, %c0_256] : memref<2x1x32xf32, #tpu.memory_space<vmem>>, vector<1x1x32xf32>
    %776 = vector.shape_cast %775 : vector<1x1x32xf32> to vector<1x32xf32>
    %c1_257 = arith.constant 1 : index
    %c0_258 = arith.constant 0 : index
    %c0_259 = arith.constant 0 : index
    %777 = vector.load %arg18[%c1_257, %c0_258, %c0_259] : memref<2x1x32xf32, #tpu.memory_space<vmem>>, vector<1x1x32xf32>
    %778 = vector.shape_cast %777 : vector<1x1x32xf32> to vector<1x32xf32>
    %cst_260 = arith.constant dense<0.000000e+00> : vector<16xf32>
    %779 = vector.multi_reduction <add>, %774, %cst_260 [1] : vector<16x32xf32> to vector<16xf32>
    %780 = vector.shape_cast %779 : vector<16xf32> to vector<16x1xf32>
    %cst_261 = arith.constant 3.200000e+01 : f32
    %781 = vector.broadcast %cst_261 : f32 to vector<16x1xf32>
    %782 = arith.divf %780, %781 : vector<16x1xf32>
    %783 = vector.broadcast %782 : vector<16x1xf32> to vector<16x32xf32>
    %784 = arith.subf %774, %783 : vector<16x32xf32>
    %785 = arith.mulf %784, %784 : vector<16x32xf32>
    %cst_262 = arith.constant dense<0.000000e+00> : vector<16xf32>
    %786 = vector.multi_reduction <add>, %785, %cst_262 [1] : vector<16x32xf32> to vector<16xf32>
    %787 = vector.shape_cast %786 : vector<16xf32> to vector<16x1xf32>
    %cst_263 = arith.constant 3.200000e+01 : f32
    %788 = vector.broadcast %cst_263 : f32 to vector<16x1xf32>
    %789 = arith.divf %787, %788 : vector<16x1xf32>
    %790 = vector.broadcast %782 : vector<16x1xf32> to vector<16x32xf32>
    %791 = arith.subf %774, %790 : vector<16x32xf32>
    %cst_264 = arith.constant 9.99999974E-6 : f32
    %792 = vector.broadcast %cst_264 : f32 to vector<16x1xf32>
    %793 = arith.addf %789, %792 : vector<16x1xf32>
    %794 = math.rsqrt %793 : vector<16x1xf32>
    %795 = vector.broadcast %794 : vector<16x1xf32> to vector<16x32xf32>
    %796 = arith.mulf %791, %795 : vector<16x32xf32>
    %797 = vector.broadcast %776 : vector<1x32xf32> to vector<16x32xf32>
    %798 = arith.mulf %796, %797 : vector<16x32xf32>
    %799 = vector.broadcast %778 : vector<1x32xf32> to vector<16x32xf32>
    %800 = arith.addf %798, %799 : vector<16x32xf32>
    %c1_265 = arith.constant 1 : index
    %c0_266 = arith.constant 0 : index
    %c0_267 = arith.constant 0 : index
    %801 = vector.load %arg11[%c1_265, %c0_266, %c0_267] : memref<2x32x64xf32, #tpu.memory_space<vmem>>, vector<1x32x64xf32>
    %802 = vector.shape_cast %801 : vector<1x32x64xf32> to vector<32x64xf32>
    %cst_268 = arith.constant dense<0.000000e+00> : vector<16x64xf32>
    %803 = tpu.matmul %800, %802, %cst_268 {dimension_numbers = #tpu.dot_dimension_numbers<[1], [0], [0], [1], [0, 0, 1, 1], [], []>} : vector<16x32xf32>, vector<32x64xf32>, vector<16x64xf32> -> vector<16x64xf32>
    %c1_269 = arith.constant 1 : index
    %c0_270 = arith.constant 0 : index
    %c0_271 = arith.constant 0 : index
    %804 = vector.load %arg12[%c1_269, %c0_270, %c0_271] : memref<2x1x64xf32, #tpu.memory_space<vmem>>, vector<1x1x64xf32>
    %805 = vector.shape_cast %804 : vector<1x1x64xf32> to vector<1x64xf32>
    %806 = vector.broadcast %805 : vector<1x64xf32> to vector<16x64xf32>
    %807 = arith.addf %803, %806 : vector<16x64xf32>
    %cst_272 = arith.constant 0.000000e+00 : f32
    %808 = vector.broadcast %cst_272 : f32 to vector<16x64xf32>
    %809 = arith.maximumf %807, %808 : vector<16x64xf32>
    %c1_273 = arith.constant 1 : index
    %c0_274 = arith.constant 0 : index
    %c0_275 = arith.constant 0 : index
    %810 = vector.load %arg13[%c1_273, %c0_274, %c0_275] : memref<2x64x32xf32, #tpu.memory_space<vmem>>, vector<1x64x32xf32>
    %811 = vector.shape_cast %810 : vector<1x64x32xf32> to vector<64x32xf32>
    %cst_276 = arith.constant dense<0.000000e+00> : vector<16x32xf32>
    %812 = tpu.matmul %809, %811, %cst_276 {dimension_numbers = #tpu.dot_dimension_numbers<[1], [0], [0], [1], [0, 0, 1, 1], [], []>} : vector<16x64xf32>, vector<64x32xf32>, vector<16x32xf32> -> vector<16x32xf32>
    %c1_277 = arith.constant 1 : index
    %c0_278 = arith.constant 0 : index
    %c0_279 = arith.constant 0 : index
    %813 = vector.load %arg14[%c1_277, %c0_278, %c0_279] : memref<2x1x32xf32, #tpu.memory_space<vmem>>, vector<1x1x32xf32>
    %814 = vector.shape_cast %813 : vector<1x1x32xf32> to vector<1x32xf32>
    %815 = vector.broadcast %814 : vector<1x32xf32> to vector<16x32xf32>
    %816 = arith.addf %812, %815 : vector<16x32xf32>
    %817 = arith.addf %800, %816 : vector<16x32xf32>
    %c1_280 = arith.constant 1 : index
    %c0_281 = arith.constant 0 : index
    %c0_282 = arith.constant 0 : index
    %818 = vector.load %arg19[%c1_280, %c0_281, %c0_282] : memref<2x1x32xf32, #tpu.memory_space<vmem>>, vector<1x1x32xf32>
    %819 = vector.shape_cast %818 : vector<1x1x32xf32> to vector<1x32xf32>
    %c1_283 = arith.constant 1 : index
    %c0_284 = arith.constant 0 : index
    %c0_285 = arith.constant 0 : index
    %820 = vector.load %arg20[%c1_283, %c0_284, %c0_285] : memref<2x1x32xf32, #tpu.memory_space<vmem>>, vector<1x1x32xf32>
    %821 = vector.shape_cast %820 : vector<1x1x32xf32> to vector<1x32xf32>
    %cst_286 = arith.constant dense<0.000000e+00> : vector<16xf32>
    %822 = vector.multi_reduction <add>, %817, %cst_286 [1] : vector<16x32xf32> to vector<16xf32>
    %823 = vector.shape_cast %822 : vector<16xf32> to vector<16x1xf32>
    %cst_287 = arith.constant 3.200000e+01 : f32
    %824 = vector.broadcast %cst_287 : f32 to vector<16x1xf32>
    %825 = arith.divf %823, %824 : vector<16x1xf32>
    %826 = vector.broadcast %825 : vector<16x1xf32> to vector<16x32xf32>
    %827 = arith.subf %817, %826 : vector<16x32xf32>
    %828 = arith.mulf %827, %827 : vector<16x32xf32>
    %cst_288 = arith.constant dense<0.000000e+00> : vector<16xf32>
    %829 = vector.multi_reduction <add>, %828, %cst_288 [1] : vector<16x32xf32> to vector<16xf32>
    %830 = vector.shape_cast %829 : vector<16xf32> to vector<16x1xf32>
    %cst_289 = arith.constant 3.200000e+01 : f32
    %831 = vector.broadcast %cst_289 : f32 to vector<16x1xf32>
    %832 = arith.divf %830, %831 : vector<16x1xf32>
    %833 = vector.broadcast %825 : vector<16x1xf32> to vector<16x32xf32>
    %834 = arith.subf %817, %833 : vector<16x32xf32>
    %cst_290 = arith.constant 9.99999974E-6 : f32
    %835 = vector.broadcast %cst_290 : f32 to vector<16x1xf32>
    %836 = arith.addf %832, %835 : vector<16x1xf32>
    %837 = math.rsqrt %836 : vector<16x1xf32>
    %838 = vector.broadcast %837 : vector<16x1xf32> to vector<16x32xf32>
    %839 = arith.mulf %834, %838 : vector<16x32xf32>
    %840 = vector.broadcast %819 : vector<1x32xf32> to vector<16x32xf32>
    %841 = arith.mulf %839, %840 : vector<16x32xf32>
    %842 = vector.broadcast %821 : vector<1x32xf32> to vector<16x32xf32>
    %843 = arith.addf %841, %842 : vector<16x32xf32>
    %c0_291 = arith.constant 0 : index
    %c0_292 = arith.constant 0 : index
    %844 = vector.load %arg21[%c0_291, %c0_292] : memref<1x32xf32, #tpu.memory_space<vmem>>, vector<1x32xf32>
    %c0_293 = arith.constant 0 : index
    %c0_294 = arith.constant 0 : index
    %845 = vector.load %arg22[%c0_293, %c0_294] : memref<1x32xf32, #tpu.memory_space<vmem>>, vector<1x32xf32>
    %cst_295 = arith.constant dense<0.000000e+00> : vector<16xf32>
    %846 = vector.multi_reduction <add>, %843, %cst_295 [1] : vector<16x32xf32> to vector<16xf32>
    %847 = vector.shape_cast %846 : vector<16xf32> to vector<16x1xf32>
    %cst_296 = arith.constant 3.200000e+01 : f32
    %848 = vector.broadcast %cst_296 : f32 to vector<16x1xf32>
    %849 = arith.divf %847, %848 : vector<16x1xf32>
    %850 = vector.broadcast %849 : vector<16x1xf32> to vector<16x32xf32>
    %851 = arith.subf %843, %850 : vector<16x32xf32>
    %852 = arith.mulf %851, %851 : vector<16x32xf32>
    %cst_297 = arith.constant dense<0.000000e+00> : vector<16xf32>
    %853 = vector.multi_reduction <add>, %852, %cst_297 [1] : vector<16x32xf32> to vector<16xf32>
    %854 = vector.shape_cast %853 : vector<16xf32> to vector<16x1xf32>
    %cst_298 = arith.constant 3.200000e+01 : f32
    %855 = vector.broadcast %cst_298 : f32 to vector<16x1xf32>
    %856 = arith.divf %854, %855 : vector<16x1xf32>
    %857 = vector.broadcast %849 : vector<16x1xf32> to vector<16x32xf32>
    %858 = arith.subf %843, %857 : vector<16x32xf32>
    %cst_299 = arith.constant 9.99999974E-6 : f32
    %859 = vector.broadcast %cst_299 : f32 to vector<16x1xf32>
    %860 = arith.addf %856, %859 : vector<16x1xf32>
    %861 = math.rsqrt %860 : vector<16x1xf32>
    %862 = vector.broadcast %861 : vector<16x1xf32> to vector<16x32xf32>
    %863 = arith.mulf %858, %862 : vector<16x32xf32>
    %864 = vector.broadcast %844 : vector<1x32xf32> to vector<16x32xf32>
    %865 = arith.mulf %863, %864 : vector<16x32xf32>
    %866 = vector.broadcast %845 : vector<1x32xf32> to vector<16x32xf32>
    %867 = arith.addf %865, %866 : vector<16x32xf32>
    %c0_300 = arith.constant 0 : index
    %c0_301 = arith.constant 0 : index
    %868 = vector.load %arg23[%c0_300, %c0_301] : memref<16x32xf32, #tpu.memory_space<vmem>>, vector<16x32xf32>
    tpu.vector_store %arg23[%c0_300, %c0_301], %867 {strides = array<i32>} : memref<16x32xf32, #tpu.memory_space<vmem>>, vector<16x32xf32>,
    return
  }
}

</mosaic_0001>

<bundles_post_ra>
// kernel: tpu_custom_call.1
= control target key start
LH: loop header
LB: loop body
LE: loop exit
PB: predicated region body
PF: predicated region fallthrough
CT: control target
= control target key end

     0   :  { %s10234_s0 = inlined_call_operand.hbm [shape: f32[16,32], index: 0, kind: input, shape index: {}]   ;;  %s10235_s1 = inlined_call_operand.vmem [shape: f32[2,12,32], index: 1, kind: input, shape index: {}]   ;;  %s10236_s2 = inlined_call_operand.hbm [shape: f32[8,8], index: 2, kind: input, shape index: {}]   ;;  %s10237_s3 = inlined_call_operand.vmem [shape: f32[2,32,96], index: 3, kind: input, shape index: {}]   ;;  %s10238_s4 = inlined_call_operand.vmem [shape: f32[2,1,96], index: 4, kind: input, shape index: {}]   ;;  %s10239_s5 = inlined_call_operand.vmem [shape: f32[2,32,32], index: 5, kind: input, shape index: {}]   ;;  %s10240_s6 = inlined_call_operand.hbm [shape: f32[2,1,32], index: 6, kind: input, shape index: {}]   ;;  %s10241_s7 = inlined_call_operand.vmem [shape: f32[2,32,96], index: 7, kind: input, shape index: {}]   ;;  %s10242_s8 = inlined_call_operand.vmem [shape: f32[2,1,96], index: 8, kind: input, shape index: {}]   ;;  %s10243_s9 = inlined_call_operand.vmem [shape: f32[2,32,32], index: 9, kind: input, shape index: {}]   ;;  %s10244_s10 = inlined_call_operand.vmem [shape: f32[2,1,32], index: 10, kind: input, shape index: {}]   ;;  %s10245_s11 = inlined_call_operand.hbm [shape: f32[2,32,64], index: 11, kind: input, shape index: {}]   ;;  %s10246_s12 = inlined_call_operand.vmem [shape: f32[2,1,64], index: 12, kind: input, shape index: {}]   ;;  %s10247_s13 = inlined_call_operand.vmem [shape: f32[2,64,32], index: 13, kind: input, shape index: {}]   ;;  %s10248_s14 = inlined_call_operand.vmem [shape: f32[2,1,32], index: 14, kind: input, shape index: {}]   ;;  %s10249_s15 = inlined_call_operand.vmem [shape: f32[2,1,32], index: 15, kind: input, shape index: {}]   ;;  %s10250_s16 = inlined_call_operand.vmem [shape: f32[2,1,32], index: 16, kind: input, shape index: {}]   ;;  %s10251_s17 = inlined_call_operand.vmem [shape: f32[2,1,32], index: 17, kind: input, shape index: {}]   ;;  %s10252_s18 = inlined_call_operand.vmem [shape: f32[2,1,32], index: 18, kind: input, shape index: {}]   ;;  %s10253_s19 = inlined_call_operand.vmem [shape: f32[2,1,32], index: 19, kind: input, shape index: {}]   ;;  %s10254_s20 = inlined_call_operand.vmem [shape: f32[2,1,32], index: 20, kind: input, shape index: {}]   ;;  %s10255_s21 = inlined_call_operand.vmem [shape: f32[1,32], index: 21, kind: input, shape index: {}]   ;;  %s10256_s22 = inlined_call_operand.vmem [shape: f32[1,32], index: 22, kind: input, shape index: {}]   ;;  %s10257_s23 = inlined_call_operand.hbm [shape: f32[16,32], index: 23, kind: output, shape index: {}]  }
   0x1   :  { %10294 = sst [smem:[#allocation15_spill]] %s10234_s0 }
   0x2   :  { %10295 = sst [smem:[#allocation16_spill]] %s10235_s1 }
   0x3   :  { %10296 = sst [smem:[#allocation17_spill]] %s10236_s2 }
   0x4   :  { %10297 = sst [smem:[#allocation18_spill]] %s10237_s3 }
   0x5   :  { %10298 = sst [smem:[#allocation19_spill]] %s10238_s4 }
   0x6   :  { %10299 = sst [smem:[#allocation20_spill]] %s10239_s5 }
   0x7   :  { %10300 = sst [smem:[#allocation21_spill]] %s10240_s6 }
   0x8   :  { %10301 = sst [smem:[#allocation22_spill]] %s10241_s7 }
   0x9   :  { %10302 = sst [smem:[#allocation23_spill]] %s10249_s15 }
   0xa   :  { %10303 = sst [smem:[#allocation24_spill]] %s10250_s16 }
   0xb   :  { %10304 = sst [smem:[#allocation25_spill]] %s10255_s21 }
   0xc   :  { %10305 = sst [smem:[#allocation26_spill]] %s10256_s22 }
   0xd   :  { %10306 = sst [smem:[#allocation27_spill]] %s10257_s23 }
   0xe   :  { %28 = vsyncpa [#allocation3], 0 }
   0xf   :  { %29 = vsyncpa [#allocation6], 0 }
  0x10   :  { %30 = vsyncpa [#allocation9], 0 }
  0x11   :  { %31 = vsyncpa [#allocation4], 0  ;;  %s8836_s4 = smov [#allocation5]   ;;  %s8837_s24 = smov [#allocation2]  }
  0x12   :  { %s52_s30 = sshll.u32 %s8836_s4, 4  ;;  %s37_s25 = sshll.u32 %s8837_s24, 4  ;;  %s53_s30 = int_to_ptr.vmem [resolvable:$true] %s52_s30  ;;  %s38_s25 = int_to_ptr.vmem [resolvable:$true] %s37_s25 }
  0x13   :  { %s8736_s5 = scalar_lea.vmem %s53_s30, 128  ;;  %p8741_p1 = scmp.lt.s32.totalorder %s53_s30, %s53_s30 }
  0x14   :  { %p8737_p0 = scmp.ne.s32.totalorder %s53_s30, %s8736_s5  ;;  %p8742_p2 = scmp.lt.s32.totalorder %s8736_s5, %s8736_s5 }
  0x16   :  { %p8743_p3 = por %p8742_p2, %p8741_p1 }
  0x18   :  { %p8744_p4 = pnand %p8743_p3, %p8737_p0 }
  0x1a   :  { %8747 = shalt.err (!%p8744_p4)
}
  0x1b   :  { %s10307_s2 = sld [smem:[#allocation17_spill]]  ;;  %s8756_s6 = scalar_lea.vmem %s38_s25, 256 }
  0x1c   :  { %p8757_p5 = scmp.ne.s32.totalorder %s38_s25, %s8756_s6  ;;  %p8761_p6 = scmp.lt.s32.totalorder %s38_s25, %s38_s25 }
  0x1d   :  { %p8762_p7 = scmp.lt.s32.totalorder %s8756_s6, %s8756_s6 }
  0x1f   :  { %p8763_p8 = por %p8762_p7, %p8761_p6 }
  0x21   :  { %55 = dma.hbm_to_vmem [thread:$0]  %s10307_s2, 128, %s53_s30, [#allocation6]  }
  0x22   :  { %p8764_p9 = pnand %p8763_p8, %p8757_p5 }
  0x24   :  { %8767 = shalt.err (!%p8764_p9)
}
  0x25   :  { %s10263_s27 = smov 128   ;;  %s10286_s7 = smov 8  }
  0x26   :  { %s10308_s3 = sld [smem:[#allocation15_spill]]  ;;  %s8840_s0 = smov [#allocation7]  }
  0x27   :  { %s67_s4 = sshll.u32 %s8840_s0, 4  ;;  %s68_s4 = int_to_ptr.vmem [resolvable:$true] %s67_s4 }
  0x28   :  { %s8776_s30 = scalar_lea.vmem %s68_s4, 32  ;;  %p8781_p11 = scmp.lt.s32.totalorder %s68_s4, %s68_s4 }
  0x29   :  { %p8777_p10 = scmp.ne.s32.totalorder %s68_s4, %s8776_s30  ;;  %p8782_p12 = scmp.lt.s32.totalorder %s8776_s30, %s8776_s30 }
  0x2b   :  { %p8783_p13 = por %p8782_p12, %p8781_p11 }
  0x2c   :  { %43 = dma.hbm_to_vmem [thread:$0]  %s10308_s3, 256, %s38_s25, [#allocation3], %s10263_s27, %s10263_s27, %s10286_s7  }
  0x2d   :  { %p8784_p0 = pnand %p8783_p13, %p8777_p10 }
  0x2f   :  { %8787 = shalt.err (!%p8784_p0)
}
  0x30   :  { %s10284_s24 = smov 16   ;;  %s8842_s5 = smov 1  }
  0x31   :  { %s10309_s2 = sld [smem:[#allocation21_spill]]  ;;  %s8843_s6 = smov [#allocation8]  }
  0x32   :  { %s87_s25 = sshll.u32 %s8843_s6, 4  ;;  %s88_s25 = int_to_ptr.vmem [resolvable:$true] %s87_s25 }
  0x33   :  { %s8796_s28 = scalar_lea.vmem %s88_s25, 1024  ;;  %p8801_p2 = scmp.lt.s32.totalorder %s88_s25, %s88_s25 }
  0x34   :  { %p8797_p1 = scmp.ne.s32.totalorder %s88_s25, %s8796_s28  ;;  %p8802_p3 = scmp.lt.s32.totalorder %s8796_s28, %s8796_s28 }
  0x36   :  { %p8803_p4 = por %p8802_p3, %p8801_p2 }
  0x37   :  { %73 = dma.hbm_to_vmem [thread:$0]  %s10309_s2, 32, %s68_s4, [#allocation6], %s10284_s24, %s10284_s24, %s8842_s5  }
  0x38   :  { %p8804_p5 = pnand %p8803_p4, %p8797_p1 }
  0x3a   :  { %8807 = shalt.err (!%p8804_p5)
}
  0x3b   :  { %93 = dma.hbm_to_vmem [thread:$0]  %s10245_s11, 1024, %s88_s25, [#allocation9], %s10263_s27, %s10263_s27, %s10286_s7  }
  0x3c   :  { %8828 = dma.done.wait [#allocation3], 256  }
  0x3d   :  { %8829 = vsyncadd [#allocation3], 4294967040 }
  0x3e   :  { %8830 = dma.done.wait [#allocation6], 160  }
  0x3f   :  { %8831 = vsyncadd [#allocation6], 4294967136 }
  0x40   :  { %8832 = dma.done.wait [#allocation9], 1024  }
  0x41   :  { %8833 = vsyncadd [#allocation9], 4294966272  ;;  %vm147_vm0 = vcmask 261120   ;;  %s10310_s30 = sld [smem:[#allocation18_spill]]  ;;  %v9005_v2 = vld [vmem:[#allocation2] sm:$0xff]  ;;  %v9015_v5 = vld [vmem:[#allocation2 + $0x8] sm:$0xff] }
  0x42   :  { %7976 = vmatprep.mubr.msk.f32.mxu1 %vm147_vm0, %v9005_v2  ;;  %v8844_v6 = vmov 0.0   ;;  %vm8845_vm1 = vmmov 0   ;;  %s10311_s29 = sld [smem:[#allocation19_spill]]  ;;  %s10288_s3 = smov 120   ;;  %vm232_vm2 = vcmask 64512   ;;  %v130_v27 = vld [vmem:[#allocation5] sm:$0xff] }
  0x43   :  { %7989 = vmatprep.subr.mxu0 %v8844_v6  ;;  %7991 = vmatprep.mubr.msk.f32.mxu0 %vm8845_vm1, %v8844_v6  ;;  %s10290_s0 = smov 96   ;;  %s10276_s4 = smov 80   ;;  %vm902_vm3 = vcmask 130048   ;;  %vm904_vm4 = vcmask 195584   ;;  %vm1990_vm5 = vcmask 97280   ;;  %vm2010_vm6 = vcmask 1043456  }
  0x44   :  { %s10280_s5 = smov 88   ;;  %s10272_s1 = smov 72   ;;  %vm3649_vm7 = vcmask 523264  }
  0x45   :  { %s10278_s11 = smov 112   ;;  %s10274_s26 = smov 104  }
  0x46   :  { %s10266_s2 = smov 56   ;;  %s10270_s6 = smov 64  }
  0x47   :  { %v139_v0 = vld [vmem:[%s10310_s30 + $0x18] sm:$0xff]  ;;  %v138_v1 = vld [vmem:[%s10310_s30 + $0x10] sm:$0xff]  ;;  %v137_v3 = vld [vmem:[%s10310_s30 + $0x8] sm:$0xff]  ;;  %s10264_s25 = smov 40   ;;  %s10268_s28 = smov 48  }
  0x48   :  { %7968 = vmatprep.subr.mxu1 %v139_v0  ;;  %v136_v4 = vld [vmem:[%s10310_s30] sm:$0xff]  ;;  %s10282_s27 = smov 24   ;;  %s10327_s21 = smov 56  }
  0x49   :  { %7969 = vmatpush3.msra.mxu1 %v139_v0  ;;  %v7483_v8 = vld [vmem:[%s10311_s29] ss:$0 sm:$0xff]  ;;  %s10328_s22 = smov 40  }
  0x4a   :  { %7970 = vmatprep.subr.mxu1 %v138_v1 }
  0x4b   :  { %7971 = vmatpush3.msra.mxu1 %v138_v1 }
  0x4c   :  { %7972 = vmatprep.subr.mxu1 %v137_v3 }
  0x4d   :  { %7973 = vmatpush3.msra.mxu1 %v137_v3 }
  0x4e   :  { %7974 = vmatprep.subr.mxu1 %v136_v4 }
  0x4f   :  { %7975 = vmatpush3.msra.mxu1 %v136_v4 }
  0x50   :  { %7977 = vmatmul.mubr.msk.f32.vlgmr.msra.gmra.mxu1 %vm147_vm0, %v9015_v5  ;;  %7979 = vmatprep.subr.mxu1 %v8844_v6 }
  0x51   :  { %7981 = vmatprep.mubr.msk.f32.mxu1 %vm8845_vm1, %v8844_v6 }
 0x110   :  { %v7978_v7 = vpop.f32.mrf.mxu1 }
 0x111   :  { %v9042_v11 = vadd.f32 %v7978_v7, %v7483_v8 }
 0x112   :  { %v220_v9 = vpop.f32.mrf.mxu1 }
 0x113   :  { %v9028_v10 = vadd.f32 %v7483_v8, %v220_v9 }
 0x115   :  { %394 = vrot.lane.b32.xlu1 %v9028_v10, %s10288_s3  ;;  %230 = vrot.lane.b32.xlu0 %v9028_v10, %s10290_s0 }
 0x119   :  { %561 = vrot.lane.b32.xlu1 %v9028_v10, %s10276_s4  ;;  %396 = vrot.lane.b32.xlu0 %v9028_v10, %s10280_s5 }
 0x11d   :  { %726 = vrot.lane.b32.xlu1 %v9028_v10, %s10272_s1  ;;  %559 = vrot.lane.b32.xlu0 %v9028_v10, %s10278_s11 }
 0x121   :  { %907 = vrot.lane.b32.xlu1 %v9042_v11, %s10290_s0  ;;  %724 = vrot.lane.b32.xlu0 %v9028_v10, %s10274_s26 }
 0x125   :  { %1070 = vrot.lane.b32.xlu1 %v9042_v11, %s10288_s3  ;;  %1072 = vrot.lane.b32.xlu0 %v9042_v11, %s10280_s5  ;;  %s10317_s5 = smov 80  }
 0x129   :  { %1235 = vrot.lane.b32.xlu1 %v9042_v11, %s10278_s11  ;;  %1237 = vrot.lane.b32.xlu0 %v9042_v11, %s10276_s4  ;;  %s10316_s4 = smov 112   ;;  %s10318_s11 = smov 104  }
 0x12d   :  { %1400 = vrot.lane.b32.xlu1 %v9042_v11, %s10274_s26  ;;  %1402 = vrot.lane.b32.xlu0 %v9042_v11, %s10272_s1  ;;  %s10313_s1 = sld [smem:[#allocation22_spill]] }
 0x12e   :  { %s10314_s26 = sld [smem:[#allocation16_spill]] }
 0x131   :  { %483 = vrot.lane.b32.xlu1 %v9028_v10, %s10266_s2  ;;  %318 = vrot.lane.b32.xlu0 %v9028_v10, %s10270_s6 }
 0x187   :  { %v395_v12 = vpop.permute.xlu1 %394  ;;  %v231_v13 = vpop.permute.xlu0 %230 }
 0x188   :  { %7980 = vmatpush3.xpose.msk.msra.mxu1 %vm232_vm2, %v231_v13 }
 0x189   :  { %7984 = vmatprep.subr.mxu1 %v8844_v6 }
 0x18b   :  { %v562_v14 = vpop.permute.xlu1 %561  ;;  %7982 = vmatmul.mubr.msk.f32.vlgmr.msra.gmra.mxu1 %vm232_vm2, %v9028_v10  ;;  %v397_v15 = vpop.permute.xlu0 %396 }
 0x18c   :  { %7990 = vmatpush3.xpose.msk.msra.mxu0 %vm232_vm2, %v397_v15  ;;  %7986 = vmatprep.mubr.msk.f32.mxu1 %vm8845_vm1, %v8844_v6 }
 0x18d   :  { %7999 = vmatprep.subr.mxu0 %v8844_v6 }
 0x18f   :  { %v727_v16 = vpop.permute.xlu1 %726  ;;  %7992 = vmatmul.mubr.msk.f32.vlgmr.msra.gmra.mxu0 %vm232_vm2, %v395_v12  ;;  %v560_v17 = vpop.permute.xlu0 %559 }
 0x190   :  { %8000 = vmatpush3.xpose.msk.msra.mxu0 %vm232_vm2, %v562_v14  ;;  %8001 = vmatprep.mubr.msk.f32.mxu0 %vm8845_vm1, %v8844_v6 }
 0x191   :  { %8009 = vmatprep.subr.mxu0 %v8844_v6 }
 0x193   :  { %8002 = vmatmul.mubr.msk.f32.vlgmr.msra.gmra.mxu0 %vm232_vm2, %v560_v17  ;;  %v725_v18 = vpop.permute.xlu0 %724  ;;  %v908_v19 = vpop.permute.xlu1 %907 }
 0x194   :  { %8010 = vmatpush3.xpose.msk.msra.mxu0 %vm232_vm2, %v727_v16  ;;  %8011 = vmatprep.mubr.msk.f32.mxu0 %vm8845_vm1, %v8844_v6 }
 0x195   :  { %8019 = vmatprep.subr.mxu0 %v8844_v6 }
 0x197   :  { %8012 = vmatmul.mubr.msk.f32.vlgmr.msra.gmra.mxu0 %vm232_vm2, %v725_v18  ;;  %v1073_v20 = vpop.permute.xlu0 %1072  ;;  %v1071_v21 = vpop.permute.xlu1 %1070 }
 0x198   :  { %8020 = vmatpush3.xpose.msk.msra.mxu0 %vm232_vm2, %v908_v19  ;;  %8021 = vmatprep.mubr.msk.f32.mxu0 %vm8845_vm1, %v8844_v6 }
 0x199   :  { %8029 = vmatprep.subr.mxu0 %v8844_v6 }
 0x19b   :  { %8022 = vmatmul.mubr.msk.f32.vlgmr.msra.gmra.mxu0 %vm232_vm2, %v9042_v11  ;;  %v1238_v22 = vpop.permute.xlu0 %1237  ;;  %v1236_v24 = vpop.permute.xlu1 %1235 }
 0x19c   :  { %8030 = vmatpush3.xpose.msk.msra.mxu0 %vm232_vm2, %v1073_v20  ;;  %8031 = vmatprep.mubr.msk.f32.mxu0 %vm8845_vm1, %v8844_v6 }
 0x19d   :  { %8039 = vmatprep.subr.mxu0 %v8844_v6 }
 0x19f   :  { %8032 = vmatmul.mubr.msk.f32.vlgmr.msra.gmra.mxu0 %vm232_vm2, %v1071_v21  ;;  %v1403_v23 = vpop.permute.xlu0 %1402  ;;  %v1401_v26 = vpop.permute.xlu1 %1400 }
 0x1a0   :  { %8040 = vmatpush3.xpose.msk.msra.mxu0 %vm232_vm2, %v1238_v22  ;;  %8041 = vmatprep.mubr.msk.f32.mxu0 %vm8845_vm1, %v8844_v6 }
 0x1a1   :  { %8049 = vmatprep.subr.mxu0 %v8844_v6 }
 0x1a3   :  { %8042 = vmatmul.mubr.msk.f32.vlgmr.msra.gmra.mxu0 %vm232_vm2, %v1236_v24  ;;  %v319_v25 = vpop.permute.xlu0 %318  ;;  %v9116_v60 = vpop.permute.xlu1 %483 }
 0x1a4   :  { %7985 = vmatpush3.msra.mxu1 %v319_v25  ;;  %8050 = vmatpush3.xpose.msk.msra.mxu0 %vm232_vm2, %v1403_v23 }
 0x1a5   :  { %8051 = vmatprep.mubr.msk.f32.mxu0 %vm8845_vm1, %v8844_v6  ;;  %7994 = vmatprep.subr.mxu1 %v8844_v6 }
 0x1a7   :  { %8052 = vmatmul.mubr.msk.f32.vlgmr.msra.gmra.mxu0 %vm232_vm2, %v1401_v26 }
 0x24b   :  { %v303_v28 = vpop.f32.mrf.mxu1 }
 0x24c   :  { %v304_v29 = vadd.f32 %v303_v28, %v130_v27 }
 0x24d   :  { %v7983_v30 = vpop.f32.mrf.mxu1 }
 0x24e   :  { %v307_v31 = vsel %vm232_vm2, %v304_v29, -inf }
 0x24f   :  { %308 = vmax.xlane.f32.xlu0 %v307_v31  ;;  %v468_v32 = vpop.f32.mrf.mxu0 }
 0x250   :  { %v469_v33 = vadd.f32 %v468_v32, %v130_v27 }
 0x251   :  { %v7993_v34 = vpop.f32.mrf.mxu0 }
 0x252   :  { %v472_v35 = vsel %vm232_vm2, %v469_v33, -inf }
 0x253   :  { %473 = vmax.xlane.f32.xlu1 %v472_v35  ;;  %v633_v36 = vpop.f32.mrf.mxu0 }
 0x254   :  { %v634_v37 = vadd.f32 %v633_v36, %v130_v27 }
 0x255   :  { %v8003_v38 = vpop.f32.mrf.mxu0 }
 0x256   :  { %v637_v39 = vsel %vm232_vm2, %v634_v37, -inf }
 0x257   :  { %638 = vmax.xlane.f32.xlu0 %v637_v39  ;;  %v798_v40 = vpop.f32.mrf.mxu0 }
 0x258   :  { %v799_v41 = vadd.f32 %v798_v40, %v130_v27 }
 0x259   :  { %v8013_v42 = vpop.f32.mrf.mxu0 }
 0x25a   :  { %v802_v43 = vsel %vm232_vm2, %v799_v41, -inf }
 0x25b   :  { %803 = vmax.xlane.f32.xlu0 %v802_v43  ;;  %v979_v44 = vpop.f32.mrf.mxu0 }
 0x25c   :  { %v980_v45 = vadd.f32 %v979_v44, %v130_v27 }
 0x25d   :  { %v8023_v46 = vpop.f32.mrf.mxu0 }
 0x25e   :  { %v983_v47 = vsel %vm232_vm2, %v980_v45, -inf }
 0x25f   :  { %984 = vmax.xlane.f32.xlu1 %v983_v47  ;;  %v1144_v48 = vpop.f32.mrf.mxu0 }
 0x260   :  { %v1145_v49 = vadd.f32 %v1144_v48, %v130_v27 }
 0x261   :  { %v8033_v50 = vpop.f32.mrf.mxu0 }
 0x262   :  { %v1148_v51 = vsel %vm232_vm2, %v1145_v49, -inf }
 0x263   :  { %1149 = vmax.xlane.f32.xlu0 %v1148_v51  ;;  %v1309_v52 = vpop.f32.mrf.mxu0 }
 0x264   :  { %v1310_v53 = vadd.f32 %v1309_v52, %v130_v27 }
 0x265   :  { %v8043_v54 = vpop.f32.mrf.mxu0 }
 0x266   :  { %v1313_v55 = vsel %vm232_vm2, %v1310_v53, -inf }
 0x267   :  { %1314 = vmax.xlane.f32.xlu1 %v1313_v55  ;;  %v1474_v56 = vpop.f32.mrf.mxu0 }
 0x268   :  { %v1475_v57 = vadd.f32 %v1474_v56, %v130_v27 }
 0x269   :  { %v8053_v58 = vpop.f32.mrf.mxu0 }
 0x26a   :  { %v1478_v59 = vsel %vm232_vm2, %v1475_v57, -inf }
 0x26b   :  { %1479 = vmax.xlane.f32.xlu0 %v1478_v59 }
 0x278   :  { %813 = vrot.lane.b32.xlu1 %v9028_v10, %s10264_s25 }
 0x281   :  { %648 = vrot.lane.b32.xlu0 %v9028_v10, %s10268_s28 }
 0x2d8   :  { %v309_v61 = vpop.xlane.xlu0 %308 }
 0x2d9   :  { %v310_v62 = vsub.f32 %v304_v29, %v309_v61 }
 0x2db   :  { %v311_v63 = vmul.f32 1.442695, %v310_v62 }
 0x2dc   :  { %v474_v0 = vpop.xlane.xlu1 %473 }
 0x2dd   :  { %8567 = vpow2.f32 %v311_v63  ;;  %v475_v1 = vsub.f32 %v469_v33, %v474_v0 }
 0x2df   :  { %v476_v3 = vmul.f32 1.442695, %v475_v1 }
 0x2e0   :  { %v639_v4 = vpop.xlane.xlu0 %638 }
 0x2e1   :  { %8569 = vpow2.f32 %v476_v3  ;;  %v640_v7 = vsub.f32 %v634_v37, %v639_v4 }
 0x2e3   :  { %v641_v8 = vmul.f32 1.442695, %v640_v7 }
 0x2e4   :  { %v804_v9 = vpop.xlane.xlu0 %803 }
 0x2e5   :  { %8571 = vpow2.f32 %v641_v8  ;;  %v805_v12 = vsub.f32 %v799_v41, %v804_v9 }
 0x2e7   :  { %v806_v13 = vmul.f32 1.442695, %v805_v12 }
 0x2e8   :  { %v985_v21 = vpop.xlane.xlu1 %984 }
 0x2e9   :  { %8573 = vpow2.f32 %v806_v13  ;;  %v986_v22 = vsub.f32 %v980_v45, %v985_v21 }
 0x2ea   :  { %v8568_v14 = vpop.eup %8567 }
 0x2eb   :  { %v313_v10 = vsel %vm232_vm2, %v8568_v14, 0.0  ;;  %v987_v26 = vmul.f32 1.442695, %v986_v22 }
 0x2ec   :  { %314 = vadd.xlane.f32.xlu1 %v313_v10  ;;  %v1150_v23 = vpop.xlane.xlu0 %1149 }
 0x2ed   :  { %v1151_v25 = vsub.f32 %v1145_v49, %v1150_v23  ;;  %8575 = vpow2.f32 %v987_v26 }
 0x2ee   :  { %v8570_v15 = vpop.eup %8569 }
 0x2ef   :  { %v478_v16 = vsel %vm232_vm2, %v8570_v15, 0.0  ;;  %v1152_v29 = vmul.f32 1.442695, %v1151_v25 }
 0x2f0   :  { %479 = vadd.xlane.f32.xlu0 %v478_v16  ;;  %v1315_v24 = vpop.xlane.xlu1 %1314 }
 0x2f1   :  { %v1316_v27 = vsub.f32 %v1310_v53, %v1315_v24  ;;  %8577 = vpow2.f32 %v1152_v29 }
 0x2f2   :  { %v8572_v17 = vpop.eup %8571 }
 0x2f3   :  { %v643_v18 = vsel %vm232_vm2, %v8572_v17, 0.0  ;;  %v1317_v30 = vmul.f32 1.442695, %v1316_v27 }
 0x2f4   :  { %644 = vadd.xlane.f32.xlu1 %v643_v18  ;;  %v1480_v28 = vpop.xlane.xlu0 %1479  ;;  %v814_v41 = vpop.permute.xlu1 %813 }
 0x2f5   :  { %v1481_v31 = vsub.f32 %v1475_v57, %v1480_v28  ;;  %8579 = vpow2.f32 %v1317_v30 }
 0x2f6   :  { %v9121_v19 = vpop.eup %8573 }
 0x2f7   :  { %v808_v20 = vsel %vm232_vm2, %v9121_v19, 0.0  ;;  %v1482_v32 = vmul.f32 1.442695, %v1481_v31 }
 0x2f8   :  { %809 = vadd.xlane.f32.xlu0 %v808_v20  ;;  %v649_v42 = vpop.permute.xlu0 %648 }
 0x2f9   :  { %8581 = vpow2.f32 %v1482_v32 }
 0x2fa   :  { %v8576_v33 = vpop.eup %8575 }
 0x2fb   :  { %v989_v35 = vsel %vm232_vm2, %v8576_v33, 0.0 }
 0x2fe   :  { %v9129_v34 = vpop.eup %8577 }
 0x2ff   :  { %v1154_v38 = vsel %vm232_vm2, %v9129_v34, 0.0 }
 0x302   :  { %v9132_v36 = vpop.eup %8579 }
 0x303   :  { %v1319_v37 = vsel %vm232_vm2, %v9132_v36, 0.0 }
 0x305   :  { %1159 = vrot.lane.b32.xlu1 %v9042_v11, %s10266_s2  ;;  %s10319_s2 = smov 72  }
 0x306   :  { %v9138_v39 = vpop.eup %8581 }
 0x307   :  { %v1484_v40 = vsel %vm232_vm2, %v9138_v39, 0.0 }
 0x30e   :  { %994 = vrot.lane.b32.xlu0 %v9042_v11, %s10270_s6  ;;  %s10323_s6 = smov 96  }
 0x329   :  { %990 = vadd.xlane.f32.xlu1 %v989_v35 }
 0x32d   :  { %1320 = vadd.xlane.f32.xlu1 %v1319_v37  ;;  %1155 = vadd.xlane.f32.xlu0 %v1154_v38 }
 0x331   :  { %1485 = vadd.xlane.f32.xlu1 %v1484_v40 }
 0x342   :  { %1489 = vrot.lane.b32.xlu1 %v9042_v11, %s10264_s25  ;;  %s10315_s25 = smov 88  }
 0x343   :  { %1324 = vrot.lane.b32.xlu0 %v9042_v11, %s10268_s28  ;;  %s10312_s28 = sld [smem:[#allocation20_spill]] }
 0x349   :  { %v1583_v18 = vld [vmem:[%s10312_s28 + $0x18] sm:$0xff]  ;;  %v1581_v20 = vld [vmem:[%s10312_s28 + $0x8] sm:$0xff]  ;;  %v1580_v21 = vld [vmem:[%s10312_s28] sm:$0xff] }
 0x34a   :  { %8059 = vmatprep.subr.mxu0 %v1583_v18 }
 0x34b   :  { %8060 = vmatpush3.msra.mxu0 %v1583_v18 }
 0x375   :  { %v315_v43 = vpop.xlane.xlu1 %314 }
 0x376   :  { %8583 = vrcp.f32 %v315_v43 }
 0x379   :  { %v480_v44 = vpop.xlane.xlu0 %479 }
 0x37a   :  { %8585 = vrcp.f32 %v480_v44 }
 0x37d   :  { %v645_v45 = vpop.xlane.xlu1 %644 }
 0x37e   :  { %8587 = vrcp.f32 %v645_v45 }
 0x381   :  { %v810_v46 = vpop.xlane.xlu0 %809  ;;  %v1160_v55 = vpop.permute.xlu1 %1159 }
 0x382   :  { %8589 = vrcp.f32 %v810_v46 }
 0x383   :  { %v8584_v47 = vpop.eup %8583 }
 0x384   :  { %v317_v48 = vmul.f32 %v8584_v47, %v8568_v14 }
 0x385   :  { %v995_v54 = vpop.permute.xlu0 %994 }
 0x386   :  { %7987 = vmatmul.mubr.msk.f32.vlgmr.msra.gmra.mxu1 %vm232_vm2, %v317_v48 }
 0x387   :  { %v8586_v49 = vpop.eup %8585  ;;  %7995 = vmatpush3.msra.mxu1 %v9116_v60  ;;  %7996 = vmatprep.mubr.msk.f32.mxu1 %vm8845_vm1, %v8844_v6 }
 0x388   :  { %8004 = vmatprep.subr.mxu1 %v8844_v6  ;;  %v482_v11 = vmul.f32 %v8586_v49, %v8570_v15 }
 0x38a   :  { %7997 = vmatmul.mubr.msk.f32.vlgmr.msra.gmra.mxu1 %vm232_vm2, %v482_v11 }
 0x38b   :  { %v8588_v50 = vpop.eup %8587  ;;  %8005 = vmatpush3.msra.mxu1 %v649_v42  ;;  %8006 = vmatprep.mubr.msk.f32.mxu1 %vm8845_vm1, %v8844_v6  ;;  %v7510_v42 = vld [vmem:[#allocation7] ss:$0 sm:$0xff] }
 0x38c   :  { %8014 = vmatprep.subr.mxu1 %v8844_v6  ;;  %v647_v51 = vmul.f32 %v8588_v50, %v8572_v17  ;;  %v1722_v50 = vld [vmem:[%s10313_s1 + $0x18] sm:$0xff] }
 0x38e   :  { %8007 = vmatmul.mubr.msk.f32.vlgmr.msra.gmra.mxu1 %vm232_vm2, %v647_v51  ;;  %v1720_v51 = vld [vmem:[%s10313_s1 + $0x8] sm:$0xff] }
 0x38f   :  { %v8590_v52 = vpop.eup %8589  ;;  %8015 = vmatpush3.msra.mxu1 %v814_v41  ;;  %8016 = vmatprep.mubr.msk.f32.mxu1 %vm8845_vm1, %v8844_v6 }
 0x390   :  { %8024 = vmatprep.subr.mxu1 %v8844_v6  ;;  %v812_v53 = vmul.f32 %v8590_v52, %v9121_v19  ;;  %v1582_v19 = vld [vmem:[%s10312_s28 + $0x10] sm:$0xff] }
 0x391   :  { %8061 = vmatprep.subr.mxu0 %v1582_v19 }
 0x392   :  { %8017 = vmatmul.mubr.msk.f32.vlgmr.msra.gmra.mxu1 %vm232_vm2, %v812_v53  ;;  %8062 = vmatpush3.msra.mxu0 %v1582_v19 }
 0x393   :  { %8025 = vmatpush3.msra.mxu1 %v995_v54  ;;  %8026 = vmatprep.mubr.msk.f32.mxu1 %vm8845_vm1, %v8844_v6 }
 0x394   :  { %8034 = vmatprep.subr.mxu1 %v8844_v6  ;;  %8063 = vmatprep.subr.mxu0 %v1581_v20 }
 0x395   :  { %8064 = vmatpush3.msra.mxu0 %v1581_v20 }
 0x396   :  { %8065 = vmatprep.subr.mxu0 %v1580_v21 }
 0x397   :  { %8066 = vmatpush3.msra.mxu0 %v1580_v21  ;;  %v7514_v21 = vld [vmem:[%s10250_s16] ss:$0 sm:$0xff]  ;;  %s10326_s16 = smov 48  }
 0x3b2   :  { %v991_v56 = vpop.xlane.xlu1 %990 }
 0x3b3   :  { %8591 = vrcp.f32 %v991_v56 }
 0x3b6   :  { %v1321_v57 = vpop.xlane.xlu1 %1320  ;;  %v1156_v58 = vpop.xlane.xlu0 %1155 }
 0x3b7   :  { %8593 = vrcp.f32 %v1156_v58 }
 0x3b8   :  { %8595 = vrcp.f32 %v1321_v57 }
 0x3ba   :  { %v1486_v59 = vpop.xlane.xlu1 %1485  ;;  %v1325_v1 = vpop.permute.xlu0 %1324 }
 0x3bb   :  { %8597 = vrcp.f32 %v1486_v59 }
 0x3be   :  { %v1490_v7 = vpop.permute.xlu1 %1489 }
 0x3c0   :  { %v8592_v60 = vpop.eup %8591 }
 0x3c1   :  { %v993_v61 = vmul.f32 %v8592_v60, %v8576_v33 }
 0x3c3   :  { %8027 = vmatmul.mubr.msk.f32.vlgmr.msra.gmra.mxu1 %vm232_vm2, %v993_v61 }
 0x3c4   :  { %8035 = vmatpush3.msra.mxu1 %v1160_v55  ;;  %8036 = vmatprep.mubr.msk.f32.mxu1 %vm8845_vm1, %v8844_v6  ;;  %v8594_v62 = vpop.eup %8593 }
 0x3c5   :  { %8044 = vmatprep.subr.mxu1 %v8844_v6  ;;  %v1158_v63 = vmul.f32 %v8594_v62, %v9129_v34  ;;  %v8596_v0 = vpop.eup %8595 }
 0x3c6   :  { %v1323_v3 = vmul.f32 %v8596_v0, %v9132_v36  ;;  %v9239_v0 = vld [vmem:[%s10242_s8] ss:$0 sm:$0xff] }
 0x3c7   :  { %8037 = vmatmul.mubr.msk.f32.vlgmr.msra.gmra.mxu1 %vm232_vm2, %v1158_v63  ;;  %v131_v63 = vld [vmem:[%s10314_s26] sm:$0xff] }
 0x3c8   :  { %8045 = vmatpush3.msra.mxu1 %v1325_v1  ;;  %8046 = vmatprep.mubr.msk.f32.mxu1 %vm8845_vm1, %v8844_v6  ;;  %v8598_v4 = vpop.eup %8597 }
 0x3c9   :  { %8054 = vmatprep.subr.mxu1 %v8844_v6  ;;  %v1488_v8 = vmul.f32 %v8598_v4, %v9138_v39 }
 0x3cb   :  { %8047 = vmatmul.mubr.msk.f32.vlgmr.msra.gmra.mxu1 %vm232_vm2, %v1323_v3 }
 0x3cc   :  { %8055 = vmatpush3.msra.mxu1 %v1490_v7  ;;  %8056 = vmatprep.mubr.msk.f32.mxu1 %vm8845_vm1, %v8844_v6 }
 0x3cd   :  { %8070 = vmatprep.subr.mxu1 %v1722_v50 }
 0x3cf   :  { %8057 = vmatmul.mubr.msk.f32.vlgmr.msra.gmra.mxu1 %vm232_vm2, %v1488_v8 }
 0x3d0   :  { %8071 = vmatpush3.msra.mxu1 %v1722_v50 }
 0x446   :  { %v390_v9 = vpop.f32.mrf.mxu1 }
 0x448   :  { %v7988_v12 = vpop.f32.mrf.mxu1 }
 0x44a   :  { %v555_v13 = vpop.f32.mrf.mxu1 }
 0x44b   :  { %890 = vrot.lane.b32.xlu0 %v555_v13, %s10286_s7 }
 0x44c   :  { %v7998_v14 = vpop.f32.mrf.mxu1 }
 0x44e   :  { %v720_v10 = vpop.f32.mrf.mxu1 }
 0x44f   :  { %894 = vrot.lane.b32.xlu1 %v720_v10, %s10284_s24  ;;  %v132_v10 = vld [vmem:[%s10314_s26 + $0x8] sm:$0xf] }
 0x450   :  { %v8008_v15 = vpop.f32.mrf.mxu1 }
 0x452   :  { %v885_v16 = vpop.f32.mrf.mxu1 }
 0x453   :  { %898 = vrot.lane.b32.xlu1 %v885_v16, %s10282_s27 }
 0x454   :  { %v8018_v17 = vpop.f32.mrf.mxu1 }
 0x455   :  { %v7513_v17 = vld [vmem:[%s10249_s15] ss:$0 sm:$0xff]  ;;  %s10324_s15 = smov 120  }
 0x483   :  { %v1066_v22 = vpop.f32.mrf.mxu1 }
 0x485   :  { %v8028_v23 = vpop.f32.mrf.mxu1 }
 0x487   :  { %v1231_v24 = vpop.f32.mrf.mxu1 }
 0x488   :  { %1566 = vrot.lane.b32.xlu0 %v1231_v24, %s10286_s7  ;;  %s10321_s7 = smov 16  }
 0x489   :  { %v8038_v25 = vpop.f32.mrf.mxu1 }
 0x48b   :  { %v1396_v26 = vpop.f32.mrf.mxu1 }
 0x48c   :  { %1570 = vrot.lane.b32.xlu0 %v1396_v26, %s10284_s24  ;;  %s10322_s24 = smov 24  }
 0x48d   :  { %v8048_v27 = vpop.f32.mrf.mxu1 }
 0x48f   :  { %v1561_v28 = vpop.f32.mrf.mxu1 }
 0x490   :  { %1574 = vrot.lane.b32.xlu1 %v1561_v28, %s10282_s27  ;;  %s10320_s27 = smov 8  }
 0x491   :  { %v8058_v29 = vpop.f32.mrf.mxu1 }
 0x4bd   :  { %v891_v30 = vpop.permute.xlu0 %890 }
 0x4be   :  { %v901_v32 = vsel %vm232_vm2, %v390_v9, %v891_v30 }
 0x4c1   :  { %v895_v31 = vpop.permute.xlu1 %894 }
 0x4c2   :  { %v903_v33 = vsel %vm902_vm3, %v901_v32, %v895_v31 }
 0x4c5   :  { %v899_v34 = vpop.permute.xlu1 %898 }
 0x4c6   :  { %v905_v35 = vsel %vm904_vm4, %v903_v33, %v899_v34 }
 0x4c7   :  { %8067 = vmatprep.mubr.msk.f32.mxu0 %vm147_vm0, %v905_v35 }
 0x4fa   :  { %v1567_v36 = vpop.permute.xlu0 %1566 }
 0x4fb   :  { %v1577_v38 = vsel %vm232_vm2, %v1066_v22, %v1567_v36 }
 0x4fe   :  { %v1571_v37 = vpop.permute.xlu0 %1570 }
 0x4ff   :  { %v1578_v39 = vsel %vm902_vm3, %v1577_v38, %v1571_v37 }
 0x502   :  { %v1575_v40 = vpop.permute.xlu1 %1574 }
 0x503   :  { %v1579_v41 = vsel %vm904_vm4, %v1578_v39, %v1575_v40 }
 0x504   :  { %8068 = vmatmul.mubr.msk.f32.vlgmr.msra.gmra.mxu0 %vm147_vm0, %v1579_v41 }
 0x505   :  { %8089 = vmatprep.mubr.msk.f32.mxu0 %vm147_vm0, %v131_v63 }
 0x5c4   :  { %v8069_v43 = vpop.f32.mrf.mxu0 }
 0x5c5   :  { %v1669_v44 = vadd.f32 %v8069_v43, %v7510_v42 }
 0x5c6   :  { %v1663_v45 = vpop.f32.mrf.mxu0 }
 0x5c7   :  { %v1664_v46 = vadd.f32 %v7510_v42, %v1663_v45  ;;  %v1673_v47 = vadd.f32 %v1669_v44, %v9015_v5  ;;  %v1721_v5 = vld [vmem:[%s10313_s1 + $0x10] sm:$0xff] }
 0x5c8   :  { %8072 = vmatprep.subr.mxu1 %v1721_v5 }
 0x5c9   :  { %v1679_v48 = vsel %vm147_vm0, %v1673_v47, 0.0  ;;  %v1672_v49 = vadd.f32 %v1664_v46, %v9005_v2  ;;  %8073 = vmatpush3.msra.mxu1 %v1721_v5  ;;  %v1719_v2 = vld [vmem:[%s10313_s1] sm:$0xff] }
 0x5ca   :  { %1680 = vadd.xlane.f32.xlu1 %v1679_v48  ;;  %8074 = vmatprep.subr.mxu1 %v1720_v51 }
 0x5cb   :  { %v1676_v11 = vsel %vm147_vm0, %v1672_v49, 0.0  ;;  %8075 = vmatpush3.msra.mxu1 %v1720_v51 }
 0x5cc   :  { %1677 = vadd.xlane.f32.xlu0 %v1676_v11  ;;  %8076 = vmatprep.subr.mxu1 %v1719_v2 }
 0x5cd   :  { %8077 = vmatpush3.msra.mxu1 %v1719_v2 }
 0x5ce   :  { %8092 = vmatprep.subr.mxu1 %v8844_v6 }
 0x5db   :  { %1821 = vrot.lane.b32.xlu1 %v1722_v50, %s10290_s0 }
 0x5df   :  { %1817 = vrot.lane.b32.xlu1 %v1720_v51, %s10290_s0 }
 0x5e3   :  { %1815 = vrot.lane.b32.xlu1 %v1719_v2, %s10290_s0 }
 0x653   :  { %v1681_v52 = vpop.xlane.xlu1 %1680 }
 0x654   :  { %v1684_v53 = vmul.f32 0.03125, %v1681_v52 }
 0x655   :  { %v1678_v54 = vpop.xlane.xlu0 %1677 }
 0x656   :  { %v1686_v55 = vsub.f32 %v1673_v47, %v1684_v53  ;;  %v1683_v56 = vmul.f32 0.03125, %v1678_v54 }
 0x657   :  { %v9227_v62 = vpop.permute.xlu1 %1821 }
 0x658   :  { %v1685_v57 = vsub.f32 %v1672_v49, %v1683_v56  ;;  %v1688_v58 = vmul.f32 %v1686_v55, %v1686_v55  ;;  %8081 = vmatprep.subr.mxu0 %v9227_v62 }
 0x659   :  { %8082 = vmatpush3.msra.mxu0 %v9227_v62 }
 0x65a   :  { %v1692_v59 = vsel %vm147_vm0, %v1688_v58, 0.0  ;;  %v1687_v60 = vmul.f32 %v1685_v57, %v1685_v57 }
 0x65b   :  { %1693 = vadd.xlane.f32.xlu0 %v1692_v59  ;;  %v9243_v8 = vpop.permute.xlu1 %1817 }
 0x65c   :  { %v1689_v61 = vsel %vm147_vm0, %v1687_v60, 0.0 }
 0x65f   :  { %1690 = vadd.xlane.f32.xlu0 %v1689_v61  ;;  %v9249_v14 = vpop.permute.xlu1 %1815 }
 0x675   :  { %1819 = vrot.lane.b32.xlu0 %v1721_v5, %s10290_s0 }
 0x679   :  { %1827 = vrot.lane.b32.xlu0 %v9239_v0, %s10290_s0 }
 0x6e4   :  { %v1694_v1 = vpop.xlane.xlu0 %1693 }
 0x6e5   :  { %v1696_v3 = vmul.f32 0.03125, %v1694_v1 }
 0x6e7   :  { %v1698_v4 = vadd.f32 1e-05, %v1696_v3 }
 0x6e8   :  { %v1691_v7 = vpop.xlane.xlu0 %1690 }
 0x6e9   :  { %8599 = vrsqrt.f32 %v1698_v4  ;;  %v1695_v9 = vmul.f32 0.03125, %v1691_v7 }
 0x6eb   :  { %v1697_v12 = vadd.f32 1e-05, %v1695_v9 }
 0x6ec   :  { %v9245_v13 = vpop.permute.xlu0 %1819 }
 0x6ed   :  { %8601 = vrsqrt.f32 %v1697_v12  ;;  %8083 = vmatprep.subr.mxu0 %v9245_v13 }
 0x6ee   :  { %8084 = vmatpush3.msra.mxu0 %v9245_v13 }
 0x6ef   :  { %8085 = vmatprep.subr.mxu0 %v9243_v8 }
 0x6f0   :  { %8086 = vmatpush3.msra.mxu0 %v9243_v8  ;;  %v9278_v25 = vpop.permute.xlu0 %1827 }
 0x6f1   :  { %8087 = vmatprep.subr.mxu0 %v9249_v14 }
 0x6f2   :  { %8088 = vmatpush3.msra.mxu0 %v9249_v14 }
 0x6f3   :  { %8090 = vmatmul.mubr.msk.f32.vlgmr.msra.gmra.mxu0 %vm147_vm0, %v132_v10  ;;  %8099 = vmatprep.subr.mxu0 %v8844_v6 }
 0x6f4   :  { %8103 = vmatprep.mubr.msk.f32.mxu0 %vm8845_vm1, %v8844_v6 }
 0x6f6   :  { %v8600_v15 = vpop.eup %8599 }
 0x6f7   :  { %v1702_v16 = vmul.f32 %v8600_v15, %v1686_v55 }
 0x6f9   :  { %v1710_v20 = vmul.f32 %v7513_v17, %v1702_v16 }
 0x6fa   :  { %v8602_v18 = vpop.eup %8601 }
 0x6fb   :  { %v1701_v19 = vmul.f32 %v8602_v18, %v1685_v57  ;;  %v9270_v24 = vadd.f32 %v7514_v21, %v1710_v20 }
 0x6fd   :  { %v1709_v22 = vmul.f32 %v7513_v17, %v1701_v19 }
 0x6ff   :  { %v9268_v23 = vadd.f32 %v7514_v21, %v1709_v22 }
 0x701   :  { %8078 = vmatprep.mubr.msk.f32.mxu1 %vm147_vm0, %v9268_v23 }
 0x702   :  { %8079 = vmatmul.mubr.msk.f32.vlgmr.msra.gmra.mxu1 %vm147_vm0, %v9270_v24 }
 0x703   :  { %8096 = vmatprep.mubr.msk.f32.mxu1 %vm8845_vm1, %v8844_v6 }
 0x7b3   :  { %v8091_v26 = vpop.f32.mrf.mxu0 }
 0x7b4   :  { %v9281_v27 = vadd.f32 %v8091_v26, %v9278_v25 }
 0x7b5   :  { %v1902_v28 = vpop.f32.mrf.mxu0 }
 0x7b6   :  { %2087 = vrot.lane.b32.xlu1 %v9281_v27, %s10288_s3  ;;  %8093 = vmatpush3.xpose.msk.msra.mxu1 %vm232_vm2, %v9281_v27  ;;  %v9288_v29 = vadd.f32 %v1902_v28, %v9278_v25 }
 0x7b7   :  { %8094 = vmatprep.subr.mxu1 %v8844_v6 }
 0x7b8   :  { %2085 = vrot.lane.b32.xlu0 %v9288_v29, %s10288_s3 }
 0x7ba   :  { %8095 = vmatpush3.xpose.msk.msra.mxu1 %vm232_vm2, %v9288_v29 }
 0x7bb   :  { %8106 = vmatprep.subr.mxu1 %v8844_v6 }
 0x7c2   :  { %v9296_v30 = vpop.f32.mrf.mxu1 }
 0x7c4   :  { %v1802_v31 = vpop.f32.mrf.mxu1 }
 0x7c5   :  { %v9299_v32 = vadd.f32 %v9239_v0, %v1802_v31 }
 0x7c7   :  { %2083 = vrot.lane.b32.xlu1 %v9299_v32, %s10288_s3  ;;  %8097 = vmatmul.mubr.msk.f32.vlgmr.msra.gmra.mxu1 %vm232_vm2, %v9299_v32 }
 0x7c8   :  { %8110 = vmatprep.mubr.msk.f32.mxu1 %vm8845_vm1, %v8844_v6 }
 0x828   :  { %v2088_v33 = vpop.permute.xlu1 %2087 }
 0x829   :  { %8107 = vmatpush3.xpose.msk.msra.mxu1 %vm232_vm2, %v2088_v33 }
 0x82a   :  { %v2086_v34 = vpop.permute.xlu0 %2085  ;;  %8108 = vmatprep.subr.mxu1 %v8844_v6 }
 0x82d   :  { %8109 = vmatpush3.xpose.msk.msra.mxu1 %vm232_vm2, %v2086_v34 }
 0x82e   :  { %8127 = vmatprep.subr.mxu1 %v8844_v6 }
 0x839   :  { %v2084_v35 = vpop.permute.xlu1 %2083 }
 0x83a   :  { %8111 = vmatmul.mubr.msk.f32.vlgmr.msra.gmra.mxu1 %vm232_vm2, %v2084_v35 }
 0x83b   :  { %8131 = vmatprep.mubr.msk.f32.mxu1 %vm8845_vm1, %v8844_v6 }
 0x887   :  { %v1986_v36 = vpop.f32.mrf.mxu1 }
 0x888   :  { %v1991_v37 = vsel %vm1990_vm5, %v1986_v36, -inf }
 0x889   :  { %1992 = vmax.xlane.f32.xlu0 %v1991_v37  ;;  %v8098_v38 = vpop.f32.mrf.mxu1 }
 0x89f   :  { %2002 = vrot.lane.b32.xlu0 %v9288_v29, %s10290_s0 }
 0x8fa   :  { %v2161_v39 = vpop.f32.mrf.mxu1 }
 0x8fb   :  { %v2165_v40 = vsel %vm1990_vm5, %v2161_v39, -inf }
 0x8fc   :  { %2166 = vmax.xlane.f32.xlu1 %v2165_v40  ;;  %v8112_v41 = vpop.f32.mrf.mxu1 }
 0x90d   :  { %2004 = vrot.lane.b32.xlu1 %v9281_v27, %s10290_s0 }
 0x911   :  { %2178 = vrot.lane.b32.xlu1 %v9281_v27, %s10315_s25 }
 0x912   :  { %v1993_v42 = vpop.xlane.xlu0 %1992 }
 0x913   :  { %v1994_v43 = vsub.f32 %v1986_v36, %v1993_v42 }
 0x915   :  { %v1995_v44 = vmul.f32 1.442695, %v1994_v43  ;;  %2176 = vrot.lane.b32.xlu1 %v9288_v29, %s10315_s25 }
 0x916   :  { %v2003_v50 = vpop.permute.xlu0 %2002 }
 0x917   :  { %8603 = vpow2.f32 %v1995_v44 }
 0x919   :  { %2258 = vrot.lane.b32.xlu1 %v9288_v29, %s10316_s4 }
 0x924   :  { %v8604_v45 = vpop.eup %8603 }
 0x925   :  { %v1997_v46 = vsel %vm1990_vm5, %v8604_v45, 0.0 }
 0x926   :  { %1998 = vadd.xlane.f32.xlu0 %v1997_v46 }
 0x985   :  { %v2167_v47 = vpop.xlane.xlu1 %2166 }
 0x986   :  { %v2168_v48 = vsub.f32 %v2161_v39, %v2167_v47  ;;  %v7481_v47 = vld [vmem:[%s10314_s26 + $0x10] sm:$0xff] }
 0x988   :  { %v2169_v49 = vmul.f32 1.442695, %v2168_v48 }
 0x989   :  { %v2005_v11 = vpop.permute.xlu1 %2004 }
 0x98a   :  { %8605 = vpow2.f32 %v2169_v49  ;;  %8100 = vmatpush3.msk.msra.mxu0 %vm2010_vm6, %v2005_v11 }
 0x98b   :  { %8101 = vmatprep.subr.mxu0 %v8844_v6 }
 0x98c   :  { %8102 = vmatpush3.msra.mxu0 %v2003_v50 }
 0x98d   :  { %8113 = vmatprep.subr.mxu0 %v8844_v6  ;;  %v2179_v52 = vpop.permute.xlu1 %2178 }
 0x991   :  { %v2177_v55 = vpop.permute.xlu1 %2176 }
 0x995   :  { %v2259_v60 = vpop.permute.xlu1 %2258 }
 0x997   :  { %v8606_v51 = vpop.eup %8605 }
 0x998   :  { %v2171_v5 = vsel %vm1990_vm5, %v8606_v51, 0.0 }
 0x999   :  { %2172 = vadd.xlane.f32.xlu0 %v2171_v5 }
 0x9af   :  { %v1999_v2 = vpop.xlane.xlu0 %1998  ;;  %2260 = vrot.lane.b32.xlu0 %v9281_v27, %s10316_s4 }
 0x9b0   :  { %8607 = vrcp.f32 %v1999_v2 }
 0x9b3   :  { %2256 = vrot.lane.b32.xlu0 %v9299_v32, %s10316_s4 }
 0x9bd   :  { %v8608_v53 = vpop.eup %8607 }
 0x9be   :  { %v2001_v54 = vmul.f32 %v8608_v53, %v8604_v45 }
 0x9c0   :  { %8104 = vmatmul.mubr.msk.f32.vlgmr.msra.gmra.mxu0 %vm1990_vm5, %v2001_v54 }
 0x9c1   :  { %8114 = vmatpush3.msk.msra.mxu0 %vm2010_vm6, %v2179_v52  ;;  %8117 = vmatprep.mubr.msk.f32.mxu0 %vm8845_vm1, %v8844_v6 }
 0x9c2   :  { %8115 = vmatprep.subr.mxu0 %v8844_v6 }
 0x9c3   :  { %8116 = vmatpush3.msra.mxu0 %v2177_v55 }
 0x9c4   :  { %8120 = vmatprep.subr.mxu0 %v8844_v6 }
 0xa22   :  { %v2173_v56 = vpop.xlane.xlu0 %2172 }
 0xa23   :  { %8609 = vrcp.f32 %v2173_v56 }
 0xa26   :  { %v2261_v59 = vpop.permute.xlu0 %2260 }
 0xa2a   :  { %v2257_v61 = vpop.permute.xlu0 %2256 }
 0xa30   :  { %v8610_v57 = vpop.eup %8609 }
 0xa31   :  { %v2175_v58 = vmul.f32 %v8610_v57, %v8606_v51 }
 0xa33   :  { %8118 = vmatmul.mubr.msk.f32.vlgmr.msra.gmra.mxu0 %vm1990_vm5, %v2175_v58 }
 0xa34   :  { %8121 = vmatpush3.xpose.msk.msra.mxu0 %vm232_vm2, %v2261_v59  ;;  %8124 = vmatprep.mubr.msk.f32.mxu0 %vm8845_vm1, %v8844_v6 }
 0xa35   :  { %8122 = vmatprep.subr.mxu0 %v8844_v6 }
 0xa38   :  { %8123 = vmatpush3.xpose.msk.msra.mxu0 %vm232_vm2, %v2259_v60 }
 0xa39   :  { %8141 = vmatprep.subr.mxu0 %v8844_v6 }
 0xa3b   :  { %8125 = vmatmul.mubr.msk.f32.vlgmr.msra.gmra.mxu0 %vm232_vm2, %v2257_v61 }
 0xa3c   :  { %8145 = vmatprep.mubr.msk.f32.mxu0 %vm8845_vm1, %v8844_v6 }
 0xa80   :  { %v9351_v63 = vpop.f32.mrf.mxu0 }
 0xa82   :  { %v8105_v1 = vpop.f32.mrf.mxu0 }
 0xaf3   :  { %v9353_v3 = vpop.f32.mrf.mxu0 }
 0xaf5   :  { %v8119_v4 = vpop.f32.mrf.mxu0 }
 0xafb   :  { %v2334_v7 = vpop.f32.mrf.mxu0 }
 0xafc   :  { %v2338_v9 = vsel %vm1990_vm5, %v2334_v7, -inf }
 0xafd   :  { %2339 = vmax.xlane.f32.xlu1 %v2338_v9  ;;  %v8126_v12 = vpop.f32.mrf.mxu0 }
 0xb0e   :  { %2349 = vrot.lane.b32.xlu1 %v9288_v29, %s10317_s5 }
 0xb12   :  { %2433 = vrot.lane.b32.xlu1 %v9281_v27, %s10318_s11 }
 0xb16   :  { %2429 = vrot.lane.b32.xlu1 %v9299_v32, %s10318_s11 }
 0xb86   :  { %v2340_v10 = vpop.xlane.xlu1 %2339 }
 0xb87   :  { %v2341_v15 = vsub.f32 %v2334_v7, %v2340_v10 }
 0xb89   :  { %v2342_v16 = vmul.f32 1.442695, %v2341_v15 }
 0xb8a   :  { %v2350_v21 = vpop.permute.xlu1 %2349 }
 0xb8b   :  { %8611 = vpow2.f32 %v2342_v16 }
 0xb8e   :  { %v2434_v28 = vpop.permute.xlu1 %2433 }
 0xb92   :  { %v2430_v32 = vpop.permute.xlu1 %2429 }
 0xb98   :  { %v8612_v17 = vpop.eup %8611 }
 0xb99   :  { %v2344_v18 = vsel %vm1990_vm5, %v8612_v17, 0.0 }
 0xb9a   :  { %2345 = vadd.xlane.f32.xlu0 %v2344_v18 }
 0xbb0   :  { %2351 = vrot.lane.b32.xlu0 %v9281_v27, %s10317_s5 }
 0xbb4   :  { %2431 = vrot.lane.b32.xlu0 %v9288_v29, %s10318_s11 }
 0xc23   :  { %v2346_v19 = vpop.xlane.xlu0 %2345 }
 0xc24   :  { %8613 = vrcp.f32 %v2346_v19 }
 0xc27   :  { %v2352_v20 = vpop.permute.xlu0 %2351 }
 0xc28   :  { %8128 = vmatpush3.msk.msra.mxu1 %vm2010_vm6, %v2352_v20 }
 0xc29   :  { %8129 = vmatprep.subr.mxu1 %v8844_v6 }
 0xc2a   :  { %8130 = vmatpush3.msra.mxu1 %v2350_v21 }
 0xc2b   :  { %8134 = vmatprep.subr.mxu1 %v8844_v6  ;;  %v2432_v31 = vpop.permute.xlu0 %2431 }
 0xc31   :  { %v8614_v22 = vpop.eup %8613 }
 0xc32   :  { %v2348_v26 = vmul.f32 %v8614_v22, %v8612_v17 }
 0xc34   :  { %8132 = vmatmul.mubr.msk.f32.vlgmr.msra.gmra.mxu1 %vm1990_vm5, %v2348_v26 }
 0xc35   :  { %8135 = vmatpush3.xpose.msk.msra.mxu1 %vm232_vm2, %v2434_v28  ;;  %8138 = vmatprep.mubr.msk.f32.mxu1 %vm8845_vm1, %v8844_v6 }
 0xc36   :  { %8136 = vmatprep.subr.mxu1 %v8844_v6 }
 0xc39   :  { %8137 = vmatpush3.xpose.msk.msra.mxu1 %vm232_vm2, %v2432_v31 }
 0xc3a   :  { %8159 = vmatprep.subr.mxu1 %v8844_v6 }
 0xc3c   :  { %8139 = vmatmul.mubr.msk.f32.vlgmr.msra.gmra.mxu1 %vm232_vm2, %v2430_v32 }
 0xc3d   :  { %8163 = vmatprep.mubr.msk.f32.mxu1 %vm8845_vm1, %v8844_v6 }
 0xcf4   :  { %v9380_v33 = vpop.f32.mrf.mxu1 }
 0xcf6   :  { %v8133_v34 = vpop.f32.mrf.mxu1 }
 0xcfc   :  { %v2507_v35 = vpop.f32.mrf.mxu1 }
 0xcfd   :  { %v2511_v36 = vsel %vm1990_vm5, %v2507_v35, -inf }
 0xcfe   :  { %2512 = vmax.xlane.f32.xlu0 %v2511_v36  ;;  %v8140_v37 = vpop.f32.mrf.mxu1 }
 0xd14   :  { %2524 = vrot.lane.b32.xlu0 %v9281_v27, %s10319_s2 }
 0xd87   :  { %v2513_v38 = vpop.xlane.xlu0 %2512 }
 0xd88   :  { %v2514_v39 = vsub.f32 %v2507_v35, %v2513_v38 }
 0xd8a   :  { %v2515_v40 = vmul.f32 1.442695, %v2514_v39 }
 0xd8b   :  { %v2525_v41 = vpop.permute.xlu0 %2524 }
 0xd8c   :  { %8615 = vpow2.f32 %v2515_v40  ;;  %8142 = vmatpush3.msk.msra.mxu0 %vm2010_vm6, %v2525_v41 }
 0xd8d   :  { %8143 = vmatprep.subr.mxu0 %v8844_v6 }
 0xd99   :  { %v8616_v42 = vpop.eup %8615 }
 0xd9a   :  { %v2517_v43 = vsel %vm1990_vm5, %v8616_v42, 0.0 }
 0xd9b   :  { %2518 = vadd.xlane.f32.xlu1 %v2517_v43 }
 0xdac   :  { %2522 = vrot.lane.b32.xlu1 %v9288_v29, %s10319_s2  ;;  %v7482_v29 = vld [vmem:[%s10314_s26 + $0x18] sm:$0xf] }
 0xe24   :  { %v2519_v44 = vpop.xlane.xlu1 %2518 }
 0xe25   :  { %8617 = vrcp.f32 %v2519_v44 }
 0xe28   :  { %v2523_v45 = vpop.permute.xlu1 %2522 }
 0xe29   :  { %8144 = vmatpush3.msra.mxu0 %v2523_v45 }
 0xe2a   :  { %8148 = vmatprep.subr.mxu0 %v9227_v62 }
 0xe32   :  { %v8618_v27 = vpop.eup %8617 }
 0xe33   :  { %v2521_v46 = vmul.f32 %v8618_v27, %v8616_v42 }
 0xe35   :  { %8146 = vmatmul.mubr.msk.f32.vlgmr.msra.gmra.mxu0 %vm1990_vm5, %v2521_v46 }
 0xe36   :  { %8149 = vmatpush3.msra.mxu0 %v9227_v62  ;;  %8156 = vmatprep.mubr.msk.f32.mxu0 %vm147_vm0, %v7481_v47 }
 0xe37   :  { %8150 = vmatprep.subr.mxu0 %v9245_v13 }
 0xe38   :  { %8151 = vmatpush3.msra.mxu0 %v9245_v13 }
 0xe39   :  { %8152 = vmatprep.subr.mxu0 %v9243_v8 }
 0xe3a   :  { %8153 = vmatpush3.msra.mxu0 %v9243_v8 }
 0xe3b   :  { %8154 = vmatprep.subr.mxu0 %v9249_v14 }
 0xe3c   :  { %8155 = vmatpush3.msra.mxu0 %v9249_v14  ;;  %v9425_v14 = vadd.f32 %v9296_v30, %v9239_v0 }
 0xe3d   :  { %8157 = vmatmul.mubr.msk.f32.vlgmr.msra.gmra.mxu0 %vm147_vm0, %v7482_v29  ;;  %8166 = vmatprep.subr.mxu0 %v8844_v6 }
 0xe3e   :  { %8170 = vmatprep.mubr.msk.f32.mxu0 %vm8845_vm1, %v8844_v6 }
 0xef5   :  { %v9410_v62 = vpop.f32.mrf.mxu0 }
 0xef7   :  { %v8147_v13 = vpop.f32.mrf.mxu0 }
 0xefd   :  { %v8158_v48 = vpop.f32.mrf.mxu0 }
 0xefe   :  { %v9413_v8 = vadd.f32 %v8158_v48, %v9278_v25 }
 0xeff   :  { %v2689_v49 = vpop.f32.mrf.mxu0 }
 0xf00   :  { %v9416_v11 = vadd.f32 %v2689_v49, %v9278_v25  ;;  %2872 = vrot.lane.b32.xlu0 %v9413_v8, %s10288_s3  ;;  %8160 = vmatpush3.xpose.msk.msra.mxu1 %vm232_vm2, %v9413_v8 }
 0xf01   :  { %8161 = vmatprep.subr.mxu1 %v8844_v6 }
 0xf02   :  { %2870 = vrot.lane.b32.xlu1 %v9416_v11, %s10288_s3 }
 0xf04   :  { %2868 = vrot.lane.b32.xlu0 %v9425_v14, %s10288_s3  ;;  %8162 = vmatpush3.xpose.msk.msra.mxu1 %vm232_vm2, %v9416_v11  ;;  %s10332_s3 = sld [smem:[#allocation26_spill]] }
 0xf05   :  { %8173 = vmatprep.subr.mxu1 %v8844_v6 }
 0xf07   :  { %8164 = vmatmul.mubr.msk.f32.vlgmr.msra.gmra.mxu1 %vm232_vm2, %v9425_v14 }
 0xf08   :  { %8177 = vmatprep.mubr.msk.f32.mxu1 %vm8845_vm1, %v8844_v6 }
 0xf72   :  { %v2873_v25 = vpop.permute.xlu0 %2872 }
 0xf73   :  { %8174 = vmatpush3.xpose.msk.msra.mxu1 %vm232_vm2, %v2873_v25 }
 0xf74   :  { %8175 = vmatprep.subr.mxu1 %v8844_v6  ;;  %v2871_v0 = vpop.permute.xlu1 %2870 }
 0xf76   :  { %v2869_v30 = vpop.permute.xlu0 %2868 }
 0xf77   :  { %8176 = vmatpush3.xpose.msk.msra.mxu1 %vm232_vm2, %v2871_v0 }
 0xf78   :  { %8194 = vmatprep.subr.mxu1 %v8844_v6 }
 0xf7a   :  { %8178 = vmatmul.mubr.msk.f32.vlgmr.msra.gmra.mxu1 %vm232_vm2, %v2869_v30 }
 0xf7b   :  { %8198 = vmatprep.mubr.msk.f32.mxu1 %vm8845_vm1, %v8844_v6 }
 0xfc7   :  { %v2773_v50 = vpop.f32.mrf.mxu1 }
 0xfc8   :  { %v2777_v51 = vsel %vm1990_vm5, %v2773_v50, -inf }
 0xfc9   :  { %2778 = vmax.xlane.f32.xlu1 %v2777_v51  ;;  %v8165_v5 = vpop.f32.mrf.mxu1 }
 0xfda   :  { %2788 = vrot.lane.b32.xlu1 %v9416_v11, %s10290_s0 }
 0xfde   :  { %2963 = vrot.lane.b32.xlu1 %v9413_v8, %s10315_s25 }
 0xfe2   :  { %3045 = vrot.lane.b32.xlu1 %v9413_v8, %s10316_s4 }
0x103a   :  { %v2946_v2 = vpop.f32.mrf.mxu1 }
0x103b   :  { %v2950_v52 = vsel %vm1990_vm5, %v2946_v2, -inf }
0x103c   :  { %2951 = vmax.xlane.f32.xlu0 %v2950_v52  ;;  %v8179_v53 = vpop.f32.mrf.mxu1 }
0x1052   :  { %2790 = vrot.lane.b32.xlu0 %v9413_v8, %s10290_s0  ;;  %v2779_v54 = vpop.xlane.xlu1 %2778  ;;  %s8858_s0 = smov [#allocation10]  }
0x1053   :  { %v2780_v55 = vsub.f32 %v2773_v50, %v2779_v54 }
0x1055   :  { %v2781_v56 = vmul.f32 1.442695, %v2780_v55 }
0x1056   :  { %v2789_v4 = vpop.permute.xlu1 %2788 }
0x1057   :  { %8619 = vpow2.f32 %v2781_v56 }
0x105a   :  { %v2964_v16 = vpop.permute.xlu1 %2963 }
0x105e   :  { %v3046_v18 = vpop.permute.xlu1 %3045 }
0x1064   :  { %v8620_v57 = vpop.eup %8619 }
0x1065   :  { %v2783_v58 = vsel %vm1990_vm5, %v8620_v57, 0.0 }
0x1071   :  { %2784 = vadd.xlane.f32.xlu0 %v2783_v58  ;;  %v3405_v58 = vld [vmem:[%s10243_s9 + $0x18] sm:$0xff] }
0x1087   :  { %2961 = vrot.lane.b32.xlu0 %v9416_v11, %s10315_s25 }
0x108b   :  { %3043 = vrot.lane.b32.xlu0 %v9416_v11, %s10316_s4 }
0x10c5   :  { %v2952_v59 = vpop.xlane.xlu0 %2951 }
0x10c6   :  { %v2953_v60 = vsub.f32 %v2946_v2, %v2952_v59  ;;  %v3404_v59 = vld [vmem:[%s10243_s9 + $0x10] sm:$0xff] }
0x10c8   :  { %v2954_v61 = vmul.f32 1.442695, %v2953_v60  ;;  %v3402_v60 = vld [vmem:[%s10243_s9] sm:$0xff] }
0x10c9   :  { %v2791_v1 = vpop.permute.xlu0 %2790 }
0x10ca   :  { %8621 = vpow2.f32 %v2954_v61  ;;  %8167 = vmatpush3.msk.msra.mxu0 %vm2010_vm6, %v2791_v1 }
0x10cb   :  { %8168 = vmatprep.subr.mxu0 %v8844_v6 }
0x10cc   :  { %8169 = vmatpush3.msra.mxu0 %v2789_v4 }
0x10cd   :  { %8180 = vmatprep.subr.mxu0 %v8844_v6 }
0x10d7   :  { %v8622_v7 = vpop.eup %8621 }
0x10d8   :  { %v2956_v9 = vsel %vm1990_vm5, %v8622_v7, 0.0 }
0x10d9   :  { %2957 = vadd.xlane.f32.xlu1 %v2956_v9 }
0x10ea   :  { %3041 = vrot.lane.b32.xlu1 %v9425_v14, %s10316_s4 }
0x10ee   :  { %3134 = vrot.lane.b32.xlu1 %v9416_v11, %s10317_s5 }
0x10fa   :  { %v2785_v12 = vpop.xlane.xlu0 %2784 }
0x10fb   :  { %8623 = vrcp.f32 %v2785_v12 }
0x10fe   :  { %v2962_v17 = vpop.permute.xlu0 %2961 }
0x1102   :  { %v3044_v22 = vpop.permute.xlu0 %3043 }
0x1108   :  { %v8624_v10 = vpop.eup %8623 }
0x1109   :  { %v2787_v15 = vmul.f32 %v8624_v10, %v8620_v57 }
0x110b   :  { %8171 = vmatmul.mubr.msk.f32.vlgmr.msra.gmra.mxu0 %vm1990_vm5, %v2787_v15 }
0x110c   :  { %8181 = vmatpush3.msk.msra.mxu0 %vm2010_vm6, %v2964_v16  ;;  %8184 = vmatprep.mubr.msk.f32.mxu0 %vm8845_vm1, %v8844_v6  ;;  %v7562_v16 = vld [vmem:[%s10244_s10] ss:$0 sm:$0xff] }
0x110d   :  { %8182 = vmatprep.subr.mxu0 %v8844_v6 }
0x110e   :  { %8183 = vmatpush3.msra.mxu0 %v2962_v17 }
0x110f   :  { %8187 = vmatprep.subr.mxu0 %v8844_v6 }
0x1162   :  { %v2958_v19 = vpop.xlane.xlu1 %2957 }
0x1163   :  { %8625 = vrcp.f32 %v2958_v19 }
0x1166   :  { %v3042_v26 = vpop.permute.xlu1 %3041 }
0x116a   :  { %v3135_v42 = vpop.permute.xlu1 %3134 }
0x1170   :  { %v8626_v20 = vpop.eup %8625 }
0x1171   :  { %v2960_v21 = vmul.f32 %v8626_v20, %v8622_v7 }
0x1173   :  { %8185 = vmatmul.mubr.msk.f32.vlgmr.msra.gmra.mxu0 %vm1990_vm5, %v2960_v21 }
0x1174   :  { %8188 = vmatpush3.xpose.msk.msra.mxu0 %vm232_vm2, %v3046_v18  ;;  %8191 = vmatprep.mubr.msk.f32.mxu0 %vm8845_vm1, %v8844_v6 }
0x1175   :  { %8189 = vmatprep.subr.mxu0 %v8844_v6 }
0x1178   :  { %8190 = vmatpush3.xpose.msk.msra.mxu0 %vm232_vm2, %v3044_v22 }
0x1179   :  { %8208 = vmatprep.subr.mxu0 %v8844_v6 }
0x117b   :  { %8192 = vmatmul.mubr.msk.f32.vlgmr.msra.gmra.mxu0 %vm232_vm2, %v3042_v26 }
0x117c   :  { %8212 = vmatprep.mubr.msk.f32.mxu0 %vm8845_vm1, %v8844_v6 }
0x11cb   :  { %v9484_v28 = vpop.f32.mrf.mxu0 }
0x11cd   :  { %v8172_v31 = vpop.f32.mrf.mxu0 }
0x1233   :  { %v3037_v32 = vpop.f32.mrf.mxu0 }
0x1235   :  { %v8186_v34 = vpop.f32.mrf.mxu0 }
0x123b   :  { %v3119_v35 = vpop.f32.mrf.mxu0 }
0x123c   :  { %v3123_v36 = vsel %vm1990_vm5, %v3119_v35, -inf }
0x123d   :  { %3124 = vmax.xlane.f32.xlu0 %v3123_v36  ;;  %v8193_v37 = vpop.f32.mrf.mxu0 }
0x1253   :  { %3136 = vrot.lane.b32.xlu0 %v9413_v8, %s10317_s5 }
0x1257   :  { %3218 = vrot.lane.b32.xlu0 %v9413_v8, %s10318_s11 }
0x125b   :  { %3214 = vrot.lane.b32.xlu0 %v9425_v14, %s10318_s11 }
0x12c6   :  { %v3125_v38 = vpop.xlane.xlu0 %3124 }
0x12c7   :  { %v3126_v39 = vsub.f32 %v3119_v35, %v3125_v38 }
0x12c9   :  { %v3127_v40 = vmul.f32 1.442695, %v3126_v39 }
0x12ca   :  { %v3137_v41 = vpop.permute.xlu0 %3136 }
0x12cb   :  { %8627 = vpow2.f32 %v3127_v40  ;;  %8195 = vmatpush3.msk.msra.mxu1 %vm2010_vm6, %v3137_v41  ;;  %v3542_v41 = vld [vmem:[#allocation8 + $0x10] sm:$0xff] }
0x12cc   :  { %8196 = vmatprep.subr.mxu1 %v8844_v6 }
0x12cd   :  { %8197 = vmatpush3.msra.mxu1 %v3135_v42  ;;  %v3541_v42 = vld [vmem:[#allocation8 + $0x8] sm:$0xff] }
0x12ce   :  { %8201 = vmatprep.subr.mxu1 %v8844_v6  ;;  %v3219_v47 = vpop.permute.xlu0 %3218 }
0x12d2   :  { %v3215_v13 = vpop.permute.xlu0 %3214 }
0x12d8   :  { %v8628_v43 = vpop.eup %8627 }
0x12d9   :  { %v3129_v44 = vsel %vm1990_vm5, %v8628_v43, 0.0 }
0x12da   :  { %3130 = vadd.xlane.f32.xlu1 %v3129_v44  ;;  %v3641_v44 = vld [vmem:[%s10247_s13 + $0x38] sm:$0xff] }
0x12eb   :  { %3216 = vrot.lane.b32.xlu1 %v9416_v11, %s10318_s11 }
0x1363   :  { %v3131_v45 = vpop.xlane.xlu1 %3130 }
0x1364   :  { %8629 = vrcp.f32 %v3131_v45  ;;  %v3640_v45 = vld [vmem:[%s10247_s13 + $0x30] sm:$0xff] }
0x1367   :  { %v3217_v29 = vpop.permute.xlu1 %3216 }
0x1371   :  { %v8630_v27 = vpop.eup %8629 }
0x1372   :  { %v3133_v46 = vmul.f32 %v8630_v27, %v8628_v43  ;;  %v3540_v43 = vld [vmem:[#allocation8] sm:$0xff]  ;;  %v3639_v27 = vld [vmem:[%s10247_s13 + $0x28] sm:$0xff] }
0x1374   :  { %8199 = vmatmul.mubr.msk.f32.vlgmr.msra.gmra.mxu1 %vm1990_vm5, %v3133_v46  ;;  %v3638_v46 = vld [vmem:[%s10247_s13 + $0x20] sm:$0xff] }
0x1375   :  { %8202 = vmatpush3.xpose.msk.msra.mxu1 %vm232_vm2, %v3219_v47  ;;  %8205 = vmatprep.mubr.msk.f32.mxu1 %vm8845_vm1, %v8844_v6 }
0x1376   :  { %8203 = vmatprep.subr.mxu1 %v8844_v6 }
0x1379   :  { %8204 = vmatpush3.xpose.msk.msra.mxu1 %vm232_vm2, %v3217_v29 }
0x137c   :  { %8206 = vmatmul.mubr.msk.f32.vlgmr.msra.gmra.mxu1 %vm232_vm2, %v3215_v13 }
0x1434   :  { %v3210_v48 = vpop.f32.mrf.mxu1 }
0x1436   :  { %v8200_v49 = vpop.f32.mrf.mxu1 }
0x143c   :  { %v3292_v14 = vpop.f32.mrf.mxu1 }
0x143d   :  { %v3296_v25 = vsel %vm1990_vm5, %v3292_v14, -inf }
0x143e   :  { %3297 = vmax.xlane.f32.xlu1 %v3296_v25  ;;  %v8207_v0 = vpop.f32.mrf.mxu1 }
0x143f   :  { %v7565_v0 = vld [vmem:[%s10251_s17] ss:$0 sm:$0xff] }
0x144f   :  { %3307 = vrot.lane.b32.xlu1 %v9416_v11, %s10319_s2 }
0x1453   :  { %2603 = vrot.lane.b32.xlu1 %v9353_v3, %s10320_s27 }
0x1457   :  { %3388 = vrot.lane.b32.xlu1 %v3037_v32, %s10320_s27 }
0x145b   :  { %3392 = vrot.lane.b32.xlu1 %v3210_v48, %s10321_s7 }
0x14c7   :  { %v3298_v30 = vpop.xlane.xlu1 %3297 }
0x14c8   :  { %v3299_v50 = vsub.f32 %v3292_v14, %v3298_v30 }
0x14ca   :  { %v3300_v51 = vmul.f32 1.442695, %v3299_v50 }
0x14cb   :  { %v3308_v52 = vpop.permute.xlu1 %3307 }
0x14cc   :  { %8631 = vpow2.f32 %v3300_v51 }
0x14cf   :  { %v2604_v54 = vpop.permute.xlu1 %2603 }
0x14d3   :  { %v3389_v4 = vpop.permute.xlu1 %3388 }
0x14d4   :  { %v3399_v9 = vsel %vm232_vm2, %v9484_v28, %v3389_v4 }
0x14d7   :  { %v3393_v7 = vpop.permute.xlu1 %3392 }
0x14d8   :  { %v3400_v12 = vsel %vm902_vm3, %v3399_v9, %v3393_v7 }
0x14d9   :  { %v8632_v5 = vpop.eup %8631 }
0x14da   :  { %v3302_v2 = vsel %vm1990_vm5, %v8632_v5, 0.0 }
0x14db   :  { %3303 = vadd.xlane.f32.xlu0 %v3302_v2  ;;  %v7566_v2 = vld [vmem:[%s10252_s18] ss:$0 sm:$0xff] }
0x14f1   :  { %3309 = vrot.lane.b32.xlu0 %v9413_v8, %s10319_s2  ;;  %v2614_v8 = vsel %vm232_vm2, %v9351_v63, %v2604_v54  ;;  %v3403_v63 = vld [vmem:[%s10243_s9 + $0x8] sm:$0xff]  ;;  %v3636_v54 = vld [vmem:[%s10247_s13 + $0x10] sm:$0xff] }
0x14f5   :  { %2607 = vrot.lane.b32.xlu0 %v9380_v33, %s10321_s7 }
0x14f9   :  { %2611 = vrot.lane.b32.xlu0 %v9410_v62, %s10322_s24 }
0x1564   :  { %v3304_v3 = vpop.xlane.xlu0 %3303 }
0x1565   :  { %8633 = vrcp.f32 %v3304_v3 }
0x1568   :  { %v3310_v11 = vpop.permute.xlu0 %3309 }
0x1569   :  { %8209 = vmatpush3.msk.msra.mxu0 %vm2010_vm6, %v3310_v11 }
0x156a   :  { %8210 = vmatprep.subr.mxu0 %v8844_v6 }
0x156b   :  { %8211 = vmatpush3.msra.mxu0 %v3308_v52 }
0x156c   :  { %v2608_v53 = vpop.permute.xlu0 %2607  ;;  %8215 = vmatprep.subr.mxu0 %v3405_v58 }
0x156d   :  { %v2615_v57 = vsel %vm902_vm3, %v2614_v8, %v2608_v53  ;;  %v3637_v53 = vld [vmem:[%s10247_s13 + $0x18] sm:$0xff]  ;;  %v7567_v8 = vld [vmem:[%s10246_s12] ss:$0 sm:$0xff] }
0x1570   :  { %v2612_v56 = vpop.permute.xlu0 %2611 }
0x1571   :  { %v2616_v62 = vsel %vm904_vm4, %v2615_v57, %v2612_v56  ;;  %v3634_v56 = vld [vmem:[%s10247_s13] sm:$0xff] }
0x1572   :  { %v8634_v55 = vpop.eup %8633 }
0x1573   :  { %v3306_v33 = vmul.f32 %v8634_v55, %v8632_v5  ;;  %v3635_v55 = vld [vmem:[%s10247_s13 + $0x8] sm:$0xff] }
0x1575   :  { %8213 = vmatmul.mubr.msk.f32.vlgmr.msra.gmra.mxu0 %vm1990_vm5, %v3306_v33 }
0x1576   :  { %8223 = vmatprep.mubr.msk.f32.mxu0 %vm147_vm0, %v2616_v62  ;;  %8216 = vmatpush3.msra.mxu0 %v3405_v58 }
0x1577   :  { %8217 = vmatprep.subr.mxu0 %v3404_v59 }
0x1578   :  { %8218 = vmatpush3.msra.mxu0 %v3404_v59 }
0x1579   :  { %8219 = vmatprep.subr.mxu0 %v3403_v63 }
0x157a   :  { %8220 = vmatpush3.msra.mxu0 %v3403_v63 }
0x157b   :  { %8221 = vmatprep.subr.mxu0 %v3402_v60 }
0x157c   :  { %8222 = vmatpush3.msra.mxu0 %v3402_v60  ;;  %v7570_v60 = vld [vmem:[%s10248_s14] ss:$0 sm:$0xff] }
0x157d   :  { %8237 = vmatprep.subr.mxu0 %v3641_v44 }
0x1635   :  { %v3383_v61 = vpop.f32.mrf.mxu0 }
0x1636   :  { %3396 = vrot.lane.b32.xlu0 %v3383_v61, %s10322_s24 }
0x1637   :  { %v8214_v1 = vpop.f32.mrf.mxu0 }
0x16a8   :  { %v3397_v10 = vpop.permute.xlu0 %3396 }
0x16a9   :  { %v3401_v15 = vsel %vm904_vm4, %v3400_v12, %v3397_v10 }
0x16aa   :  { %8224 = vmatmul.mubr.msk.f32.vlgmr.msra.gmra.mxu0 %vm147_vm0, %v3401_v15 }
0x16ab   :  { %8238 = vmatpush3.msra.mxu0 %v3641_v44 }
0x16ac   :  { %8239 = vmatprep.subr.mxu0 %v3640_v45 }
0x16ad   :  { %8240 = vmatpush3.msra.mxu0 %v3640_v45 }
0x16ae   :  { %8241 = vmatprep.subr.mxu0 %v3639_v27 }
0x16af   :  { %8242 = vmatpush3.msra.mxu0 %v3639_v27 }
0x16b0   :  { %8243 = vmatprep.subr.mxu0 %v3638_v46 }
0x16b1   :  { %8244 = vmatpush3.msra.mxu0 %v3638_v46  ;;  %v7574_v46 = vld [vmem:[%s10254_s20] ss:$0 sm:$0xff] }
0x16b2   :  { %8245 = vmatprep.subr.mxu0 %v3637_v53 }
0x16b3   :  { %8246 = vmatpush3.msra.mxu0 %v3637_v53 }
0x16b4   :  { %8247 = vmatprep.subr.mxu0 %v3636_v54 }
0x16b5   :  { %8248 = vmatpush3.msra.mxu0 %v3636_v54 }
0x16b6   :  { %8249 = vmatprep.subr.mxu0 %v3635_v55 }
0x16b7   :  { %8250 = vmatpush3.msra.mxu0 %v3635_v55 }
0x16b8   :  { %8251 = vmatprep.subr.mxu0 %v3634_v56 }
0x16b9   :  { %8252 = vmatpush3.msra.mxu0 %v3634_v56 }
0x16ba   :  { %8277 = vmatprep.subr.mxu0 %v8844_v6 }
0x176a   :  { %v8225_v17 = vpop.f32.mrf.mxu0 }
0x176b   :  { %v3491_v18 = vadd.f32 %v8225_v17, %v7562_v16 }
0x176c   :  { %v3485_v19 = vpop.f32.mrf.mxu0 }
0x176d   :  { %v3495_v20 = vadd.f32 %v3491_v18, %v9270_v24  ;;  %v3486_v21 = vadd.f32 %v7562_v16, %v3485_v19 }
0x176f   :  { %v3494_v22 = vadd.f32 %v3486_v21, %v9268_v23  ;;  %v3501_v26 = vsel %vm147_vm0, %v3495_v20, 0.0  ;;  %v3543_v23 = vld [vmem:[#allocation8 + $0x18] sm:$0xff] }
0x1770   :  { %3502 = vadd.xlane.f32.xlu0 %v3501_v26  ;;  %8226 = vmatprep.subr.mxu1 %v3543_v23 }
0x1771   :  { %v3498_v28 = vsel %vm147_vm0, %v3494_v22, 0.0  ;;  %8227 = vmatpush3.msra.mxu1 %v3543_v23 }
0x1772   :  { %3499 = vadd.xlane.f32.xlu1 %v3498_v28  ;;  %8228 = vmatprep.subr.mxu1 %v3542_v41 }
0x1773   :  { %8229 = vmatpush3.msra.mxu1 %v3542_v41 }
0x1774   :  { %8230 = vmatprep.subr.mxu1 %v3541_v42 }
0x1775   :  { %8231 = vmatpush3.msra.mxu1 %v3541_v42  ;;  %v7573_v42 = vld [vmem:[%s10253_s19] ss:$0 sm:$0xff] }
0x1776   :  { %8232 = vmatprep.subr.mxu1 %v3540_v43 }
0x1777   :  { %8233 = vmatpush3.msra.mxu1 %v3540_v43 }
0x17f9   :  { %v3503_v31 = vpop.xlane.xlu0 %3502 }
0x17fa   :  { %v3505_v32 = vmul.f32 0.03125, %v3503_v31 }
0x17fb   :  { %v3500_v34 = vpop.xlane.xlu1 %3499 }
0x17fc   :  { %v3507_v35 = vsub.f32 %v3495_v20, %v3505_v32  ;;  %v3504_v36 = vmul.f32 0.03125, %v3500_v34  ;;  %v7578_v32 = vld [vmem:[%s10310_s30 + $0x38] sm:$0xff]  ;;  %v7577_v34 = vld [vmem:[%s10310_s30 + $0x30] sm:$0xff] }
0x17fd   :  { %8256 = vmatprep.subr.mxu1 %v7578_v32 }
0x17fe   :  { %v3506_v37 = vsub.f32 %v3494_v22, %v3504_v36  ;;  %v3509_v38 = vmul.f32 %v3507_v35, %v3507_v35  ;;  %v7575_v36 = vld [vmem:[%s10310_s30 + $0x20] sm:$0xff] }
0x1800   :  { %v3513_v39 = vsel %vm147_vm0, %v3509_v38, 0.0  ;;  %v3508_v40 = vmul.f32 %v3506_v37, %v3506_v37 }
0x1801   :  { %3514 = vadd.xlane.f32.xlu1 %v3513_v39 }
0x1802   :  { %v3510_v24 = vsel %vm147_vm0, %v3508_v40, 0.0 }
0x1803   :  { %3511 = vadd.xlane.f32.xlu0 %v3510_v24 }
0x188a   :  { %v3515_v47 = vpop.xlane.xlu1 %3514 }
0x188b   :  { %v3517_v29 = vmul.f32 0.03125, %v3515_v47 }
0x188c   :  { %v3512_v13 = vpop.xlane.xlu0 %3511 }
0x188d   :  { %v3519_v48 = vadd.f32 1e-05, %v3517_v29  ;;  %v3516_v49 = vmul.f32 0.03125, %v3512_v13 }
0x188f   :  { %8635 = vrsqrt.f32 %v3519_v48  ;;  %v3518_v14 = vadd.f32 1e-05, %v3516_v49  ;;  %v7580_v49 = vld [vmem:[%s10311_s29 + $0x1] ss:$0 sm:$0xff]  ;;  %s10325_s29 = smov 64  }
0x1891   :  { %8637 = vrsqrt.f32 %v3518_v14 }
0x189c   :  { %v8636_v25 = vpop.eup %8635 }
0x189d   :  { %v3523_v30 = vmul.f32 %v8636_v25, %v3507_v35  ;;  %v7576_v35 = vld [vmem:[%s10310_s30 + $0x28] sm:$0xff] }
0x189e   :  { %v8638_v50 = vpop.eup %8637 }
0x189f   :  { %v3522_v51 = vmul.f32 %v8638_v50, %v3506_v37  ;;  %v3531_v5 = vmul.f32 %v7565_v0, %v3523_v30 }
0x18a1   :  { %v3530_v3 = vmul.f32 %v7565_v0, %v3522_v51  ;;  %v3539_v52 = vadd.f32 %v7566_v2, %v3531_v5 }
0x18a3   :  { %v3538_v11 = vadd.f32 %v7566_v2, %v3530_v3 }
0x18a5   :  { %8234 = vmatprep.mubr.msk.f32.mxu1 %vm147_vm0, %v3538_v11 }
0x18a6   :  { %8235 = vmatmul.mubr.msk.f32.vlgmr.msra.gmra.mxu1 %vm147_vm0, %v3539_v52 }
0x18a7   :  { %8257 = vmatpush3.msra.mxu1 %v7578_v32 }
0x18a8   :  { %8258 = vmatprep.subr.mxu1 %v7577_v34 }
0x18a9   :  { %8259 = vmatpush3.msra.mxu1 %v7577_v34 }
0x18aa   :  { %8260 = vmatprep.subr.mxu1 %v7576_v35 }
0x18ab   :  { %8261 = vmatpush3.msra.mxu1 %v7576_v35 }
0x18ac   :  { %8262 = vmatprep.subr.mxu1 %v7575_v36 }
0x18ad   :  { %8263 = vmatpush3.msra.mxu1 %v7575_v36 }
0x18ae   :  { %8267 = vmatprep.subr.mxu1 %v8844_v6 }
0x1966   :  { %v8236_v33 = vpop.f32.mrf.mxu1 }
0x1967   :  { %v3629_v57 = vadd.f32 %v8236_v33, %v7567_v8 }
0x1968   :  { %v3623_v62 = vpop.f32.mrf.mxu1 }
0x1969   :  { %v3624_v58 = vadd.f32 %v7567_v8, %v3623_v62  ;;  %v3633_v63 = vmax.f32 %v3629_v57, 0.0 }
0x196b   :  { %v3632_v59 = vmax.f32 %v3624_v58, 0.0  ;;  %v8723_v58 = vld [vmem:[#allocation5] sm:$0xff] }
0x196d   :  { %8253 = vmatprep.mubr.msk.f32.mxu0 %vm3649_vm7, %v3632_v59 }
0x196e   :  { %8254 = vmatmul.mubr.msk.f32.vlgmr.msra.gmra.mxu0 %vm3649_vm7, %v3633_v63 }
0x196f   :  { %8279 = vmatprep.mubr.msk.f32.mxu0 %vm8845_vm1, %v8844_v6 }
0x1a2e   :  { %v8255_v61 = vpop.f32.mrf.mxu0 }
0x1a2f   :  { %v3728_v1 = vadd.f32 %v8255_v61, %v7570_v60 }
0x1a30   :  { %v3722_v4 = vpop.f32.mrf.mxu0 }
0x1a31   :  { %v3732_v7 = vadd.f32 %v3728_v1, %v3539_v52  ;;  %v3723_v9 = vadd.f32 %v7570_v60, %v3722_v4 }
0x1a33   :  { %v3731_v12 = vadd.f32 %v3723_v9, %v3538_v11  ;;  %v3738_v10 = vsel %vm147_vm0, %v3732_v7, 0.0 }
0x1a34   :  { %3739 = vadd.xlane.f32.xlu1 %v3738_v10 }
0x1a35   :  { %v3735_v15 = vsel %vm147_vm0, %v3731_v12, 0.0 }
0x1a36   :  { %3736 = vadd.xlane.f32.xlu0 %v3735_v15 }
0x1abd   :  { %v3740_v16 = vpop.xlane.xlu1 %3739 }
0x1abe   :  { %v3742_v17 = vmul.f32 0.03125, %v3740_v16 }
0x1abf   :  { %v3737_v18 = vpop.xlane.xlu0 %3736 }
0x1ac0   :  { %v3744_v19 = vsub.f32 %v3732_v7, %v3742_v17  ;;  %v3741_v20 = vmul.f32 0.03125, %v3737_v18 }
0x1ac2   :  { %v3743_v21 = vsub.f32 %v3731_v12, %v3741_v20  ;;  %v3746_v22 = vmul.f32 %v3744_v19, %v3744_v19 }
0x1ac4   :  { %v3750_v26 = vsel %vm147_vm0, %v3746_v22, 0.0  ;;  %v3745_v28 = vmul.f32 %v3743_v21, %v3743_v21 }
0x1ac5   :  { %3751 = vadd.xlane.f32.xlu1 %v3750_v26 }
0x1ac6   :  { %v3747_v31 = vsel %vm147_vm0, %v3745_v28, 0.0 }
0x1ac7   :  { %3748 = vadd.xlane.f32.xlu0 %v3747_v31 }
0x1b4e   :  { %v3752_v37 = vpop.xlane.xlu1 %3751 }
0x1b4f   :  { %v3754_v38 = vmul.f32 0.03125, %v3752_v37 }
0x1b50   :  { %v3749_v39 = vpop.xlane.xlu0 %3748 }
0x1b51   :  { %v3756_v40 = vadd.f32 1e-05, %v3754_v38  ;;  %v3753_v24 = vmul.f32 0.03125, %v3749_v39 }
0x1b53   :  { %8639 = vrsqrt.f32 %v3756_v40  ;;  %v3755_v23 = vadd.f32 1e-05, %v3753_v24 }
0x1b55   :  { %8641 = vrsqrt.f32 %v3755_v23 }
0x1b60   :  { %v8640_v41 = vpop.eup %8639 }
0x1b61   :  { %v3760_v43 = vmul.f32 %v8640_v41, %v3744_v19 }
0x1b62   :  { %v8642_v44 = vpop.eup %8641 }
0x1b63   :  { %v3759_v45 = vmul.f32 %v8642_v44, %v3743_v21  ;;  %v3768_v27 = vmul.f32 %v7573_v42, %v3760_v43 }
0x1b65   :  { %v3767_v47 = vmul.f32 %v7573_v42, %v3759_v45  ;;  %v9623_v13 = vadd.f32 %v7574_v46, %v3768_v27 }
0x1b67   :  { %v9621_v29 = vadd.f32 %v7574_v46, %v3767_v47 }
0x1b69   :  { %8264 = vmatprep.mubr.msk.f32.mxu1 %vm147_vm0, %v9621_v29 }
0x1b6a   :  { %8265 = vmatmul.mubr.msk.f32.vlgmr.msra.gmra.mxu1 %vm147_vm0, %v9623_v13 }
0x1b6b   :  { %8269 = vmatprep.mubr.msk.f32.mxu1 %vm8845_vm1, %v8844_v6 }
0x1c2a   :  { %v8266_v48 = vpop.f32.mrf.mxu1 }
0x1c2b   :  { %v9648_v0 = vadd.f32 %v8266_v48, %v7580_v49 }
0x1c2c   :  { %v3862_v14 = vpop.f32.mrf.mxu1 }
0x1c2d   :  { %v9634_v25 = vadd.f32 %v7580_v49, %v3862_v14 }
0x1c2f   :  { %4037 = vrot.lane.b32.xlu1 %v9634_v25, %s10315_s25  ;;  %3872 = vrot.lane.b32.xlu0 %v9634_v25, %s10323_s6 }
0x1c33   :  { %4035 = vrot.lane.b32.xlu1 %v9634_v25, %s10324_s15  ;;  %4202 = vrot.lane.b32.xlu0 %v9634_v25, %s10317_s5 }
0x1c37   :  { %4200 = vrot.lane.b32.xlu1 %v9634_v25, %s10316_s4  ;;  %4367 = vrot.lane.b32.xlu0 %v9634_v25, %s10319_s2 }
0x1c3b   :  { %4365 = vrot.lane.b32.xlu1 %v9634_v25, %s10318_s11  ;;  %4546 = vrot.lane.b32.xlu0 %v9648_v0, %s10323_s6 }
0x1c3f   :  { %4711 = vrot.lane.b32.xlu1 %v9648_v0, %s10315_s25  ;;  %4709 = vrot.lane.b32.xlu0 %v9648_v0, %s10324_s15 }
0x1c43   :  { %4876 = vrot.lane.b32.xlu1 %v9648_v0, %s10317_s5  ;;  %4874 = vrot.lane.b32.xlu0 %v9648_v0, %s10316_s4 }
0x1c47   :  { %5041 = vrot.lane.b32.xlu1 %v9648_v0, %s10319_s2  ;;  %5039 = vrot.lane.b32.xlu0 %v9648_v0, %s10318_s11 }
0x1c4b   :  { %3959 = vrot.lane.b32.xlu1 %v9634_v25, %s10325_s29 }
0x1ca1   :  { %v4038_v30 = vpop.permute.xlu1 %4037  ;;  %v3873_v50 = vpop.permute.xlu0 %3872 }
0x1ca2   :  { %8268 = vmatpush3.xpose.msk.msra.mxu1 %vm232_vm2, %v3873_v50  ;;  %8278 = vmatpush3.xpose.msk.msra.mxu0 %vm232_vm2, %v4038_v30 }
0x1ca3   :  { %8287 = vmatprep.subr.mxu0 %v8844_v6  ;;  %8272 = vmatprep.subr.mxu1 %v8844_v6 }
0x1ca5   :  { %v4036_v51 = vpop.permute.xlu1 %4035  ;;  %8270 = vmatmul.mubr.msk.f32.vlgmr.msra.gmra.mxu1 %vm232_vm2, %v9634_v25  ;;  %v4203_v5 = vpop.permute.xlu0 %4202 }
0x1ca6   :  { %8280 = vmatmul.mubr.msk.f32.vlgmr.msra.gmra.mxu0 %vm232_vm2, %v4036_v51  ;;  %8274 = vmatprep.mubr.msk.f32.mxu1 %vm8845_vm1, %v8844_v6 }
0x1ca7   :  { %8288 = vmatpush3.xpose.msk.msra.mxu0 %vm232_vm2, %v4203_v5  ;;  %8289 = vmatprep.mubr.msk.f32.mxu0 %vm8845_vm1, %v8844_v6 }
0x1ca8   :  { %8297 = vmatprep.subr.mxu0 %v8844_v6 }
0x1ca9   :  { %v4201_v2 = vpop.permute.xlu1 %4200  ;;  %v4368_v3 = vpop.permute.xlu0 %4367 }
0x1caa   :  { %8290 = vmatmul.mubr.msk.f32.vlgmr.msra.gmra.mxu0 %vm232_vm2, %v4201_v2 }
0x1cab   :  { %8298 = vmatpush3.xpose.msk.msra.mxu0 %vm232_vm2, %v4368_v3  ;;  %8299 = vmatprep.mubr.msk.f32.mxu0 %vm8845_vm1, %v8844_v6 }
0x1cac   :  { %8307 = vmatprep.subr.mxu0 %v8844_v6 }
0x1cad   :  { %v4366_v11 = vpop.permute.xlu1 %4365  ;;  %v4547_v52 = vpop.permute.xlu0 %4546 }
0x1cae   :  { %8300 = vmatmul.mubr.msk.f32.vlgmr.msra.gmra.mxu0 %vm232_vm2, %v4366_v11 }
0x1caf   :  { %8308 = vmatpush3.xpose.msk.msra.mxu0 %vm232_vm2, %v4547_v52  ;;  %8309 = vmatprep.mubr.msk.f32.mxu0 %vm8845_vm1, %v8844_v6 }
0x1cb0   :  { %8317 = vmatprep.subr.mxu0 %v8844_v6 }
0x1cb1   :  { %v4712_v53 = vpop.permute.xlu1 %4711  ;;  %v4710_v54 = vpop.permute.xlu0 %4709 }
0x1cb2   :  { %8310 = vmatmul.mubr.msk.f32.vlgmr.msra.gmra.mxu0 %vm232_vm2, %v9648_v0 }
0x1cb3   :  { %8318 = vmatpush3.xpose.msk.msra.mxu0 %vm232_vm2, %v4712_v53  ;;  %8319 = vmatprep.mubr.msk.f32.mxu0 %vm8845_vm1, %v8844_v6 }
0x1cb4   :  { %8327 = vmatprep.subr.mxu0 %v8844_v6 }
0x1cb5   :  { %v4877_v55 = vpop.permute.xlu1 %4876  ;;  %v4875_v56 = vpop.permute.xlu0 %4874 }
0x1cb6   :  { %8320 = vmatmul.mubr.msk.f32.vlgmr.msra.gmra.mxu0 %vm232_vm2, %v4710_v54 }
0x1cb7   :  { %8328 = vmatpush3.xpose.msk.msra.mxu0 %vm232_vm2, %v4877_v55  ;;  %8329 = vmatprep.mubr.msk.f32.mxu0 %vm8845_vm1, %v8844_v6 }
0x1cb8   :  { %8337 = vmatprep.subr.mxu0 %v8844_v6 }
0x1cb9   :  { %v5042_v8 = vpop.permute.xlu1 %5041  ;;  %v5040_v33 = vpop.permute.xlu0 %5039 }
0x1cba   :  { %8330 = vmatmul.mubr.msk.f32.vlgmr.msra.gmra.mxu0 %vm232_vm2, %v4875_v56 }
0x1cbb   :  { %8338 = vmatpush3.xpose.msk.msra.mxu0 %vm232_vm2, %v5042_v8  ;;  %8339 = vmatprep.mubr.msk.f32.mxu0 %vm8845_vm1, %v8844_v6 }
0x1cbd   :  { %v3960_v57 = vpop.permute.xlu1 %3959 }
0x1cbe   :  { %8273 = vmatpush3.msra.mxu1 %v3960_v57  ;;  %8340 = vmatmul.mubr.msk.f32.vlgmr.msra.gmra.mxu0 %vm232_vm2, %v5040_v33 }
0x1cbf   :  { %8282 = vmatprep.subr.mxu1 %v8844_v6 }
0x1d65   :  { %v3944_v62 = vpop.f32.mrf.mxu1 }
0x1d66   :  { %v3945_v59 = vadd.f32 %v8723_v58, %v3944_v62  ;;  %v4109_v63 = vpop.f32.mrf.mxu0 }
0x1d67   :  { %v4110_v60 = vadd.f32 %v8723_v58, %v4109_v63  ;;  %v8271_v61 = vpop.f32.mrf.mxu1 }
0x1d68   :  { %v8281_v1 = vpop.f32.mrf.mxu0  ;;  %v3948_v4 = vsel %vm232_vm2, %v3945_v59, -inf }
0x1d69   :  { %3949 = vmax.xlane.f32.xlu1 %v3948_v4  ;;  %v4113_v7 = vsel %vm232_vm2, %v4110_v60, -inf }
0x1d6a   :  { %4114 = vmax.xlane.f32.xlu0 %v4113_v7  ;;  %v4274_v9 = vpop.f32.mrf.mxu0 }
0x1d6b   :  { %v4275_v12 = vadd.f32 %v8723_v58, %v4274_v9 }
0x1d6c   :  { %v8291_v10 = vpop.f32.mrf.mxu0 }
0x1d6d   :  { %v4278_v15 = vsel %vm232_vm2, %v4275_v12, -inf }
0x1d6e   :  { %4279 = vmax.xlane.f32.xlu0 %v4278_v15  ;;  %v4439_v16 = vpop.f32.mrf.mxu0 }
0x1d6f   :  { %v4440_v17 = vadd.f32 %v8723_v58, %v4439_v16 }
0x1d70   :  { %v8301_v18 = vpop.f32.mrf.mxu0 }
0x1d71   :  { %v4443_v19 = vsel %vm232_vm2, %v4440_v17, -inf }
0x1d72   :  { %4444 = vmax.xlane.f32.xlu1 %v4443_v19  ;;  %v4618_v20 = vpop.f32.mrf.mxu0 }
0x1d73   :  { %v4619_v21 = vadd.f32 %v8723_v58, %v4618_v20 }
0x1d74   :  { %v8311_v22 = vpop.f32.mrf.mxu0 }
0x1d75   :  { %v4622_v26 = vsel %vm232_vm2, %v4619_v21, -inf }
0x1d76   :  { %4623 = vmax.xlane.f32.xlu0 %v4622_v26  ;;  %v4783_v28 = vpop.f32.mrf.mxu0 }
0x1d77   :  { %v4784_v31 = vadd.f32 %v8723_v58, %v4783_v28 }
0x1d78   :  { %v8321_v32 = vpop.f32.mrf.mxu0 }
0x1d79   :  { %v4787_v34 = vsel %vm232_vm2, %v4784_v31, -inf }
0x1d7a   :  { %4788 = vmax.xlane.f32.xlu1 %v4787_v34  ;;  %v4948_v35 = vpop.f32.mrf.mxu0 }
0x1d7b   :  { %v4949_v36 = vadd.f32 %v8723_v58, %v4948_v35 }
0x1d7c   :  { %v8331_v37 = vpop.f32.mrf.mxu0 }
0x1d7d   :  { %v4952_v38 = vsel %vm232_vm2, %v4949_v36, -inf }
0x1d7e   :  { %4953 = vmax.xlane.f32.xlu0 %v4952_v38  ;;  %v5113_v39 = vpop.f32.mrf.mxu0 }
0x1d7f   :  { %v5114_v24 = vadd.f32 %v8723_v58, %v5113_v39 }
0x1d80   :  { %v8341_v40 = vpop.f32.mrf.mxu0 }
0x1d81   :  { %v5117_v23 = vsel %vm232_vm2, %v5114_v24, -inf }
0x1d8b   :  { %4289 = vrot.lane.b32.xlu1 %v9634_v25, %s10326_s16 }
0x1d94   :  { %4124 = vrot.lane.b32.xlu0 %v9634_v25, %s10327_s21 }
0x1daf   :  { %5118 = vmax.xlane.f32.xlu1 %v5117_v23 }
0x1dc0   :  { %4454 = vrot.lane.b32.xlu1 %v9634_v25, %s10328_s22 }
0x1df2   :  { %v3950_v41 = vpop.xlane.xlu1 %3949 }
0x1df3   :  { %v3951_v42 = vsub.f32 %v3945_v59, %v3950_v41  ;;  %v4115_v43 = vpop.xlane.xlu0 %4114 }
0x1df4   :  { %v4116_v44 = vsub.f32 %v4110_v60, %v4115_v43 }
0x1df5   :  { %v3952_v45 = vmul.f32 1.442695, %v3951_v42 }
0x1df6   :  { %v4117_v27 = vmul.f32 1.442695, %v4116_v44 }
0x1df7   :  { %8643 = vpow2.f32 %v3952_v45  ;;  %v4280_v46 = vpop.xlane.xlu0 %4279 }
0x1df8   :  { %8645 = vpow2.f32 %v4117_v27  ;;  %v4281_v47 = vsub.f32 %v4275_v12, %v4280_v46 }
0x1dfa   :  { %v4282_v48 = vmul.f32 1.442695, %v4281_v47 }
0x1dfb   :  { %v4445_v5 = vpop.xlane.xlu1 %4444 }
0x1dfc   :  { %8647 = vpow2.f32 %v4282_v48  ;;  %v4446_v2 = vsub.f32 %v4440_v17, %v4445_v5 }
0x1dfe   :  { %v4447_v53 = vmul.f32 1.442695, %v4446_v2  ;;  %v7610_v2 = vld [vmem:[%s10312_s28 + $0x38] sm:$0xff] }
0x1dff   :  { %v4624_v3 = vpop.xlane.xlu0 %4623  ;;  %8347 = vmatprep.subr.mxu0 %v7610_v2 }
0x1e00   :  { %v4625_v52 = vsub.f32 %v4619_v21, %v4624_v3  ;;  %8649 = vpow2.f32 %v4447_v53  ;;  %v7609_v3 = vld [vmem:[%s10312_s28 + $0x30] sm:$0xff]  ;;  %8348 = vmatpush3.msra.mxu0 %v7610_v2  ;;  %v7607_v53 = vld [vmem:[%s10312_s28 + $0x20] sm:$0xff] }
0x1e01   :  { %8349 = vmatprep.subr.mxu0 %v7609_v3 }
0x1e02   :  { %v4626_v56 = vmul.f32 1.442695, %v4625_v52  ;;  %8350 = vmatpush3.msra.mxu0 %v7609_v3  ;;  %v7608_v52 = vld [vmem:[%s10312_s28 + $0x28] sm:$0xff] }
0x1e03   :  { %v4789_v11 = vpop.xlane.xlu1 %4788  ;;  %8351 = vmatprep.subr.mxu0 %v7608_v52 }
0x1e04   :  { %v8644_v49 = vpop.eup %8643  ;;  %v4790_v54 = vsub.f32 %v4784_v31, %v4789_v11  ;;  %8651 = vpow2.f32 %v4626_v56  ;;  %8352 = vmatpush3.msra.mxu0 %v7608_v52 }
0x1e05   :  { %v9722_v14 = vpop.eup %8645  ;;  %v3954_v30 = vsel %vm232_vm2, %v8644_v49, 0.0  ;;  %8353 = vmatprep.subr.mxu0 %v7607_v53 }
0x1e06   :  { %3955 = vadd.xlane.f32.xlu0 %v3954_v30  ;;  %v4119_v25 = vsel %vm232_vm2, %v9722_v14, 0.0  ;;  %v4791_v8 = vmul.f32 1.442695, %v4790_v54  ;;  %8354 = vmatpush3.msra.mxu0 %v7607_v53 }
0x1e07   :  { %4120 = vadd.xlane.f32.xlu1 %v4119_v25  ;;  %v4954_v55 = vpop.xlane.xlu0 %4953  ;;  %v4290_v62 = vpop.permute.xlu1 %4289 }
0x1e08   :  { %v4955_v33 = vsub.f32 %v4949_v36, %v4954_v55  ;;  %8653 = vpow2.f32 %v4791_v8 }
0x1e09   :  { %v9727_v50 = vpop.eup %8647 }
0x1e0a   :  { %v4284_v51 = vsel %vm232_vm2, %v9727_v50, 0.0  ;;  %v4956_v57 = vmul.f32 1.442695, %v4955_v33 }
0x1e0b   :  { %4285 = vadd.xlane.f32.xlu0 %v4284_v51  ;;  %v4125_v17 = vpop.permute.xlu0 %4124 }
0x1e0c   :  { %8655 = vpow2.f32 %v4956_v57 }
0x1e0d   :  { %v8650_v58 = vpop.eup %8649 }
0x1e0e   :  { %v4449_v1 = vsel %vm232_vm2, %v8650_v58, 0.0 }
0x1e11   :  { %v9735_v60 = vpop.eup %8651 }
0x1e12   :  { %v4628_v9 = vsel %vm232_vm2, %v9735_v60, 0.0 }
0x1e15   :  { %v9738_v4 = vpop.eup %8653 }
0x1e16   :  { %v4793_v7 = vsel %vm232_vm2, %v9738_v4, 0.0 }
0x1e18   :  { %4633 = vrot.lane.b32.xlu1 %v9648_v0, %s10325_s29  ;;  %s10329_s29 = sld [smem:[#allocation23_spill]] }
0x1e19   :  { %v9744_v12 = vpop.eup %8655 }
0x1e1a   :  { %v4958_v10 = vsel %vm232_vm2, %v9744_v12, 0.0 }
0x1e1e   :  { %v7616_v2 = vld [vmem:[%s10329_s29 + $0x1] ss:$0 sm:$0xff]  ;;  %s7467_s29 = sshll.u32 %s8858_s0, 4  ;;  %s7468_s29 = int_to_ptr.vmem [resolvable:$true] %s7467_s29 }
0x1e1f   :  { %p8813_p7 = scmp.lt.s32.totalorder %s7468_s29, %s7468_s29 }
0x1e21   :  { %4798 = vrot.lane.b32.xlu0 %v9648_v0, %s10327_s21 }
0x1e38   :  { %v5119_v59 = vpop.xlane.xlu1 %5118 }
0x1e39   :  { %v5120_v63 = vsub.f32 %v5114_v24, %v5119_v59 }
0x1e3b   :  { %v5121_v61 = vmul.f32 1.442695, %v5120_v63 }
0x1e3c   :  { %4450 = vadd.xlane.f32.xlu1 %v4449_v1  ;;  %v4455_v18 = vpop.permute.xlu1 %4454 }
0x1e3d   :  { %8657 = vpow2.f32 %v5121_v61 }
0x1e40   :  { %4794 = vadd.xlane.f32.xlu1 %v4793_v7  ;;  %4629 = vadd.xlane.f32.xlu0 %v4628_v9 }
0x1e44   :  { %4959 = vadd.xlane.f32.xlu0 %v4958_v10 }
0x1e4a   :  { %v9748_v15 = vpop.eup %8657 }
0x1e4b   :  { %v5123_v16 = vsel %vm232_vm2, %v9748_v15, 0.0 }
0x1e4c   :  { %5124 = vadd.xlane.f32.xlu0 %v5123_v16 }
0x1e51   :  { %4963 = vrot.lane.b32.xlu1 %v9648_v0, %s10326_s16  ;;  %s8808_s16 = scalar_lea.vmem %s7468_s29, 256 }
0x1e52   :  { %p8809_p6 = scmp.ne.s32.totalorder %s7468_s29, %s8808_s16  ;;  %p8814_p8 = scmp.lt.s32.totalorder %s8808_s16, %s8808_s16 }
0x1e54   :  { %p8815_p9 = por %p8814_p8, %p8813_p7 }
0x1e56   :  { %p8816_p10 = pnand %p8815_p9, %p8809_p6 }
0x1e62   :  { %5128 = vrot.lane.b32.xlu0 %v9648_v0, %s10328_s22  ;;  %s10330_s22 = sld [smem:[#allocation24_spill]] }
0x1e8f   :  { %v3956_v19 = vpop.xlane.xlu0 %3955 }
0x1e90   :  { %8659 = vrcp.f32 %v3956_v19  ;;  %v4121_v20 = vpop.xlane.xlu1 %4120  ;;  %v7621_v19 = vld [vmem:[%s10313_s1 + $0x38] sm:$0xff] }
0x1e91   :  { %8661 = vrcp.f32 %v4121_v20  ;;  %v7620_v20 = vld [vmem:[%s10313_s1 + $0x30] sm:$0xff] }
0x1e94   :  { %v4286_v21 = vpop.xlane.xlu0 %4285  ;;  %v4634_v34 = vpop.permute.xlu1 %4633 }
0x1e95   :  { %8663 = vrcp.f32 %v4286_v21  ;;  %v7611_v21 = vld [vmem:[#allocation7 + $0x1] ss:$0 sm:$0xff] }
0x1e98   :  { %v4799_v35 = vpop.permute.xlu0 %4798 }
0x1e9d   :  { %v8660_v22 = vpop.eup %8659 }
0x1e9e   :  { %v3958_v26 = vmul.f32 %v8660_v22, %v8644_v49  ;;  %v8662_v28 = vpop.eup %8661 }
0x1e9f   :  { %v4123_v0 = vmul.f32 %v8662_v28, %v9722_v14 }
0x1ea0   :  { %8275 = vmatmul.mubr.msk.f32.vlgmr.msra.gmra.mxu1 %vm232_vm2, %v3958_v26 }
0x1ea1   :  { %8283 = vmatpush3.msra.mxu1 %v4125_v17  ;;  %8284 = vmatprep.mubr.msk.f32.mxu1 %vm8845_vm1, %v8844_v6 }
0x1ea2   :  { %8292 = vmatprep.subr.mxu1 %v8844_v6  ;;  %v8664_v31 = vpop.eup %8663 }
0x1ea3   :  { %v4288_v32 = vmul.f32 %v8664_v31, %v9727_v50 }
0x1ea4   :  { %8285 = vmatmul.mubr.msk.f32.vlgmr.msra.gmra.mxu1 %vm232_vm2, %v4123_v0 }
0x1ea5   :  { %8293 = vmatpush3.msra.mxu1 %v4290_v62  ;;  %8294 = vmatprep.mubr.msk.f32.mxu1 %vm8845_vm1, %v8844_v6 }
0x1ea6   :  { %8302 = vmatprep.subr.mxu1 %v8844_v6 }
0x1ea8   :  { %8295 = vmatmul.mubr.msk.f32.vlgmr.msra.gmra.mxu1 %vm232_vm2, %v4288_v32 }
0x1ea9   :  { %8303 = vmatpush3.msra.mxu1 %v4455_v18  ;;  %8304 = vmatprep.mubr.msk.f32.mxu1 %vm8845_vm1, %v8844_v6  ;;  %v8724_v18 = vld [vmem:[%s10314_s26] sm:$0xff] }
0x1eaa   :  { %8312 = vmatprep.subr.mxu1 %v8844_v6 }
0x1ec5   :  { %v4451_v36 = vpop.xlane.xlu1 %4450 }
0x1ec6   :  { %8665 = vrcp.f32 %v4451_v36  ;;  %v7619_v36 = vld [vmem:[%s10313_s1 + $0x28] sm:$0xff] }
0x1ec9   :  { %v4630_v37 = vpop.xlane.xlu0 %4629  ;;  %v4795_v38 = vpop.xlane.xlu1 %4794 }
0x1eca   :  { %8667 = vrcp.f32 %v4630_v37 }
0x1ecb   :  { %8669 = vrcp.f32 %v4795_v38 }
0x1ecd   :  { %v4960_v39 = vpop.xlane.xlu0 %4959  ;;  %v4964_v27 = vpop.permute.xlu1 %4963 }
0x1ece   :  { %8671 = vrcp.f32 %v4960_v39 }
0x1ed3   :  { %v8666_v40 = vpop.eup %8665 }
0x1ed4   :  { %v4453_v24 = vmul.f32 %v8666_v40, %v8650_v58 }
0x1ed5   :  { %v5125_v23 = vpop.xlane.xlu0 %5124 }
0x1ed6   :  { %8673 = vrcp.f32 %v5125_v23  ;;  %8305 = vmatmul.mubr.msk.f32.vlgmr.msra.gmra.mxu1 %vm232_vm2, %v4453_v24 }
0x1ed7   :  { %8313 = vmatpush3.msra.mxu1 %v4634_v34  ;;  %8314 = vmatprep.mubr.msk.f32.mxu1 %vm8845_vm1, %v8844_v6  ;;  %v8668_v41 = vpop.eup %8667 }
0x1ed8   :  { %8322 = vmatprep.subr.mxu1 %v8844_v6  ;;  %v4632_v42 = vmul.f32 %v8668_v41, %v9735_v60  ;;  %v8670_v43 = vpop.eup %8669 }
0x1ed9   :  { %v4797_v44 = vmul.f32 %v8670_v43, %v9738_v4  ;;  %v5129_v48 = vpop.permute.xlu0 %5128 }
0x1eda   :  { %8315 = vmatmul.mubr.msk.f32.vlgmr.msra.gmra.mxu1 %vm232_vm2, %v4632_v42 }
0x1edb   :  { %8323 = vmatpush3.msra.mxu1 %v4799_v35  ;;  %8324 = vmatprep.mubr.msk.f32.mxu1 %vm8845_vm1, %v8844_v6  ;;  %v8672_v45 = vpop.eup %8671 }
0x1edc   :  { %8332 = vmatprep.subr.mxu1 %v8844_v6  ;;  %v4962_v46 = vmul.f32 %v8672_v45, %v9744_v12 }
0x1ede   :  { %8325 = vmatmul.mubr.msk.f32.vlgmr.msra.gmra.mxu1 %vm232_vm2, %v4797_v44 }
0x1edf   :  { %8333 = vmatpush3.msra.mxu1 %v4964_v27  ;;  %8334 = vmatprep.mubr.msk.f32.mxu1 %vm8845_vm1, %v8844_v6  ;;  %v9854_v27 = vld [vmem:[%s10242_s8 + $0x1] ss:$0 sm:$0xff] }
0x1ee0   :  { %8342 = vmatprep.subr.mxu1 %v8844_v6 }
0x1ee2   :  { %8335 = vmatmul.mubr.msk.f32.vlgmr.msra.gmra.mxu1 %vm232_vm2, %v4962_v46 }
0x1ee3   :  { %v8674_v47 = vpop.eup %8673  ;;  %8343 = vmatpush3.msra.mxu1 %v5129_v48  ;;  %8344 = vmatprep.mubr.msk.f32.mxu1 %vm8845_vm1, %v8844_v6 }
0x1ee4   :  { %v5127_v49 = vmul.f32 %v8674_v47, %v9748_v15  ;;  %8358 = vmatprep.subr.mxu1 %v7621_v19 }
0x1ee6   :  { %8345 = vmatmul.mubr.msk.f32.vlgmr.msra.gmra.mxu1 %vm232_vm2, %v5127_v49 }
0x1ee7   :  { %8359 = vmatpush3.msra.mxu1 %v7621_v19 }
0x1ee8   :  { %8360 = vmatprep.subr.mxu1 %v7620_v20 }
0x1ee9   :  { %8361 = vmatpush3.msra.mxu1 %v7620_v20 }
0x1eea   :  { %8362 = vmatprep.subr.mxu1 %v7619_v36 }
0x1eeb   :  { %8363 = vmatpush3.msra.mxu1 %v7619_v36 }
0x1f60   :  { %v4031_v14 = vpop.f32.mrf.mxu1 }
0x1f62   :  { %v8276_v30 = vpop.f32.mrf.mxu1 }
0x1f64   :  { %v4196_v25 = vpop.f32.mrf.mxu1 }
0x1f65   :  { %4531 = vrot.lane.b32.xlu1 %v4196_v25, %s10320_s27 }
0x1f66   :  { %v8286_v50 = vpop.f32.mrf.mxu1 }
0x1f68   :  { %v4361_v51 = vpop.f32.mrf.mxu1 }
0x1f69   :  { %4535 = vrot.lane.b32.xlu0 %v4361_v51, %s10321_s7  ;;  %v8725_v51 = vld [vmem:[%s10314_s26 + $0x8] sm:$0xf] }
0x1f6a   :  { %v8296_v5 = vpop.f32.mrf.mxu1 }
0x1f96   :  { %v4526_v11 = vpop.f32.mrf.mxu1 }
0x1f97   :  { %4539 = vrot.lane.b32.xlu0 %v4526_v11, %s10322_s24 }
0x1f98   :  { %v8306_v54 = vpop.f32.mrf.mxu1 }
0x1f99   :  { %v7617_v54 = vld [vmem:[%s10330_s22 + $0x1] ss:$0 sm:$0xff] }
0x1f9a   :  { %v4705_v55 = vpop.f32.mrf.mxu1 }
0x1f9c   :  { %v8316_v56 = vpop.f32.mrf.mxu1 }
0x1f9e   :  { %v4870_v8 = vpop.f32.mrf.mxu1 }
0x1f9f   :  { %5205 = vrot.lane.b32.xlu1 %v4870_v8, %s10320_s27 }
0x1fa0   :  { %v8326_v33 = vpop.f32.mrf.mxu1 }
0x1fa2   :  { %v5035_v57 = vpop.f32.mrf.mxu1 }
0x1fa3   :  { %5209 = vrot.lane.b32.xlu1 %v5035_v57, %s10321_s7 }
0x1fa4   :  { %v8336_v62 = vpop.f32.mrf.mxu1 }
0x1fa6   :  { %v5200_v58 = vpop.f32.mrf.mxu1 }
0x1fa7   :  { %5213 = vrot.lane.b32.xlu0 %v5200_v58, %s10322_s24 }
0x1fa8   :  { %v8346_v59 = vpop.f32.mrf.mxu1 }
0x1fd7   :  { %v4532_v63 = vpop.permute.xlu1 %4531 }
0x1fd8   :  { %v4542_v61 = vsel %vm232_vm2, %v4031_v14, %v4532_v63 }
0x1fdb   :  { %v4536_v60 = vpop.permute.xlu0 %4535 }
0x1fdc   :  { %v4543_v1 = vsel %vm902_vm3, %v4542_v61, %v4536_v60 }
0x2009   :  { %v4540_v4 = vpop.permute.xlu0 %4539 }
0x200a   :  { %v4544_v7 = vsel %vm904_vm4, %v4543_v1, %v4540_v4 }
0x200b   :  { %8355 = vmatprep.mubr.msk.f32.mxu0 %vm147_vm0, %v4544_v7 }
0x2011   :  { %v5206_v9 = vpop.permute.xlu1 %5205 }
0x2012   :  { %v5216_v10 = vsel %vm232_vm2, %v4705_v55, %v5206_v9 }
0x2015   :  { %v5210_v12 = vpop.permute.xlu1 %5209 }
0x2016   :  { %v5217_v15 = vsel %vm902_vm3, %v5216_v10, %v5210_v12 }
0x2019   :  { %v5214_v16 = vpop.permute.xlu0 %5213 }
0x201a   :  { %v5218_v17 = vsel %vm904_vm4, %v5217_v15, %v5214_v16 }
0x201b   :  { %8356 = vmatmul.mubr.msk.f32.vlgmr.msra.gmra.mxu0 %vm147_vm0, %v5218_v17 }
0x201c   :  { %8377 = vmatprep.mubr.msk.f32.mxu0 %vm147_vm0, %v8724_v18 }
0x20db   :  { %v8357_v22 = vpop.f32.mrf.mxu0 }
0x20dc   :  { %v5310_v26 = vadd.f32 %v8357_v22, %v7611_v21 }
0x20dd   :  { %v5304_v28 = vpop.f32.mrf.mxu0 }
0x20de   :  { %v5314_v0 = vadd.f32 %v5310_v26, %v9623_v13  ;;  %v5305_v31 = vadd.f32 %v7611_v21, %v5304_v28 }
0x20e0   :  { %v5313_v32 = vadd.f32 %v5305_v31, %v9621_v29  ;;  %v5322_v34 = vsel %vm147_vm0, %v5314_v0, 0.0  ;;  %v7618_v29 = vld [vmem:[%s10313_s1 + $0x20] sm:$0xff] }
0x20e1   :  { %5323 = vadd.xlane.f32.xlu0 %v5322_v34  ;;  %8364 = vmatprep.subr.mxu1 %v7618_v29 }
0x20e2   :  { %v5319_v35 = vsel %vm147_vm0, %v5313_v32, 0.0  ;;  %8365 = vmatpush3.msra.mxu1 %v7618_v29 }
0x20e3   :  { %5320 = vadd.xlane.f32.xlu1 %v5319_v35  ;;  %8380 = vmatprep.subr.mxu1 %v8844_v6 }
0x20f4   :  { %5463 = vrot.lane.b32.xlu1 %v7620_v20, %s10323_s6 }
0x20f7   :  { %5465 = vrot.lane.b32.xlu0 %v7621_v19, %s10323_s6 }
0x216a   :  { %v5324_v13 = vpop.xlane.xlu0 %5323 }
0x216b   :  { %v5326_v37 = vmul.f32 0.03125, %v5324_v13 }
0x216c   :  { %v5321_v38 = vpop.xlane.xlu1 %5320 }
0x216d   :  { %v5328_v39 = vsub.f32 %v5314_v0, %v5326_v37  ;;  %v5325_v40 = vmul.f32 0.03125, %v5321_v38 }
0x216e   :  { %v9839_v24 = vpop.permute.xlu0 %5465 }
0x216f   :  { %v5327_v23 = vsub.f32 %v5313_v32, %v5325_v40  ;;  %v5330_v41 = vmul.f32 %v5328_v39, %v5328_v39  ;;  %8369 = vmatprep.subr.mxu0 %v9839_v24 }
0x2170   :  { %8370 = vmatpush3.msra.mxu0 %v9839_v24  ;;  %v9843_v42 = vpop.permute.xlu1 %5463 }
0x2171   :  { %v5334_v43 = vsel %vm147_vm0, %v5330_v41, 0.0  ;;  %v5329_v44 = vmul.f32 %v5327_v23, %v5327_v23  ;;  %8371 = vmatprep.subr.mxu0 %v9843_v42 }
0x2172   :  { %5335 = vadd.xlane.f32.xlu1 %v5334_v43  ;;  %8372 = vmatpush3.msra.mxu0 %v9843_v42 }
0x2173   :  { %v5331_v45 = vsel %vm147_vm0, %v5329_v44, 0.0 }
0x2174   :  { %5332 = vadd.xlane.f32.xlu0 %v5331_v45 }
0x2183   :  { %5461 = vrot.lane.b32.xlu1 %v7619_v36, %s10323_s6 }
0x2187   :  { %5471 = vrot.lane.b32.xlu1 %v9854_v27, %s10323_s6 }
0x218a   :  { %5459 = vrot.lane.b32.xlu0 %v7618_v29, %s10323_s6 }
0x21fb   :  { %v5336_v46 = vpop.xlane.xlu1 %5335 }
0x21fc   :  { %v5338_v47 = vmul.f32 0.03125, %v5336_v46 }
0x21fd   :  { %v5333_v48 = vpop.xlane.xlu0 %5332 }
0x21fe   :  { %v5340_v49 = vadd.f32 1e-05, %v5338_v47  ;;  %v5337_v14 = vmul.f32 0.03125, %v5333_v48 }
0x21ff   :  { %v9858_v30 = vpop.permute.xlu1 %5461 }
0x2200   :  { %8675 = vrsqrt.f32 %v5340_v49  ;;  %v5339_v25 = vadd.f32 1e-05, %v5337_v14  ;;  %8373 = vmatprep.subr.mxu0 %v9858_v30 }
0x2201   :  { %v9861_v50 = vpop.permute.xlu0 %5459  ;;  %8374 = vmatpush3.msra.mxu0 %v9858_v30 }
0x2202   :  { %8677 = vrsqrt.f32 %v5339_v25  ;;  %8375 = vmatprep.subr.mxu0 %v9861_v50 }
0x2203   :  { %8376 = vmatpush3.msra.mxu0 %v9861_v50  ;;  %v9889_v33 = vpop.permute.xlu1 %5471 }
0x2204   :  { %8378 = vmatmul.mubr.msk.f32.vlgmr.msra.gmra.mxu0 %vm147_vm0, %v8725_v51  ;;  %8387 = vmatprep.subr.mxu0 %v8844_v6 }
0x2205   :  { %8391 = vmatprep.mubr.msk.f32.mxu0 %vm8845_vm1, %v8844_v6 }
0x220d   :  { %v8676_v5 = vpop.eup %8675 }
0x220e   :  { %v5344_v3 = vmul.f32 %v8676_v5, %v5328_v39 }
0x220f   :  { %v8678_v11 = vpop.eup %8677 }
0x2210   :  { %v5343_v52 = vmul.f32 %v8678_v11, %v5327_v23  ;;  %v5352_v53 = vmul.f32 %v7616_v2, %v5344_v3 }
0x2212   :  { %v5351_v55 = vmul.f32 %v7616_v2, %v5343_v52  ;;  %v9881_v8 = vadd.f32 %v7617_v54, %v5352_v53 }
0x2214   :  { %v9879_v56 = vadd.f32 %v7617_v54, %v5351_v55 }
0x2216   :  { %8366 = vmatprep.mubr.msk.f32.mxu1 %vm147_vm0, %v9879_v56 }
0x2217   :  { %8367 = vmatmul.mubr.msk.f32.vlgmr.msra.gmra.mxu1 %vm147_vm0, %v9881_v8 }
0x2218   :  { %8384 = vmatprep.mubr.msk.f32.mxu1 %vm8845_vm1, %v8844_v6 }
0x22c4   :  { %v8379_v57 = vpop.f32.mrf.mxu0 }
0x22c5   :  { %v9892_v62 = vadd.f32 %v8379_v57, %v9889_v33 }
0x22c6   :  { %v5540_v58 = vpop.f32.mrf.mxu0 }
0x22c7   :  { %5723 = vrot.lane.b32.xlu0 %v9892_v62, %s10324_s15  ;;  %8381 = vmatpush3.xpose.msk.msra.mxu1 %vm232_vm2, %v9892_v62  ;;  %v9899_v59 = vadd.f32 %v5540_v58, %v9889_v33 }
0x22c8   :  { %8382 = vmatprep.subr.mxu1 %v8844_v6 }
0x22c9   :  { %5721 = vrot.lane.b32.xlu1 %v9899_v59, %s10324_s15 }
0x22cb   :  { %8383 = vmatpush3.xpose.msk.msra.mxu1 %vm232_vm2, %v9899_v59 }
0x22cc   :  { %8394 = vmatprep.subr.mxu1 %v8844_v6 }
0x22d7   :  { %v9907_v63 = vpop.f32.mrf.mxu1 }
0x22d9   :  { %v5446_v60 = vpop.f32.mrf.mxu1 }
0x22da   :  { %v9910_v61 = vadd.f32 %v9854_v27, %v5446_v60 }
0x22dc   :  { %5719 = vrot.lane.b32.xlu0 %v9910_v61, %s10324_s15  ;;  %8385 = vmatmul.mubr.msk.f32.vlgmr.msra.gmra.mxu1 %vm232_vm2, %v9910_v61 }
0x22dd   :  { %8398 = vmatprep.mubr.msk.f32.mxu1 %vm8845_vm1, %v8844_v6 }
0x2339   :  { %v5724_v1 = vpop.permute.xlu0 %5723 }
0x233a   :  { %8395 = vmatpush3.xpose.msk.msra.mxu1 %vm232_vm2, %v5724_v1 }
0x233b   :  { %v5722_v4 = vpop.permute.xlu1 %5721  ;;  %8396 = vmatprep.subr.mxu1 %v8844_v6 }
0x233e   :  { %8397 = vmatpush3.xpose.msk.msra.mxu1 %vm232_vm2, %v5722_v4 }
0x233f   :  { %8415 = vmatprep.subr.mxu1 %v8844_v6 }
0x234e   :  { %v5720_v7 = vpop.permute.xlu0 %5719 }
0x234f   :  { %8399 = vmatmul.mubr.msk.f32.vlgmr.msra.gmra.mxu1 %vm232_vm2, %v5720_v7 }
0x2350   :  { %8419 = vmatprep.mubr.msk.f32.mxu1 %vm8845_vm1, %v8844_v6 }
0x239c   :  { %v5624_v9 = vpop.f32.mrf.mxu1 }
0x239d   :  { %v5628_v12 = vsel %vm1990_vm5, %v5624_v9, -inf }
0x239e   :  { %5629 = vmax.xlane.f32.xlu1 %v5628_v12  ;;  %v8386_v10 = vpop.f32.mrf.mxu1 }
0x23af   :  { %5639 = vrot.lane.b32.xlu1 %v9899_v59, %s10323_s6 }
0x23b3   :  { %5814 = vrot.lane.b32.xlu1 %v9892_v62, %s10315_s25 }
0x23b7   :  { %5896 = vrot.lane.b32.xlu1 %v9892_v62, %s10316_s4 }
0x240f   :  { %v5797_v15 = vpop.f32.mrf.mxu1 }
0x2410   :  { %v5801_v16 = vsel %vm1990_vm5, %v5797_v15, -inf }
0x2411   :  { %5802 = vmax.xlane.f32.xlu0 %v5801_v16  ;;  %v8400_v17 = vpop.f32.mrf.mxu1 }
0x2427   :  { %5641 = vrot.lane.b32.xlu0 %v9892_v62, %s10323_s6  ;;  %v5630_v18 = vpop.xlane.xlu1 %5629 }
0x2428   :  { %v5631_v19 = vsub.f32 %v5624_v9, %v5630_v18 }
0x242a   :  { %v5632_v20 = vmul.f32 1.442695, %v5631_v19 }
0x242b   :  { %v5640_v32 = vpop.permute.xlu1 %5639 }
0x242c   :  { %8679 = vpow2.f32 %v5632_v20 }
0x242f   :  { %v5815_v37 = vpop.permute.xlu1 %5814 }
0x2433   :  { %v5897_v39 = vpop.permute.xlu1 %5896 }
0x2439   :  { %v8680_v21 = vpop.eup %8679 }
0x243a   :  { %v5634_v22 = vsel %vm1990_vm5, %v8680_v21, 0.0 }
0x2446   :  { %5635 = vadd.xlane.f32.xlu0 %v5634_v22 }
0x245c   :  { %5812 = vrot.lane.b32.xlu0 %v9899_v59, %s10315_s25 }
0x2460   :  { %5894 = vrot.lane.b32.xlu0 %v9899_v59, %s10316_s4 }
0x249a   :  { %v5803_v26 = vpop.xlane.xlu0 %5802 }
0x249b   :  { %v5804_v28 = vsub.f32 %v5797_v15, %v5803_v26 }
0x249d   :  { %v5805_v0 = vmul.f32 1.442695, %v5804_v28 }
0x249e   :  { %v5642_v31 = vpop.permute.xlu0 %5641 }
0x249f   :  { %8681 = vpow2.f32 %v5805_v0  ;;  %8388 = vmatpush3.msk.msra.mxu0 %vm2010_vm6, %v5642_v31  ;;  %v10036_v31 = vadd.f32 %v9907_v63, %v9854_v27 }
0x24a0   :  { %8389 = vmatprep.subr.mxu0 %v8844_v6 }
0x24a1   :  { %8390 = vmatpush3.msra.mxu0 %v5640_v32 }
0x24a2   :  { %8401 = vmatprep.subr.mxu0 %v8844_v6 }
0x24ac   :  { %v8682_v34 = vpop.eup %8681 }
0x24ad   :  { %v5807_v35 = vsel %vm1990_vm5, %v8682_v34, 0.0 }
0x24ae   :  { %5808 = vadd.xlane.f32.xlu1 %v5807_v35 }
0x24bf   :  { %5892 = vrot.lane.b32.xlu1 %v9910_v61, %s10316_s4 }
0x24c3   :  { %5985 = vrot.lane.b32.xlu1 %v9899_v59, %s10317_s5 }
0x24cf   :  { %v5636_v36 = vpop.xlane.xlu0 %5635 }
0x24d0   :  { %8683 = vrcp.f32 %v5636_v36 }
0x24d3   :  { %v5813_v38 = vpop.permute.xlu0 %5812 }
0x24d7   :  { %v5895_v43 = vpop.permute.xlu0 %5894 }
0x24dd   :  { %v8684_v29 = vpop.eup %8683 }
0x24de   :  { %v5638_v13 = vmul.f32 %v8684_v29, %v8680_v21 }
0x24e0   :  { %8392 = vmatmul.mubr.msk.f32.vlgmr.msra.gmra.mxu0 %vm1990_vm5, %v5638_v13 }
0x24e1   :  { %8402 = vmatpush3.msk.msra.mxu0 %vm2010_vm6, %v5815_v37  ;;  %8405 = vmatprep.mubr.msk.f32.mxu0 %vm8845_vm1, %v8844_v6 }
0x24e2   :  { %8403 = vmatprep.subr.mxu0 %v8844_v6 }
0x24e3   :  { %8404 = vmatpush3.msra.mxu0 %v5813_v38 }
0x24e4   :  { %8408 = vmatprep.subr.mxu0 %v8844_v6 }
0x2537   :  { %v5809_v40 = vpop.xlane.xlu1 %5808 }
0x2538   :  { %8685 = vrcp.f32 %v5809_v40 }
0x253b   :  { %v5893_v44 = vpop.permute.xlu1 %5892 }
0x253f   :  { %v5986_v11 = vpop.permute.xlu1 %5985 }
0x2545   :  { %v8686_v23 = vpop.eup %8685 }
0x2546   :  { %v5811_v41 = vmul.f32 %v8686_v23, %v8682_v34 }
0x2548   :  { %8406 = vmatmul.mubr.msk.f32.vlgmr.msra.gmra.mxu0 %vm1990_vm5, %v5811_v41 }
0x2549   :  { %8409 = vmatpush3.xpose.msk.msra.mxu0 %vm232_vm2, %v5897_v39  ;;  %8412 = vmatprep.mubr.msk.f32.mxu0 %vm8845_vm1, %v8844_v6 }
0x254a   :  { %8410 = vmatprep.subr.mxu0 %v8844_v6 }
0x254d   :  { %8411 = vmatpush3.xpose.msk.msra.mxu0 %vm232_vm2, %v5895_v43 }
0x254e   :  { %8429 = vmatprep.subr.mxu0 %v8844_v6 }
0x2550   :  { %8413 = vmatmul.mubr.msk.f32.vlgmr.msra.gmra.mxu0 %vm232_vm2, %v5893_v44 }
0x2551   :  { %8433 = vmatprep.mubr.msk.f32.mxu0 %vm8845_vm1, %v8844_v6 }
0x25a0   :  { %v9964_v45 = vpop.f32.mrf.mxu0 }
0x25a2   :  { %v8393_v46 = vpop.f32.mrf.mxu0 }
0x2608   :  { %v9966_v47 = vpop.f32.mrf.mxu0 }
0x260a   :  { %v8407_v48 = vpop.f32.mrf.mxu0 }
0x2610   :  { %v5970_v49 = vpop.f32.mrf.mxu0 }
0x2611   :  { %v5974_v14 = vsel %vm1990_vm5, %v5970_v49, -inf }
0x2612   :  { %5975 = vmax.xlane.f32.xlu0 %v5974_v14  ;;  %v8414_v25 = vpop.f32.mrf.mxu0 }
0x2628   :  { %5987 = vrot.lane.b32.xlu0 %v9892_v62, %s10317_s5 }
0x262c   :  { %6069 = vrot.lane.b32.xlu0 %v9892_v62, %s10318_s11 }
0x2630   :  { %6065 = vrot.lane.b32.xlu0 %v9910_v61, %s10318_s11 }
0x269b   :  { %v5976_v51 = vpop.xlane.xlu0 %5975 }
0x269c   :  { %v5977_v5 = vsub.f32 %v5970_v49, %v5976_v51 }
0x269e   :  { %v5978_v2 = vmul.f32 1.442695, %v5977_v5 }
0x269f   :  { %v5988_v3 = vpop.permute.xlu0 %5987 }
0x26a0   :  { %8687 = vpow2.f32 %v5978_v2  ;;  %8416 = vmatpush3.msk.msra.mxu1 %vm2010_vm6, %v5988_v3 }
0x26a1   :  { %8417 = vmatprep.subr.mxu1 %v8844_v6 }
0x26a2   :  { %8418 = vmatpush3.msra.mxu1 %v5986_v11 }
0x26a3   :  { %8422 = vmatprep.subr.mxu1 %v8844_v6  ;;  %v6070_v58 = vpop.permute.xlu0 %6069 }
0x26a7   :  { %v6066_v61 = vpop.permute.xlu0 %6065 }
0x26ad   :  { %v8688_v52 = vpop.eup %8687 }
0x26ae   :  { %v5980_v53 = vsel %vm1990_vm5, %v8688_v52, 0.0 }
0x26af   :  { %5981 = vadd.xlane.f32.xlu1 %v5980_v53 }
0x26c0   :  { %6067 = vrot.lane.b32.xlu1 %v9899_v59, %s10318_s11 }
0x2738   :  { %v5982_v54 = vpop.xlane.xlu1 %5981 }
0x2739   :  { %8689 = vrcp.f32 %v5982_v54 }
0x273c   :  { %v6068_v60 = vpop.permute.xlu1 %6067 }
0x2746   :  { %v8690_v55 = vpop.eup %8689 }
0x2747   :  { %v5984_v57 = vmul.f32 %v8690_v55, %v8688_v52 }
0x2749   :  { %8420 = vmatmul.mubr.msk.f32.vlgmr.msra.gmra.mxu1 %vm1990_vm5, %v5984_v57 }
0x274a   :  { %8423 = vmatpush3.xpose.msk.msra.mxu1 %vm232_vm2, %v6070_v58  ;;  %8426 = vmatprep.mubr.msk.f32.mxu1 %vm8845_vm1, %v8844_v6 }
0x274b   :  { %8424 = vmatprep.subr.mxu1 %v8844_v6 }
0x274e   :  { %8425 = vmatpush3.xpose.msk.msra.mxu1 %vm232_vm2, %v6068_v60 }
0x274f   :  { %8447 = vmatprep.subr.mxu1 %v8844_v6 }
0x2751   :  { %8427 = vmatmul.mubr.msk.f32.vlgmr.msra.gmra.mxu1 %vm232_vm2, %v6066_v61 }
0x2752   :  { %8451 = vmatprep.mubr.msk.f32.mxu1 %vm8845_vm1, %v8844_v6 }
0x2809   :  { %v9991_v1 = vpop.f32.mrf.mxu1 }
0x280b   :  { %v8421_v4 = vpop.f32.mrf.mxu1 }
0x2811   :  { %v6143_v7 = vpop.f32.mrf.mxu1 }
0x2812   :  { %v6147_v9 = vsel %vm1990_vm5, %v6143_v7, -inf }
0x2813   :  { %6148 = vmax.xlane.f32.xlu1 %v6147_v9  ;;  %v8428_v12 = vpop.f32.mrf.mxu1 }
0x2824   :  { %6158 = vrot.lane.b32.xlu1 %v9899_v59, %s10319_s2 }
0x289c   :  { %v6149_v10 = vpop.xlane.xlu1 %6148 }
0x289d   :  { %v6150_v15 = vsub.f32 %v6143_v7, %v6149_v10 }
0x289f   :  { %v6151_v16 = vmul.f32 1.442695, %v6150_v15 }
0x28a0   :  { %v6159_v21 = vpop.permute.xlu1 %6158 }
0x28a1   :  { %8691 = vpow2.f32 %v6151_v16 }
0x28ae   :  { %v8692_v17 = vpop.eup %8691 }
0x28af   :  { %v6153_v18 = vsel %vm1990_vm5, %v8692_v17, 0.0 }
0x28b0   :  { %6154 = vadd.xlane.f32.xlu0 %v6153_v18 }
0x28c6   :  { %6160 = vrot.lane.b32.xlu0 %v9892_v62, %s10319_s2  ;;  %v8726_v62 = vld [vmem:[%s10314_s26 + $0x10] sm:$0xff] }
0x2939   :  { %v6155_v19 = vpop.xlane.xlu0 %6154 }
0x293a   :  { %8693 = vrcp.f32 %v6155_v19 }
0x293d   :  { %v6161_v20 = vpop.permute.xlu0 %6160 }
0x293e   :  { %8430 = vmatpush3.msk.msra.mxu0 %vm2010_vm6, %v6161_v20 }
0x293f   :  { %8431 = vmatprep.subr.mxu0 %v8844_v6 }
0x2940   :  { %8432 = vmatpush3.msra.mxu0 %v6159_v21 }
0x2941   :  { %8436 = vmatprep.subr.mxu0 %v9839_v24 }
0x2947   :  { %v8694_v59 = vpop.eup %8693 }
0x2948   :  { %v6157_v22 = vmul.f32 %v8694_v59, %v8692_v17 }
0x294a   :  { %8434 = vmatmul.mubr.msk.f32.vlgmr.msra.gmra.mxu0 %vm1990_vm5, %v6157_v22 }
0x294b   :  { %8437 = vmatpush3.msra.mxu0 %v9839_v24  ;;  %8444 = vmatprep.mubr.msk.f32.mxu0 %vm147_vm0, %v8726_v62  ;;  %v8727_v24 = vld [vmem:[%s10314_s26 + $0x18] sm:$0xf] }
0x294c   :  { %8438 = vmatprep.subr.mxu0 %v9843_v42 }
0x294d   :  { %8439 = vmatpush3.msra.mxu0 %v9843_v42 }
0x294e   :  { %8440 = vmatprep.subr.mxu0 %v9858_v30 }
0x294f   :  { %8441 = vmatpush3.msra.mxu0 %v9858_v30 }
0x2950   :  { %8442 = vmatprep.subr.mxu0 %v9861_v50 }
0x2951   :  { %8443 = vmatpush3.msra.mxu0 %v9861_v50 }
0x2952   :  { %8445 = vmatmul.mubr.msk.f32.vlgmr.msra.gmra.mxu0 %vm147_vm0, %v8727_v24  ;;  %8454 = vmatprep.subr.mxu0 %v8844_v6 }
0x2953   :  { %8458 = vmatprep.mubr.msk.f32.mxu0 %vm8845_vm1, %v8844_v6 }
0x2a0a   :  { %v10021_v42 = vpop.f32.mrf.mxu0 }
0x2a0c   :  { %v8435_v26 = vpop.f32.mrf.mxu0 }
0x2a12   :  { %v8446_v28 = vpop.f32.mrf.mxu0 }
0x2a13   :  { %v10024_v30 = vadd.f32 %v8446_v28, %v9889_v33 }
0x2a14   :  { %v6319_v0 = vpop.f32.mrf.mxu0 }
0x2a15   :  { %v10027_v50 = vadd.f32 %v6319_v0, %v9889_v33  ;;  %6502 = vrot.lane.b32.xlu1 %v10024_v30, %s10324_s15  ;;  %8448 = vmatpush3.xpose.msk.msra.mxu1 %vm232_vm2, %v10024_v30 }
0x2a16   :  { %8449 = vmatprep.subr.mxu1 %v8844_v6 }
0x2a17   :  { %6500 = vrot.lane.b32.xlu0 %v10027_v50, %s10324_s15 }
0x2a19   :  { %6498 = vrot.lane.b32.xlu1 %v10036_v31, %s10324_s15  ;;  %8450 = vmatpush3.xpose.msk.msra.mxu1 %vm232_vm2, %v10027_v50 }
0x2a1a   :  { %8461 = vmatprep.subr.mxu1 %v8844_v6 }
0x2a1c   :  { %8452 = vmatmul.mubr.msk.f32.vlgmr.msra.gmra.mxu1 %vm232_vm2, %v10036_v31 }
0x2a1d   :  { %8465 = vmatprep.mubr.msk.f32.mxu1 %vm8845_vm1, %v8844_v6 }
0x2a87   :  { %v6503_v33 = vpop.permute.xlu1 %6502 }
0x2a88   :  { %8462 = vmatpush3.xpose.msk.msra.mxu1 %vm232_vm2, %v6503_v33 }
0x2a89   :  { %8463 = vmatprep.subr.mxu1 %v8844_v6  ;;  %v6501_v27 = vpop.permute.xlu0 %6500 }
0x2a8b   :  { %v6499_v63 = vpop.permute.xlu1 %6498 }
0x2a8c   :  { %8464 = vmatpush3.xpose.msk.msra.mxu1 %vm232_vm2, %v6501_v27 }
0x2a8d   :  { %8482 = vmatprep.subr.mxu1 %v8844_v6 }
0x2a8f   :  { %8466 = vmatmul.mubr.msk.f32.vlgmr.msra.gmra.mxu1 %vm232_vm2, %v6499_v63 }
0x2a90   :  { %8486 = vmatprep.mubr.msk.f32.mxu1 %vm8845_vm1, %v8844_v6 }
0x2adc   :  { %v6403_v32 = vpop.f32.mrf.mxu1 }
0x2add   :  { %v6407_v34 = vsel %vm1990_vm5, %v6403_v32, -inf }
0x2ade   :  { %6408 = vmax.xlane.f32.xlu0 %v6407_v34  ;;  %v8453_v35 = vpop.f32.mrf.mxu1 }
0x2af4   :  { %6418 = vrot.lane.b32.xlu0 %v10027_v50, %s10323_s6 }
0x2b4f   :  { %v6576_v36 = vpop.f32.mrf.mxu1 }
0x2b50   :  { %v6580_v29 = vsel %vm1990_vm5, %v6576_v36, -inf }
0x2b51   :  { %6581 = vmax.xlane.f32.xlu1 %v6580_v29  ;;  %v8467_v13 = vpop.f32.mrf.mxu1 }
0x2b62   :  { %6420 = vrot.lane.b32.xlu1 %v10024_v30, %s10323_s6 }
0x2b66   :  { %6593 = vrot.lane.b32.xlu1 %v10024_v30, %s10315_s25 }
0x2b67   :  { %v6409_v37 = vpop.xlane.xlu0 %6408 }
0x2b68   :  { %v6410_v38 = vsub.f32 %v6403_v32, %v6409_v37 }
0x2b6a   :  { %v6411_v39 = vmul.f32 1.442695, %v6410_v38  ;;  %6591 = vrot.lane.b32.xlu1 %v10027_v50, %s10315_s25 }
0x2b6b   :  { %v6419_v48 = vpop.permute.xlu0 %6418 }
0x2b6c   :  { %8695 = vpow2.f32 %v6411_v39 }
0x2b6e   :  { %6673 = vrot.lane.b32.xlu1 %v10027_v50, %s10316_s4 }
0x2b79   :  { %v8696_v40 = vpop.eup %8695 }
0x2b7a   :  { %v6413_v23 = vsel %vm1990_vm5, %v8696_v40, 0.0 }
0x2b7b   :  { %6414 = vadd.xlane.f32.xlu0 %v6413_v23 }
0x2bda   :  { %v6582_v41 = vpop.xlane.xlu1 %6581 }
0x2bdb   :  { %v6583_v43 = vsub.f32 %v6576_v36, %v6582_v41  ;;  %v7670_v41 = vld [vmem:[%s10243_s9 + $0x20] sm:$0xff] }
0x2bdd   :  { %v6584_v44 = vmul.f32 1.442695, %v6583_v43 }
0x2bde   :  { %v6421_v46 = vpop.permute.xlu1 %6420 }
0x2bdf   :  { %8697 = vpow2.f32 %v6584_v44  ;;  %8455 = vmatpush3.msk.msra.mxu0 %vm2010_vm6, %v6421_v46 }
0x2be0   :  { %8456 = vmatprep.subr.mxu0 %v8844_v6 }
0x2be1   :  { %8457 = vmatpush3.msra.mxu0 %v6419_v48 }
0x2be2   :  { %8468 = vmatprep.subr.mxu0 %v8844_v6  ;;  %v6594_v51 = vpop.permute.xlu1 %6593 }
0x2be6   :  { %v6592_v3 = vpop.permute.xlu1 %6591 }
0x2bea   :  { %v6674_v55 = vpop.permute.xlu1 %6673 }
0x2bec   :  { %v8698_v49 = vpop.eup %8697 }
0x2bed   :  { %v6586_v14 = vsel %vm1990_vm5, %v8698_v49, 0.0 }
0x2bee   :  { %6587 = vadd.xlane.f32.xlu0 %v6586_v14 }
0x2c04   :  { %v6415_v25 = vpop.xlane.xlu0 %6414  ;;  %6675 = vrot.lane.b32.xlu0 %v10024_v30, %s10316_s4 }
0x2c05   :  { %8699 = vrcp.f32 %v6415_v25 }
0x2c08   :  { %6671 = vrot.lane.b32.xlu0 %v10036_v31, %s10316_s4 }
0x2c12   :  { %v8700_v5 = vpop.eup %8699 }
0x2c13   :  { %v6417_v2 = vmul.f32 %v8700_v5, %v8696_v40  ;;  %v7675_v5 = vld [vmem:[%s10244_s10 + $0x1] ss:$0 sm:$0xff]  ;;  %s10331_s10 = sld [smem:[#allocation25_spill]] }
0x2c15   :  { %8459 = vmatmul.mubr.msk.f32.vlgmr.msra.gmra.mxu0 %vm1990_vm5, %v6417_v2 }
0x2c16   :  { %8469 = vmatpush3.msk.msra.mxu0 %vm2010_vm6, %v6594_v51  ;;  %8472 = vmatprep.mubr.msk.f32.mxu0 %vm8845_vm1, %v8844_v6 }
0x2c17   :  { %8470 = vmatprep.subr.mxu0 %v8844_v6 }
0x2c18   :  { %8471 = vmatpush3.msra.mxu0 %v6592_v3 }
0x2c19   :  { %8475 = vmatprep.subr.mxu0 %v8844_v6 }
0x2c77   :  { %v6588_v11 = vpop.xlane.xlu0 %6587 }
0x2c78   :  { %8701 = vrcp.f32 %v6588_v11 }
0x2c7b   :  { %v6676_v54 = vpop.permute.xlu0 %6675 }
0x2c7f   :  { %v6672_v57 = vpop.permute.xlu0 %6671 }
0x2c85   :  { %v8702_v52 = vpop.eup %8701 }
0x2c86   :  { %v6590_v53 = vmul.f32 %v8702_v52, %v8698_v49 }
0x2c88   :  { %8473 = vmatmul.mubr.msk.f32.vlgmr.msra.gmra.mxu0 %vm1990_vm5, %v6590_v53 }
0x2c89   :  { %8476 = vmatpush3.xpose.msk.msra.mxu0 %vm232_vm2, %v6676_v54  ;;  %8479 = vmatprep.mubr.msk.f32.mxu0 %vm8845_vm1, %v8844_v6 }
0x2c8a   :  { %8477 = vmatprep.subr.mxu0 %v8844_v6 }
0x2c8d   :  { %8478 = vmatpush3.xpose.msk.msra.mxu0 %vm232_vm2, %v6674_v55 }
0x2c8e   :  { %8496 = vmatprep.subr.mxu0 %v8844_v6 }
0x2c90   :  { %8480 = vmatmul.mubr.msk.f32.vlgmr.msra.gmra.mxu0 %vm232_vm2, %v6672_v57 }
0x2c91   :  { %8500 = vmatprep.mubr.msk.f32.mxu0 %vm8845_vm1, %v8844_v6 }
0x2cd5   :  { %v10093_v58 = vpop.f32.mrf.mxu0 }
0x2cd7   :  { %v8460_v60 = vpop.f32.mrf.mxu0 }
0x2d48   :  { %v6667_v61 = vpop.f32.mrf.mxu0 }
0x2d4a   :  { %v8474_v4 = vpop.f32.mrf.mxu0 }
0x2d50   :  { %v6749_v7 = vpop.f32.mrf.mxu0 }
0x2d51   :  { %v6753_v9 = vsel %vm1990_vm5, %v6749_v7, -inf }
0x2d52   :  { %6754 = vmax.xlane.f32.xlu1 %v6753_v9  ;;  %v8481_v12 = vpop.f32.mrf.mxu0 }
0x2d63   :  { %6764 = vrot.lane.b32.xlu1 %v10027_v50, %s10317_s5 }
0x2d67   :  { %6848 = vrot.lane.b32.xlu1 %v10024_v30, %s10318_s11 }
0x2d6b   :  { %6844 = vrot.lane.b32.xlu1 %v10036_v31, %s10318_s11 }
0x2ddb   :  { %v6755_v10 = vpop.xlane.xlu1 %6754 }
0x2ddc   :  { %v6756_v15 = vsub.f32 %v6749_v7, %v6755_v10 }
0x2dde   :  { %v6757_v16 = vmul.f32 1.442695, %v6756_v15 }
0x2ddf   :  { %v6765_v21 = vpop.permute.xlu1 %6764 }
0x2de0   :  { %8703 = vpow2.f32 %v6757_v16  ;;  %v7177_v16 = vld [vmem:[#allocation8 + $0x30] sm:$0xff] }
0x2de3   :  { %v6849_v62 = vpop.permute.xlu1 %6848 }
0x2de7   :  { %v6845_v26 = vpop.permute.xlu1 %6844 }
0x2ded   :  { %v8704_v17 = vpop.eup %8703 }
0x2dee   :  { %v6759_v18 = vsel %vm1990_vm5, %v8704_v17, 0.0 }
0x2def   :  { %6760 = vadd.xlane.f32.xlu0 %v6759_v18  ;;  %v7175_v18 = vld [vmem:[#allocation8 + $0x20] sm:$0xff] }
0x2e05   :  { %6766 = vrot.lane.b32.xlu0 %v10024_v30, %s10317_s5 }
0x2e09   :  { %6846 = vrot.lane.b32.xlu0 %v10027_v50, %s10318_s11 }
0x2e78   :  { %v6761_v19 = vpop.xlane.xlu0 %6760 }
0x2e79   :  { %8705 = vrcp.f32 %v6761_v19  ;;  %v7693_v19 = vld [vmem:[%s10247_s13 + $0x78] sm:$0xff] }
0x2e7c   :  { %v6767_v20 = vpop.permute.xlu0 %6766 }
0x2e7d   :  { %8483 = vmatpush3.msk.msra.mxu1 %vm2010_vm6, %v6767_v20  ;;  %v7692_v20 = vld [vmem:[%s10247_s13 + $0x70] sm:$0xff] }
0x2e7e   :  { %8484 = vmatprep.subr.mxu1 %v8844_v6 }
0x2e7f   :  { %8485 = vmatpush3.msra.mxu1 %v6765_v21  ;;  %v7691_v21 = vld [vmem:[%s10247_s13 + $0x68] sm:$0xff] }
0x2e80   :  { %8489 = vmatprep.subr.mxu1 %v8844_v6  ;;  %v6847_v24 = vpop.permute.xlu0 %6846 }
0x2e86   :  { %v8706_v59 = vpop.eup %8705 }
0x2e87   :  { %v6763_v22 = vmul.f32 %v8706_v59, %v8704_v17  ;;  %v7176_v17 = vld [vmem:[#allocation8 + $0x28] sm:$0xff] }
0x2e88   :  { %v7690_v59 = vld [vmem:[%s10247_s13 + $0x60] sm:$0xff] }
0x2e89   :  { %8487 = vmatmul.mubr.msk.f32.vlgmr.msra.gmra.mxu1 %vm1990_vm5, %v6763_v22 }
0x2e8a   :  { %8490 = vmatpush3.xpose.msk.msra.mxu1 %vm232_vm2, %v6849_v62  ;;  %8493 = vmatprep.mubr.msk.f32.mxu1 %vm8845_vm1, %v8844_v6 }
0x2e8b   :  { %8491 = vmatprep.subr.mxu1 %v8844_v6 }
0x2e8e   :  { %8492 = vmatpush3.xpose.msk.msra.mxu1 %vm232_vm2, %v6847_v24 }
0x2e91   :  { %8494 = vmatmul.mubr.msk.f32.vlgmr.msra.gmra.mxu1 %vm232_vm2, %v6845_v26 }
0x2f49   :  { %v6840_v28 = vpop.f32.mrf.mxu1 }
0x2f4b   :  { %v8488_v0 = vpop.f32.mrf.mxu1 }
0x2f51   :  { %v6922_v31 = vpop.f32.mrf.mxu1 }
0x2f52   :  { %v6926_v33 = vsel %vm1990_vm5, %v6922_v31, -inf }
0x2f53   :  { %6927 = vmax.xlane.f32.xlu0 %v6926_v33  ;;  %v8495_v27 = vpop.f32.mrf.mxu1  ;;  %v7680_v33 = vld [vmem:[%s10251_s17 + $0x1] ss:$0 sm:$0xff] }
0x2f69   :  { %6939 = vrot.lane.b32.xlu0 %v10024_v30, %s10319_s2 }
0x2f6d   :  { %6239 = vrot.lane.b32.xlu0 %v9966_v47, %s10320_s27 }
0x2f71   :  { %7018 = vrot.lane.b32.xlu0 %v6667_v61, %s10320_s27 }
0x2f75   :  { %7022 = vrot.lane.b32.xlu0 %v6840_v28, %s10321_s7 }
0x2fdc   :  { %v6928_v63 = vpop.xlane.xlu0 %6927 }
0x2fdd   :  { %v6929_v32 = vsub.f32 %v6922_v31, %v6928_v63  ;;  %v7681_v63 = vld [vmem:[%s10252_s18 + $0x1] ss:$0 sm:$0xff] }
0x2fdf   :  { %v6930_v34 = vmul.f32 1.442695, %v6929_v32 }
0x2fe0   :  { %v6940_v35 = vpop.permute.xlu0 %6939 }
0x2fe1   :  { %8707 = vpow2.f32 %v6930_v34  ;;  %8497 = vmatpush3.msk.msra.mxu0 %vm2010_vm6, %v6940_v35 }
0x2fe2   :  { %8498 = vmatprep.subr.mxu0 %v8844_v6 }
0x2fe4   :  { %v6240_v37 = vpop.permute.xlu0 %6239 }
0x2fe5   :  { %v6250_v39 = vsel %vm232_vm2, %v9964_v45, %v6240_v37  ;;  %v7671_v45 = vld [vmem:[%s10243_s9 + $0x28] sm:$0xff] }
0x2fe6   :  { %v7687_v37 = vld [vmem:[%s10247_s13 + $0x48] sm:$0xff] }
0x2fe8   :  { %v7019_v46 = vpop.permute.xlu0 %7018 }
0x2fe9   :  { %v7029_v49 = vsel %vm232_vm2, %v10093_v58, %v7019_v46 }
0x2fec   :  { %v7023_v48 = vpop.permute.xlu0 %7022 }
0x2fed   :  { %v7030_v14 = vsel %vm902_vm3, %v7029_v49, %v7023_v48 }
0x2fee   :  { %v8708_v36 = vpop.eup %8707 }
0x2fef   :  { %v6932_v29 = vsel %vm1990_vm5, %v8708_v36, 0.0 }
0x2ff0   :  { %6933 = vadd.xlane.f32.xlu1 %v6932_v29 }
0x3001   :  { %6937 = vrot.lane.b32.xlu1 %v10027_v50, %s10319_s2 }
0x3005   :  { %6243 = vrot.lane.b32.xlu1 %v9991_v1, %s10321_s7  ;;  %v7673_v1 = vld [vmem:[%s10243_s9 + $0x38] sm:$0xff] }
0x3009   :  { %6247 = vrot.lane.b32.xlu1 %v10021_v42, %s10322_s24  ;;  %v7672_v42 = vld [vmem:[%s10243_s9 + $0x30] sm:$0xff] }
0x3079   :  { %v6934_v47 = vpop.xlane.xlu1 %6933 }
0x307a   :  { %8709 = vrcp.f32 %v6934_v47 }
0x307d   :  { %v6938_v30 = vpop.permute.xlu1 %6937 }
0x307e   :  { %8499 = vmatpush3.msra.mxu0 %v6938_v30  ;;  %v7689_v30 = vld [vmem:[%s10247_s13 + $0x58] sm:$0xff] }
0x307f   :  { %8503 = vmatprep.subr.mxu0 %v7673_v1 }
0x3081   :  { %v6244_v13 = vpop.permute.xlu1 %6243 }
0x3082   :  { %v6251_v50 = vsel %vm902_vm3, %v6250_v39, %v6244_v13  ;;  %v7688_v13 = vld [vmem:[%s10247_s13 + $0x50] sm:$0xff] }
0x3085   :  { %v6248_v38 = vpop.permute.xlu1 %6247 }
0x3086   :  { %v6252_v23 = vsel %vm904_vm4, %v6251_v50, %v6248_v38  ;;  %v7683_v38 = vld [vmem:[%s10246_s12 + $0x1] ss:$0 sm:$0xff] }
0x3087   :  { %v8710_v6 = vpop.eup %8709 }
0x3088   :  { %v6936_v40 = vmul.f32 %v8710_v6, %v8708_v36  ;;  %v7686_v6 = vld [vmem:[%s10247_s13 + $0x40] sm:$0xff] }
0x308a   :  { %8501 = vmatmul.mubr.msk.f32.vlgmr.msra.gmra.mxu0 %vm1990_vm5, %v6936_v40 }
0x308b   :  { %8511 = vmatprep.mubr.msk.f32.mxu0 %vm147_vm0, %v6252_v23  ;;  %8504 = vmatpush3.msra.mxu0 %v7673_v1 }
0x308c   :  { %8505 = vmatprep.subr.mxu0 %v7672_v42 }
0x308d   :  { %8506 = vmatpush3.msra.mxu0 %v7672_v42 }
0x308e   :  { %8507 = vmatprep.subr.mxu0 %v7671_v45 }
0x308f   :  { %8508 = vmatpush3.msra.mxu0 %v7671_v45  ;;  %v7695_v45 = vld [vmem:[%s10248_s14 + $0x1] ss:$0 sm:$0xff] }
0x3090   :  { %8509 = vmatprep.subr.mxu0 %v7670_v41 }
0x3091   :  { %8510 = vmatpush3.msra.mxu0 %v7670_v41 }
0x3092   :  { %8525 = vmatprep.subr.mxu0 %v7693_v19 }
0x314a   :  { %v7013_v43 = vpop.f32.mrf.mxu0 }
0x314b   :  { %7026 = vrot.lane.b32.xlu1 %v7013_v43, %s10322_s24 }
0x314c   :  { %v8502_v44 = vpop.f32.mrf.mxu0 }
0x31bd   :  { %v7027_v25 = vpop.permute.xlu1 %7026 }
0x31be   :  { %v7031_v51 = vsel %vm904_vm4, %v7030_v14, %v7027_v25 }
0x31bf   :  { %8512 = vmatmul.mubr.msk.f32.vlgmr.msra.gmra.mxu0 %vm147_vm0, %v7031_v51 }
0x31c0   :  { %8526 = vmatpush3.msra.mxu0 %v7693_v19 }
0x31c1   :  { %8527 = vmatprep.subr.mxu0 %v7692_v20 }
0x31c2   :  { %8528 = vmatpush3.msra.mxu0 %v7692_v20 }
0x31c3   :  { %8529 = vmatprep.subr.mxu0 %v7691_v21 }
0x31c4   :  { %8530 = vmatpush3.msra.mxu0 %v7691_v21 }
0x31c5   :  { %8531 = vmatprep.subr.mxu0 %v7690_v59 }
0x31c6   :  { %8532 = vmatpush3.msra.mxu0 %v7690_v59 }
0x31c7   :  { %8533 = vmatprep.subr.mxu0 %v7689_v30 }
0x31c8   :  { %8534 = vmatpush3.msra.mxu0 %v7689_v30 }
0x31c9   :  { %8535 = vmatprep.subr.mxu0 %v7688_v13 }
0x31ca   :  { %8536 = vmatpush3.msra.mxu0 %v7688_v13  ;;  %v7702_v13 = vld [vmem:[%s10331_s10] ss:$0 sm:$0xff] }
0x31cb   :  { %8537 = vmatprep.subr.mxu0 %v7687_v37 }
0x31cc   :  { %8538 = vmatpush3.msra.mxu0 %v7687_v37 }
0x31cd   :  { %8539 = vmatprep.subr.mxu0 %v7686_v6 }
0x31ce   :  { %8540 = vmatpush3.msra.mxu0 %v7686_v6 }
0x327f   :  { %v8513_v2 = vpop.f32.mrf.mxu0 }
0x3280   :  { %v7123_v3 = vadd.f32 %v8513_v2, %v7675_v5 }
0x3281   :  { %v7117_v11 = vpop.f32.mrf.mxu0 }
0x3282   :  { %v7127_v52 = vadd.f32 %v7123_v3, %v9881_v8  ;;  %v7118_v53 = vadd.f32 %v7675_v5, %v7117_v11 }
0x3284   :  { %v7126_v54 = vadd.f32 %v7118_v53, %v9879_v56  ;;  %v7135_v55 = vsel %vm147_vm0, %v7127_v52, 0.0  ;;  %v7178_v56 = vld [vmem:[#allocation8 + $0x38] sm:$0xff] }
0x3285   :  { %7136 = vadd.xlane.f32.xlu1 %v7135_v55  ;;  %8514 = vmatprep.subr.mxu1 %v7178_v56 }
0x3286   :  { %v7132_v57 = vsel %vm147_vm0, %v7126_v54, 0.0  ;;  %8515 = vmatpush3.msra.mxu1 %v7178_v56  ;;  %v7701_v56 = vld [vmem:[%s10254_s20 + $0x1] ss:$0 sm:$0xff] }
0x3287   :  { %7133 = vadd.xlane.f32.xlu0 %v7132_v57  ;;  %8516 = vmatprep.subr.mxu1 %v7177_v16 }
0x3288   :  { %8517 = vmatpush3.msra.mxu1 %v7177_v16 }
0x3289   :  { %8518 = vmatprep.subr.mxu1 %v7176_v17 }
0x328a   :  { %8519 = vmatpush3.msra.mxu1 %v7176_v17 }
0x328b   :  { %8520 = vmatprep.subr.mxu1 %v7175_v18 }
0x328c   :  { %8521 = vmatpush3.msra.mxu1 %v7175_v18 }
0x330e   :  { %v7137_v58 = vpop.xlane.xlu1 %7136 }
0x330f   :  { %v7139_v60 = vmul.f32 0.03125, %v7137_v58 }
0x3310   :  { %v7134_v61 = vpop.xlane.xlu0 %7133 }
0x3311   :  { %v7138_v4 = vmul.f32 0.03125, %v7134_v61  ;;  %v7141_v7 = vsub.f32 %v7127_v52, %v7139_v60 }
0x3313   :  { %v7140_v9 = vsub.f32 %v7126_v54, %v7138_v4  ;;  %v7143_v15 = vmul.f32 %v7141_v7, %v7141_v7 }
0x3315   :  { %v7142_v12 = vmul.f32 %v7140_v9, %v7140_v9  ;;  %v7147_v8 = vsel %vm147_vm0, %v7143_v15, 0.0 }
0x3317   :  { %v7144_v10 = vsel %vm147_vm0, %v7142_v12, 0.0 }
0x3318   :  { %7145 = vadd.xlane.f32.xlu0 %v7144_v10  ;;  %v7700_v10 = vld [vmem:[%s10253_s19 + $0x1] ss:$0 sm:$0xff] }
0x331c   :  { %7148 = vadd.xlane.f32.xlu0 %v7147_v8 }
0x33a1   :  { %v7146_v22 = vpop.xlane.xlu0 %7145 }
0x33a2   :  { %v7150_v62 = vmul.f32 0.03125, %v7146_v22 }
0x33a4   :  { %v7152_v24 = vadd.f32 1e-05, %v7150_v62 }
0x33a5   :  { %v7149_v26 = vpop.xlane.xlu0 %7148 }
0x33a6   :  { %8711 = vrsqrt.f32 %v7152_v24  ;;  %v7151_v28 = vmul.f32 0.03125, %v7149_v26 }
0x33a8   :  { %v7153_v0 = vadd.f32 1e-05, %v7151_v28 }
0x33aa   :  { %8713 = vrsqrt.f32 %v7153_v0 }
0x33b3   :  { %v8712_v31 = vpop.eup %8711 }
0x33b4   :  { %v7156_v27 = vmul.f32 %v8712_v31, %v7140_v9 }
0x33b6   :  { %v7164_v32 = vmul.f32 %v7680_v33, %v7156_v27 }
0x33b7   :  { %v8714_v34 = vpop.eup %8713 }
0x33b8   :  { %v7157_v35 = vmul.f32 %v8714_v34, %v7141_v7  ;;  %v7172_v36 = vadd.f32 %v7681_v63, %v7164_v32 }
0x33ba   :  { %v7165_v29 = vmul.f32 %v7680_v33, %v7157_v35  ;;  %8522 = vmatprep.mubr.msk.f32.mxu1 %vm147_vm0, %v7172_v36 }
0x33bc   :  { %v7173_v47 = vadd.f32 %v7681_v63, %v7165_v29 }
0x33be   :  { %8523 = vmatmul.mubr.msk.f32.vlgmr.msra.gmra.mxu1 %vm147_vm0, %v7173_v47 }
0x347e   :  { %v8524_v39 = vpop.f32.mrf.mxu1 }
0x347f   :  { %v7265_v40 = vadd.f32 %v8524_v39, %v7683_v38 }
0x3480   :  { %v7259_v50 = vpop.f32.mrf.mxu1 }
0x3481   :  { %v7260_v23 = vadd.f32 %v7683_v38, %v7259_v50  ;;  %v7269_v42 = vmax.f32 %v7265_v40, 0.0  ;;  %v7703_v38 = vld [vmem:[%s10332_s3] ss:$0 sm:$0xff] }
0x3483   :  { %v7268_v1 = vmax.f32 %v7260_v23, 0.0 }
0x3485   :  { %8541 = vmatprep.mubr.msk.f32.mxu0 %vm3649_vm7, %v7268_v1 }
0x3486   :  { %8542 = vmatmul.mubr.msk.f32.vlgmr.msra.gmra.mxu0 %vm3649_vm7, %v7269_v42 }
0x3546   :  { %v8543_v41 = vpop.f32.mrf.mxu0 }
0x3547   :  { %v7365_v43 = vadd.f32 %v8543_v41, %v7695_v45 }
0x3548   :  { %v7359_v44 = vpop.f32.mrf.mxu0 }
0x3549   :  { %v7369_v46 = vadd.f32 %v7365_v43, %v7173_v47  ;;  %v7360_v48 = vadd.f32 %v7695_v45, %v7359_v44 }
0x354b   :  { %v7368_v49 = vadd.f32 %v7360_v48, %v7172_v36  ;;  %v7377_v14 = vsel %vm147_vm0, %v7369_v46, 0.0 }
0x354c   :  { %7378 = vadd.xlane.f32.xlu0 %v7377_v14 }
0x354d   :  { %v7374_v25 = vsel %vm147_vm0, %v7368_v49, 0.0 }
0x354e   :  { %7375 = vadd.xlane.f32.xlu1 %v7374_v25 }
0x35d5   :  { %v7379_v51 = vpop.xlane.xlu0 %7378 }
0x35d6   :  { %v7381_v5 = vmul.f32 0.03125, %v7379_v51 }
0x35d7   :  { %v7376_v2 = vpop.xlane.xlu1 %7375 }
0x35d8   :  { %v7383_v3 = vsub.f32 %v7369_v46, %v7381_v5  ;;  %v7380_v11 = vmul.f32 0.03125, %v7376_v2 }
0x35da   :  { %v7382_v52 = vsub.f32 %v7368_v49, %v7380_v11  ;;  %v7385_v53 = vmul.f32 %v7383_v3, %v7383_v3 }
0x35dc   :  { %v7389_v54 = vsel %vm147_vm0, %v7385_v53, 0.0  ;;  %v7384_v55 = vmul.f32 %v7382_v52, %v7382_v52 }
0x35dd   :  { %7390 = vadd.xlane.f32.xlu0 %v7389_v54 }
0x35de   :  { %v7386_v57 = vsel %vm147_vm0, %v7384_v55, 0.0 }
0x35df   :  { %7387 = vadd.xlane.f32.xlu1 %v7386_v57 }
0x3666   :  { %v7391_v58 = vpop.xlane.xlu0 %7390 }
0x3667   :  { %v7393_v60 = vmul.f32 0.03125, %v7391_v58 }
0x3668   :  { %v7388_v61 = vpop.xlane.xlu1 %7387 }
0x3669   :  { %v7395_v4 = vadd.f32 1e-05, %v7393_v60  ;;  %v7392_v7 = vmul.f32 0.03125, %v7388_v61 }
0x366b   :  { %8715 = vrsqrt.f32 %v7395_v4  ;;  %v7394_v9 = vadd.f32 1e-05, %v7392_v7 }
0x366d   :  { %8717 = vrsqrt.f32 %v7394_v9 }
0x3678   :  { %v8716_v12 = vpop.eup %8715 }
0x3679   :  { %v7399_v15 = vmul.f32 %v8716_v12, %v7383_v3 }
0x367a   :  { %v8718_v8 = vpop.eup %8717 }
0x367b   :  { %v7407_v16 = vmul.f32 %v7700_v10, %v7399_v15  ;;  %v7398_v17 = vmul.f32 %v8718_v8, %v7382_v52 }
0x367d   :  { %v7415_v18 = vadd.f32 %v7701_v56, %v7407_v16  ;;  %v7406_v19 = vmul.f32 %v7700_v10, %v7398_v17 }
0x367f   :  { %v7421_v20 = vsel %vm147_vm0, %v7415_v18, 0.0  ;;  %v7414_v21 = vadd.f32 %v7701_v56, %v7406_v19 }
0x3680   :  { %7422 = vadd.xlane.f32.xlu0 %v7421_v20 }
0x3681   :  { %v7418_v59 = vsel %vm147_vm0, %v7414_v21, 0.0 }
0x3682   :  { %7419 = vadd.xlane.f32.xlu1 %v7418_v59 }
0x3709   :  { %v7423_v22 = vpop.xlane.xlu0 %7422 }
0x370a   :  { %v7425_v62 = vmul.f32 0.03125, %v7423_v22 }
0x370b   :  { %v7420_v24 = vpop.xlane.xlu1 %7419 }
0x370c   :  { %v7427_v26 = vsub.f32 %v7415_v18, %v7425_v62  ;;  %v7424_v28 = vmul.f32 0.03125, %v7420_v24 }
0x370e   :  { %v7426_v0 = vsub.f32 %v7414_v21, %v7424_v28  ;;  %v7429_v31 = vmul.f32 %v7427_v26, %v7427_v26 }
0x3710   :  { %v7433_v33 = vsel %vm147_vm0, %v7429_v31, 0.0  ;;  %v7428_v27 = vmul.f32 %v7426_v0, %v7426_v0 }
0x3711   :  { %7434 = vadd.xlane.f32.xlu0 %v7433_v33 }
0x3712   :  { %v7430_v63 = vsel %vm147_vm0, %v7428_v27, 0.0 }
0x3713   :  { %7431 = vadd.xlane.f32.xlu1 %v7430_v63 }
0x379a   :  { %v7435_v32 = vpop.xlane.xlu0 %7434 }
0x379b   :  { %v7437_v34 = vmul.f32 0.03125, %v7435_v32 }
0x379c   :  { %v7432_v35 = vpop.xlane.xlu1 %7431 }
0x379d   :  { %v7439_v36 = vadd.f32 1e-05, %v7437_v34  ;;  %v7436_v29 = vmul.f32 0.03125, %v7432_v35 }
0x379f   :  { %8719 = vrsqrt.f32 %v7439_v36  ;;  %v7438_v47 = vadd.f32 1e-05, %v7436_v29 }
0x37a1   :  { %8721 = vrsqrt.f32 %v7438_v47 }
0x37ac   :  { %v8720_v30 = vpop.eup %8719 }
0x37ad   :  { %v7443_v37 = vmul.f32 %v8720_v30, %v7427_v26 }
0x37ae   :  { %v8722_v6 = vpop.eup %8721 }
0x37af   :  { %v7442_v39 = vmul.f32 %v8722_v6, %v7426_v0  ;;  %v7451_v40 = vmul.f32 %v7702_v13, %v7443_v37 }
0x37b1   :  { %v7450_v50 = vmul.f32 %v7702_v13, %v7442_v39  ;;  %v7459_v23 = vadd.f32 %v7703_v38, %v7451_v40 }
0x37b3   :  { %v7458_v1 = vadd.f32 %v7703_v38, %v7450_v50  ;;  %7461 = vst.msk [vmem:[#allocation10 + $0x8] sm:$0xff] %vm147_vm0, %v7459_v23 }
0x37b5   :  { %7460 = vst.msk [vmem:[#allocation10] sm:$0xff] %vm147_vm0, %v7458_v1 }
0x37b6   :  { %8819 = shalt.err (!%p8816_p10)
}
0x37b7   :  { %s10333_s21 = smov 128   ;;  %s10334_s1 = sld [smem:[#allocation27_spill]] }
0x37bd   :  { %7473 = dma.vmem_to_hbm [thread:$0]  %s7468_s29, 256, %s10334_s1, [#allocation4], %s10333_s21, %s10333_s21, %s10320_s27  }
0x37be   :  { %8834 = dma.done.wait [#allocation4], 256  }
0x37bf   :  { %8835 = vsyncadd [#allocation4], 4294967040 }
0x37c0   :  { %7477 = vsyncpa [#allocation3], 1 }
0x37c1   :  { %7478 = vsyncpa [#allocation6], 1 }
0x37c2   :  { %7479 = vsyncpa [#allocation9], 1 }
0x37c3   :  { %7480 = vsyncpa [#allocation4], 1 }

</bundles_post_ra>
